<compile_context>
chip_gen: v7x
topology: tpu7x:2x2x1
jax: 0.10.0
libtpu: 0.0.40
codegen_flags: <defaults>
</compile_context>

<pallas_src>
import functools

import numpy as np
import jax
import jax.numpy as jnp
from jax.experimental import pallas as pl
from jax.experimental.pallas import tpu as pltpu


# ---------------------------------------------------------------------------
# host-side helpers
# ---------------------------------------------------------------------------
def _bilinear_matrix(n_in, n_out):
    """1-D bilinear interpolation matrix, PyTorch align_corners=True semantics."""
    m = np.zeros((n_out, n_in), dtype=np.float32)
    if n_in == 1 or n_out == 1:
        m[:, 0] = 1.0
        return m
    scale = (n_in - 1) / (n_out - 1)
    for i in range(n_out):
        src = i * scale
        i0 = min(int(np.floor(src)), n_in - 1)
        i1 = min(i0 + 1, n_in - 1)
        frac = src - i0
        m[i, i0] += 1.0 - frac
        m[i, i1] += frac
    return m


def _upsample_kron(h, w, ho, wo):
    """(H*W, Ho*Wo) matrix s.t. x_flat @ K == row-major-flatten(bilinear_x2(x)) per channel."""
    ah = _bilinear_matrix(h, ho)                       # (Ho, H)
    aw = _bilinear_matrix(w, wo)                       # (Wo, W)
    return np.kron(ah, aw).T.astype(np.float32)        # (H*W, Ho*Wo)


def _stack_weight(w_pt):
    """PyTorch Conv2d weight (Cout, Cin, 3, 3) -> (9, Cout, Cin), tap-major k = ky*3+kx."""
    cout, cin = w_pt.shape[0], w_pt.shape[1]
    return jnp.transpose(w_pt, (2, 3, 0, 1)).reshape(9, cout, cin)


# ---------------------------------------------------------------------------
# fused Pallas kernel
# ---------------------------------------------------------------------------
def _fused_block_kernel(x_ref, kup_ref, w1_ref, b1_ref, w2_ref, b2_ref, o_ref,
                        *, ho, wo, imgs):
    # x_ref:   (imgs, Cin, H*W)     flattened input images  (lane dim = H*W)
    # kup_ref: (H*W, Ho*Wo)         separable-Kronecker bilinear-x2 matrix
    # w1_ref:  (9, Cout, Cin)       conv1 weights, one (Cout, Cin) slab per 3x3 tap
    # b1_ref:  (Cout, 1)
    # w2_ref:  (9, Cout, Cout)      conv2 weights
    # b2_ref:  (Cout, 1)
    # o_ref:   (imgs, Cout, Ho*Wo)  flattened outputs (lane dim = Ho*Wo, lane-dense)
    f32 = jnp.float32
    hw = ho * wo
    L = imgs * hw

    # ---- bilinear x2 upsample: one lane-dense MXU matmul per image ----
    ups = [jnp.dot(x_ref[b], kup_ref[...], preferred_element_type=f32)
           for b in range(imgs)]
    act = ups[0] if imgs == 1 else jnp.concatenate(ups, axis=1)        # (Cin, L)

    # ---- boundary masks, built once from an in-kernel iota (no extra HBM input) ----
    # f32 floor-division keeps this to guaranteed-supported VPU ops (no int div/rem).
    pf = jax.lax.broadcasted_iota(jnp.int32, (1, L), 1).astype(f32)
    row_all = jnp.floor(pf / wo)                       # row index in concatenated strip
    col = pf - row_all * wo                            # 0 .. Wo-1
    row = row_all - jnp.floor(row_all / ho) * ho       # 0 .. Ho-1 (per image)
    top = jnp.where(row > 0.5, 1.0, 0.0)               # tap dy=-1 needs h >= 1
    bot = jnp.where(row < ho - 1.5, 1.0, 0.0)          # tap dy=+1 needs h <= Ho-2
    left = jnp.where(col > 0.5, 1.0, 0.0)              # tap dx=-1 needs w >= 1
    right = jnp.where(col < wo - 1.5, 1.0, 0.0)        # tap dx=+1 needs w <= Wo-2

    def tap_mask(dy, dx):
        m = None
        if dy == -1:
            m = top
        elif dy == 1:
            m = bot
        if dx == -1:
            m = left if m is None else m * left
        elif dx == 1:
            m = right if m is None else m * right
        return m

    masks = {(dy, dx): tap_mask(dy, dx) for dy in (-1, 0, 1) for dx in (-1, 0, 1)}

    # ---- 3x3 conv (padding=1, stride=1) + ReLU as 9 accumulated tap matmuls ----
    # Tap (dy,dx) at flat position p needs act[p + dy*Wo + dx]; the shift is an XLU
    # lane-roll (no unaligned lane-offset slice copies) and the boundary mask zeroes
    # both the image edge and anything rolled across image / batch boundaries.
    def conv3x3_relu(a, w_ref, b_ref):
        acc = None
        k = 0
        for dy in (-1, 0, 1):
            for dx in (-1, 0, 1):
                d = dy * wo + dx
                tap = a if d == 0 else pltpu.roll(a, shift=(-d) % L, axis=1)
                m = masks[(dy, dx)]
                if m is not None:
                    tap = tap * m
                part = jnp.dot(w_ref[k], tap, preferred_element_type=f32)
                acc = part if acc is None else acc + part
                k += 1
        return jnp.maximum(acc + b_ref[...], 0.0)

    y1 = conv3x3_relu(act, w1_ref, b1_ref)             # (Cout, L)   conv1 + ReLU
    y2 = conv3x3_relu(y1, w2_ref, b2_ref)              # (Cout, L)   conv2 + ReLU

    # ---- lane-dense output stores (aligned, hw-multiple lane offsets) ----
    if imgs == 1:
        o_ref[0] = y2.astype(o_ref.dtype)
    else:
        for b in range(imgs):
            o_ref[b] = y2[:, b * hw:(b + 1) * hw].astype(o_ref.dtype)


# ---------------------------------------------------------------------------
# wrapper
# ---------------------------------------------------------------------------
def upsample_block_forward(x_nchw, params, *, images_per_step=1):
    """UpsampleBlock.forward (NCHW in / NCHW out), one fused Pallas call.

    params use PyTorch layouts: w1 (Cout, Cin, 3, 3), b1 (Cout,),
                                w2 (Cout, Cout, 3, 3), b2 (Cout,).
    images_per_step: images folded into the lane axis of every matmul per grid step.
      Use 1 on v7x (keeps >= 2 parallel grid steps for its 2 TensorCores); on
      single-TC v5e/v6e, images_per_step = N amortizes MXU weight loads best.
    """
    n, cin, h, w = x_nchw.shape
    ho, wo = 2 * h, 2 * w
    hw_in, hw_out = h * w, ho * wo
    cout = params["w1"].shape[0]
    imgs = images_per_step
    assert n % imgs == 0, (n, imgs)

    # TODO(synk): for large spatial sizes (hw_in*hw_out*4B beyond a few MiB) switch the
    # Kronecker matrix back to two separable 1-D interpolation matmuls and add an HW
    # grid axis sized against the per-generation VMEM budget (v7x: 64 MiB physical).
    kup = jnp.asarray(_upsample_kron(h, w, ho, wo))                 # (H*W, Ho*Wo)
    w1s = _stack_weight(params["w1"])                               # (9, Cout, Cin)
    w2s = _stack_weight(params["w2"])                               # (9, Cout, Cout)
    b1c = params["b1"].reshape(cout, 1)
    b2c = params["b2"].reshape(cout, 1)

    # Only the tiny input is relaid-out in HBM; the fat intermediates stay in VMEM.
    x_flat = x_nchw.reshape(n, cin, hw_in)

    flops = n * (2 * cin * hw_in * hw_out
                 + 18 * cout * cin * hw_out
                 + 18 * cout * cout * hw_out)
    bytes_accessed = 4 * (n * cin * hw_in + hw_in * hw_out
                          + 9 * cout * cin + 9 * cout * cout + 2 * cout
                          + n * cout * hw_out)

    out_flat = pl.pallas_call(
        functools.partial(_fused_block_kernel, ho=ho, wo=wo, imgs=imgs),
        out_shape=jax.ShapeDtypeStruct((n, cout, hw_out), jnp.float32),
        grid_spec=pltpu.PrefetchScalarGridSpec(
            num_scalar_prefetch=0,
            grid=(n // imgs,),
            in_specs=[
                pl.BlockSpec((imgs, cin, hw_in), lambda i: (i, 0, 0)),
                pl.BlockSpec((hw_in, hw_out), lambda i: (0, 0)),
                pl.BlockSpec((9, cout, cin), lambda i: (0, 0, 0)),
                pl.BlockSpec((cout, 1), lambda i: (0, 0)),
                pl.BlockSpec((9, cout, cout), lambda i: (0, 0, 0)),
                pl.BlockSpec((cout, 1), lambda i: (0, 0)),
            ],
            out_specs=pl.BlockSpec((imgs, cout, hw_out), lambda i: (i, 0, 0)),
        ),
        compiler_params=pltpu.CompilerParams(dimension_semantics=("parallel",)),
        cost_estimate=pl.CostEstimate(flops=flops, transcendentals=0,
                                      bytes_accessed=bytes_accessed),
    )(x_flat, kup, w1s, b1c, w2s, b2c)

    # The module's consumer expects NCHW; this reshape is the one small HBM relayout.
    return out_flat.reshape(n, cout, ho, wo)


# ---------------------------------------------------------------------------
# pure-JAX reference (sanity check only)
# ---------------------------------------------------------------------------
def reference_forward(x_nchw, params):
    n, c, h, w = x_nchw.shape
    a = jnp.asarray(_bilinear_matrix(h, 2 * h))
    b = jnp.asarray(_bilinear_matrix(w, 2 * w))
    hi = jax.lax.Precision.HIGHEST
    x = jnp.einsum("oh,nchw->ncow", a, x_nchw, precision=hi)
    x = jnp.einsum("pw,ncow->ncop", b, x, precision=hi)

    def conv(x, w_pt, bias):
        y = jax.lax.conv_general_dilated(
            x, w_pt, window_strides=(1, 1), padding=((1, 1), (1, 1)),
            dimension_numbers=("NCHW", "OIHW", "NCHW"), precision=hi)
        return jnp.maximum(y + bias[None, :, None, None], 0.0)

    x = conv(x, params["w1"], params["b1"])
    return conv(x, params["w2"], params["b2"])


# ---------------------------------------------------------------------------
if __name__ == "__main__":
    N, Cin, Cout, H, W = 2, 4, 8, 16, 16

    key = jax.random.PRNGKey(0)
    kx, kw1, kb1, kw2, kb2 = jax.random.split(key, 5)

    x = jax.random.normal(kx, (N, Cin, H, W), dtype=jnp.float32)
    params = {  # PyTorch Conv2d layouts: weight (Cout, Cin, kh, kw), bias (Cout,)
        "w1": 0.1 * jax.random.normal(kw1, (Cout, Cin, 3, 3), dtype=jnp.float32),
        "b1": 0.1 * jax.random.normal(kb1, (Cout,), dtype=jnp.float32),
        "w2": 0.1 * jax.random.normal(kw2, (Cout, Cout, 3, 3), dtype=jnp.float32),
        "b2": 0.1 * jax.random.normal(kb2, (Cout,), dtype=jnp.float32),
    }

    out = jax.block_until_ready(upsample_block_forward(x, params))
    assert out.shape == (N, Cout, 2 * H, 2 * W), out.shape

    ref = jax.block_until_ready(reference_forward(x, params))
    max_err = float(jnp.max(jnp.abs(out - ref)))
    assert max_err < 1e-4, f"mismatch vs reference: {max_err}"

    print("KERNEL_OK")
</pallas_src>

<mosaic_0001>
module attributes {stable_mosaic.version = 11 : i64} {
  func.func @_fused_block_kernel(%arg0: i32, %arg1: memref<1x4x256xf32, #tpu.memory_space<vmem>>, %arg2: memref<256x1024xf32, #tpu.memory_space<vmem>>, %arg3: memref<9x8x4xf32, #tpu.memory_space<vmem>>, %arg4: memref<8x1xf32, #tpu.memory_space<vmem>>, %arg5: memref<9x8x8xf32, #tpu.memory_space<vmem>>, %arg6: memref<8x1xf32, #tpu.memory_space<vmem>>, %arg7: memref<1x8x1024xf32, #tpu.memory_space<vmem>>) attributes {dimension_semantics = [#tpu.dimension_semantics<parallel>], iteration_bounds = array<i64: 2>, scalar_prefetch = 0 : i64, scratch_operands = 0 : i64, tpu.core_type = #tpu.core_type<tc>, window_params = [{transform_indices = @transform_0, window_bounds = array<i64: 1, 4, 256>}, {pipeline_mode = #tpu.pipeline_mode<synchronous>, transform_indices = @transform_1, window_bounds = array<i64: 256, 1024>}, {pipeline_mode = #tpu.pipeline_mode<synchronous>, transform_indices = @transform_2, window_bounds = array<i64: 9, 8, 4>}, {pipeline_mode = #tpu.pipeline_mode<synchronous>, transform_indices = @transform_3, window_bounds = array<i64: 8, 1>}, {pipeline_mode = #tpu.pipeline_mode<synchronous>, transform_indices = @transform_4, window_bounds = array<i64: 9, 8, 8>}, {pipeline_mode = #tpu.pipeline_mode<synchronous>, transform_indices = @transform_5, window_bounds = array<i64: 8, 1>}, {transform_indices = @transform_6, window_bounds = array<i64: 1, 8, 1024>}]} {
    %c0 = arith.constant 0 : index
    %c0_0 = arith.constant 0 : index
    %c0_1 = arith.constant 0 : index
    %0 = vector.load %arg1[%c0, %c0_0, %c0_1] : memref<1x4x256xf32, #tpu.memory_space<vmem>>, vector<1x4x256xf32>
    %1 = vector.shape_cast %0 : vector<1x4x256xf32> to vector<4x256xf32>
    %c0_2 = arith.constant 0 : index
    %c0_3 = arith.constant 0 : index
    %2 = vector.load %arg2[%c0_2, %c0_3] : memref<256x1024xf32, #tpu.memory_space<vmem>>, vector<256x1024xf32>
    %cst = arith.constant dense<0.000000e+00> : vector<4x1024xf32>
    %3 = tpu.matmul %1, %2, %cst {dimension_numbers = #tpu.dot_dimension_numbers<[1], [0], [0], [1], [0, 0, 1, 1], [], []>} : vector<4x256xf32>, vector<256x1024xf32>, vector<4x1024xf32> -> vector<4x1024xf32>
    %4 = tpu.iota {dimensions = array<i32: 1>} : vector<1x1024xi32>
    %5 = arith.sitofp %4 : vector<1x1024xi32> to vector<1x1024xf32>
    %cst_4 = arith.constant 3.200000e+01 : f32
    %6 = vector.broadcast %cst_4 : f32 to vector<1x1024xf32>
    %7 = arith.divf %5, %6 : vector<1x1024xf32>
    %8 = math.floor %7 : vector<1x1024xf32>
    %cst_5 = arith.constant 3.200000e+01 : f32
    %9 = vector.broadcast %cst_5 : f32 to vector<1x1024xf32>
    %10 = arith.mulf %8, %9 : vector<1x1024xf32>
    %11 = arith.subf %5, %10 : vector<1x1024xf32>
    %cst_6 = arith.constant 3.200000e+01 : f32
    %12 = vector.broadcast %cst_6 : f32 to vector<1x1024xf32>
    %13 = arith.divf %8, %12 : vector<1x1024xf32>
    %14 = math.floor %13 : vector<1x1024xf32>
    %cst_7 = arith.constant 3.200000e+01 : f32
    %15 = vector.broadcast %cst_7 : f32 to vector<1x1024xf32>
    %16 = arith.mulf %14, %15 : vector<1x1024xf32>
    %17 = arith.subf %8, %16 : vector<1x1024xf32>
    %cst_8 = arith.constant 5.000000e-01 : f32
    %18 = vector.broadcast %cst_8 : f32 to vector<1x1024xf32>
    %19 = arith.cmpf ogt, %17, %18 : vector<1x1024xf32>
    %cst_9 = arith.constant 1.000000e+00 : f32
    %cst_10 = arith.constant 0.000000e+00 : f32
    %20 = vector.broadcast %cst_9 : f32 to vector<1x1024xf32>
    %21 = vector.broadcast %cst_10 : f32 to vector<1x1024xf32>
    %22 = arith.select %19, %20, %21 : vector<1x1024xi1>, vector<1x1024xf32>
    %cst_11 = arith.constant 3.050000e+01 : f32
    %23 = vector.broadcast %cst_11 : f32 to vector<1x1024xf32>
    %24 = arith.cmpf olt, %17, %23 : vector<1x1024xf32>
    %cst_12 = arith.constant 1.000000e+00 : f32
    %cst_13 = arith.constant 0.000000e+00 : f32
    %25 = vector.broadcast %cst_12 : f32 to vector<1x1024xf32>
    %26 = vector.broadcast %cst_13 : f32 to vector<1x1024xf32>
    %27 = arith.select %24, %25, %26 : vector<1x1024xi1>, vector<1x1024xf32>
    %cst_14 = arith.constant 5.000000e-01 : f32
    %28 = vector.broadcast %cst_14 : f32 to vector<1x1024xf32>
    %29 = arith.cmpf ogt, %11, %28 : vector<1x1024xf32>
    %cst_15 = arith.constant 1.000000e+00 : f32
    %cst_16 = arith.constant 0.000000e+00 : f32
    %30 = vector.broadcast %cst_15 : f32 to vector<1x1024xf32>
    %31 = vector.broadcast %cst_16 : f32 to vector<1x1024xf32>
    %32 = arith.select %29, %30, %31 : vector<1x1024xi1>, vector<1x1024xf32>
    %cst_17 = arith.constant 3.050000e+01 : f32
    %33 = vector.broadcast %cst_17 : f32 to vector<1x1024xf32>
    %34 = arith.cmpf olt, %11, %33 : vector<1x1024xf32>
    %cst_18 = arith.constant 1.000000e+00 : f32
    %cst_19 = arith.constant 0.000000e+00 : f32
    %35 = vector.broadcast %cst_18 : f32 to vector<1x1024xf32>
    %36 = vector.broadcast %cst_19 : f32 to vector<1x1024xf32>
    %37 = arith.select %34, %35, %36 : vector<1x1024xi1>, vector<1x1024xf32>
    %38 = arith.mulf %22, %32 : vector<1x1024xf32>
    %39 = arith.mulf %22, %37 : vector<1x1024xf32>
    %40 = arith.mulf %27, %32 : vector<1x1024xf32>
    %41 = arith.mulf %27, %37 : vector<1x1024xf32>
    %c33_i32 = arith.constant 33 : i32
    %42 = tpu.dynamic_rotate %3 by %c33_i32 dim 1 : vector<4x1024xf32>, i32 -> vector<4x1024xf32>
    %43 = vector.broadcast %38 : vector<1x1024xf32> to vector<4x1024xf32>
    %44 = arith.mulf %42, %43 : vector<4x1024xf32>
    %c0_20 = arith.constant 0 : index
    %c0_21 = arith.constant 0 : index
    %c0_22 = arith.constant 0 : index
    %45 = vector.load %arg3[%c0_20, %c0_21, %c0_22] : memref<9x8x4xf32, #tpu.memory_space<vmem>>, vector<1x8x4xf32>
    %46 = vector.shape_cast %45 : vector<1x8x4xf32> to vector<8x4xf32>
    %cst_23 = arith.constant dense<0.000000e+00> : vector<8x1024xf32>
    %47 = tpu.matmul %46, %44, %cst_23 {dimension_numbers = #tpu.dot_dimension_numbers<[1], [0], [0], [1], [0, 0, 1, 1], [], []>} : vector<8x4xf32>, vector<4x1024xf32>, vector<8x1024xf32> -> vector<8x1024xf32>
    %c32_i32 = arith.constant 32 : i32
    %48 = tpu.dynamic_rotate %3 by %c32_i32 dim 1 : vector<4x1024xf32>, i32 -> vector<4x1024xf32>
    %49 = vector.broadcast %22 : vector<1x1024xf32> to vector<4x1024xf32>
    %50 = arith.mulf %48, %49 : vector<4x1024xf32>
    %c1 = arith.constant 1 : index
    %c0_24 = arith.constant 0 : index
    %c0_25 = arith.constant 0 : index
    %51 = vector.load %arg3[%c1, %c0_24, %c0_25] : memref<9x8x4xf32, #tpu.memory_space<vmem>>, vector<1x8x4xf32>
    %52 = vector.shape_cast %51 : vector<1x8x4xf32> to vector<8x4xf32>
    %cst_26 = arith.constant dense<0.000000e+00> : vector<8x1024xf32>
    %53 = tpu.matmul %52, %50, %cst_26 {dimension_numbers = #tpu.dot_dimension_numbers<[1], [0], [0], [1], [0, 0, 1, 1], [], []>} : vector<8x4xf32>, vector<4x1024xf32>, vector<8x1024xf32> -> vector<8x1024xf32>
    %54 = arith.addf %47, %53 : vector<8x1024xf32>
    %c31_i32 = arith.constant 31 : i32
    %55 = tpu.dynamic_rotate %3 by %c31_i32 dim 1 : vector<4x1024xf32>, i32 -> vector<4x1024xf32>
    %56 = vector.broadcast %39 : vector<1x1024xf32> to vector<4x1024xf32>
    %57 = arith.mulf %55, %56 : vector<4x1024xf32>
    %c2 = arith.constant 2 : index
    %c0_27 = arith.constant 0 : index
    %c0_28 = arith.constant 0 : index
    %58 = vector.load %arg3[%c2, %c0_27, %c0_28] : memref<9x8x4xf32, #tpu.memory_space<vmem>>, vector<1x8x4xf32>
    %59 = vector.shape_cast %58 : vector<1x8x4xf32> to vector<8x4xf32>
    %cst_29 = arith.constant dense<0.000000e+00> : vector<8x1024xf32>
    %60 = tpu.matmul %59, %57, %cst_29 {dimension_numbers = #tpu.dot_dimension_numbers<[1], [0], [0], [1], [0, 0, 1, 1], [], []>} : vector<8x4xf32>, vector<4x1024xf32>, vector<8x1024xf32> -> vector<8x1024xf32>
    %61 = arith.addf %54, %60 : vector<8x1024xf32>
    %c1_i32 = arith.constant 1 : i32
    %62 = tpu.dynamic_rotate %3 by %c1_i32 dim 1 : vector<4x1024xf32>, i32 -> vector<4x1024xf32>
    %63 = vector.broadcast %32 : vector<1x1024xf32> to vector<4x1024xf32>
    %64 = arith.mulf %62, %63 : vector<4x1024xf32>
    %c3 = arith.constant 3 : index
    %c0_30 = arith.constant 0 : index
    %c0_31 = arith.constant 0 : index
    %65 = vector.load %arg3[%c3, %c0_30, %c0_31] : memref<9x8x4xf32, #tpu.memory_space<vmem>>, vector<1x8x4xf32>
    %66 = vector.shape_cast %65 : vector<1x8x4xf32> to vector<8x4xf32>
    %cst_32 = arith.constant dense<0.000000e+00> : vector<8x1024xf32>
    %67 = tpu.matmul %66, %64, %cst_32 {dimension_numbers = #tpu.dot_dimension_numbers<[1], [0], [0], [1], [0, 0, 1, 1], [], []>} : vector<8x4xf32>, vector<4x1024xf32>, vector<8x1024xf32> -> vector<8x1024xf32>
    %68 = arith.addf %61, %67 : vector<8x1024xf32>
    %c4 = arith.constant 4 : index
    %c0_33 = arith.constant 0 : index
    %c0_34 = arith.constant 0 : index
    %69 = vector.load %arg3[%c4, %c0_33, %c0_34] : memref<9x8x4xf32, #tpu.memory_space<vmem>>, vector<1x8x4xf32>
    %70 = vector.shape_cast %69 : vector<1x8x4xf32> to vector<8x4xf32>
    %cst_35 = arith.constant dense<0.000000e+00> : vector<8x1024xf32>
    %71 = tpu.matmul %70, %3, %cst_35 {dimension_numbers = #tpu.dot_dimension_numbers<[1], [0], [0], [1], [0, 0, 1, 1], [], []>} : vector<8x4xf32>, vector<4x1024xf32>, vector<8x1024xf32> -> vector<8x1024xf32>
    %72 = arith.addf %68, %71 : vector<8x1024xf32>
    %c1023_i32 = arith.constant 1023 : i32
    %73 = tpu.dynamic_rotate %3 by %c1023_i32 dim 1 : vector<4x1024xf32>, i32 -> vector<4x1024xf32>
    %74 = vector.broadcast %37 : vector<1x1024xf32> to vector<4x1024xf32>
    %75 = arith.mulf %73, %74 : vector<4x1024xf32>
    %c5 = arith.constant 5 : index
    %c0_36 = arith.constant 0 : index
    %c0_37 = arith.constant 0 : index
    %76 = vector.load %arg3[%c5, %c0_36, %c0_37] : memref<9x8x4xf32, #tpu.memory_space<vmem>>, vector<1x8x4xf32>
    %77 = vector.shape_cast %76 : vector<1x8x4xf32> to vector<8x4xf32>
    %cst_38 = arith.constant dense<0.000000e+00> : vector<8x1024xf32>
    %78 = tpu.matmul %77, %75, %cst_38 {dimension_numbers = #tpu.dot_dimension_numbers<[1], [0], [0], [1], [0, 0, 1, 1], [], []>} : vector<8x4xf32>, vector<4x1024xf32>, vector<8x1024xf32> -> vector<8x1024xf32>
    %79 = arith.addf %72, %78 : vector<8x1024xf32>
    %c993_i32 = arith.constant 993 : i32
    %80 = tpu.dynamic_rotate %3 by %c993_i32 dim 1 : vector<4x1024xf32>, i32 -> vector<4x1024xf32>
    %81 = vector.broadcast %40 : vector<1x1024xf32> to vector<4x1024xf32>
    %82 = arith.mulf %80, %81 : vector<4x1024xf32>
    %c6 = arith.constant 6 : index
    %c0_39 = arith.constant 0 : index
    %c0_40 = arith.constant 0 : index
    %83 = vector.load %arg3[%c6, %c0_39, %c0_40] : memref<9x8x4xf32, #tpu.memory_space<vmem>>, vector<1x8x4xf32>
    %84 = vector.shape_cast %83 : vector<1x8x4xf32> to vector<8x4xf32>
    %cst_41 = arith.constant dense<0.000000e+00> : vector<8x1024xf32>
    %85 = tpu.matmul %84, %82, %cst_41 {dimension_numbers = #tpu.dot_dimension_numbers<[1], [0], [0], [1], [0, 0, 1, 1], [], []>} : vector<8x4xf32>, vector<4x1024xf32>, vector<8x1024xf32> -> vector<8x1024xf32>
    %86 = arith.addf %79, %85 : vector<8x1024xf32>
    %c992_i32 = arith.constant 992 : i32
    %87 = tpu.dynamic_rotate %3 by %c992_i32 dim 1 : vector<4x1024xf32>, i32 -> vector<4x1024xf32>
    %88 = vector.broadcast %27 : vector<1x1024xf32> to vector<4x1024xf32>
    %89 = arith.mulf %87, %88 : vector<4x1024xf32>
    %c7 = arith.constant 7 : index
    %c0_42 = arith.constant 0 : index
    %c0_43 = arith.constant 0 : index
    %90 = vector.load %arg3[%c7, %c0_42, %c0_43] : memref<9x8x4xf32, #tpu.memory_space<vmem>>, vector<1x8x4xf32>
    %91 = vector.shape_cast %90 : vector<1x8x4xf32> to vector<8x4xf32>
    %cst_44 = arith.constant dense<0.000000e+00> : vector<8x1024xf32>
    %92 = tpu.matmul %91, %89, %cst_44 {dimension_numbers = #tpu.dot_dimension_numbers<[1], [0], [0], [1], [0, 0, 1, 1], [], []>} : vector<8x4xf32>, vector<4x1024xf32>, vector<8x1024xf32> -> vector<8x1024xf32>
    %93 = arith.addf %86, %92 : vector<8x1024xf32>
    %c991_i32 = arith.constant 991 : i32
    %94 = tpu.dynamic_rotate %3 by %c991_i32 dim 1 : vector<4x1024xf32>, i32 -> vector<4x1024xf32>
    %95 = vector.broadcast %41 : vector<1x1024xf32> to vector<4x1024xf32>
    %96 = arith.mulf %94, %95 : vector<4x1024xf32>
    %c8 = arith.constant 8 : index
    %c0_45 = arith.constant 0 : index
    %c0_46 = arith.constant 0 : index
    %97 = vector.load %arg3[%c8, %c0_45, %c0_46] : memref<9x8x4xf32, #tpu.memory_space<vmem>>, vector<1x8x4xf32>
    %98 = vector.shape_cast %97 : vector<1x8x4xf32> to vector<8x4xf32>
    %cst_47 = arith.constant dense<0.000000e+00> : vector<8x1024xf32>
    %99 = tpu.matmul %98, %96, %cst_47 {dimension_numbers = #tpu.dot_dimension_numbers<[1], [0], [0], [1], [0, 0, 1, 1], [], []>} : vector<8x4xf32>, vector<4x1024xf32>, vector<8x1024xf32> -> vector<8x1024xf32>
    %100 = arith.addf %93, %99 : vector<8x1024xf32>
    %c0_48 = arith.constant 0 : index
    %c0_49 = arith.constant 0 : index
    %101 = vector.load %arg4[%c0_48, %c0_49] : memref<8x1xf32, #tpu.memory_space<vmem>>, vector<8x1xf32>
    %102 = vector.broadcast %101 : vector<8x1xf32> to vector<8x1024xf32>
    %103 = arith.addf %100, %102 : vector<8x1024xf32>
    %cst_50 = arith.constant 0.000000e+00 : f32
    %104 = vector.broadcast %cst_50 : f32 to vector<8x1024xf32>
    %105 = arith.maximumf %103, %104 : vector<8x1024xf32>
    %c33_i32_51 = arith.constant 33 : i32
    %106 = tpu.dynamic_rotate %105 by %c33_i32_51 dim 1 : vector<8x1024xf32>, i32 -> vector<8x1024xf32>
    %107 = vector.broadcast %38 : vector<1x1024xf32> to vector<8x1024xf32>
    %108 = arith.mulf %106, %107 : vector<8x1024xf32>
    %c0_52 = arith.constant 0 : index
    %c0_53 = arith.constant 0 : index
    %c0_54 = arith.constant 0 : index
    %109 = vector.load %arg5[%c0_52, %c0_53, %c0_54] : memref<9x8x8xf32, #tpu.memory_space<vmem>>, vector<1x8x8xf32>
    %110 = vector.shape_cast %109 : vector<1x8x8xf32> to vector<8x8xf32>
    %cst_55 = arith.constant dense<0.000000e+00> : vector<8x1024xf32>
    %111 = tpu.matmul %110, %108, %cst_55 {dimension_numbers = #tpu.dot_dimension_numbers<[1], [0], [0], [1], [0, 0, 1, 1], [], []>} : vector<8x8xf32>, vector<8x1024xf32>, vector<8x1024xf32> -> vector<8x1024xf32>
    %c32_i32_56 = arith.constant 32 : i32
    %112 = tpu.dynamic_rotate %105 by %c32_i32_56 dim 1 : vector<8x1024xf32>, i32 -> vector<8x1024xf32>
    %113 = vector.broadcast %22 : vector<1x1024xf32> to vector<8x1024xf32>
    %114 = arith.mulf %112, %113 : vector<8x1024xf32>
    %c1_57 = arith.constant 1 : index
    %c0_58 = arith.constant 0 : index
    %c0_59 = arith.constant 0 : index
    %115 = vector.load %arg5[%c1_57, %c0_58, %c0_59] : memref<9x8x8xf32, #tpu.memory_space<vmem>>, vector<1x8x8xf32>
    %116 = vector.shape_cast %115 : vector<1x8x8xf32> to vector<8x8xf32>
    %cst_60 = arith.constant dense<0.000000e+00> : vector<8x1024xf32>
    %117 = tpu.matmul %116, %114, %cst_60 {dimension_numbers = #tpu.dot_dimension_numbers<[1], [0], [0], [1], [0, 0, 1, 1], [], []>} : vector<8x8xf32>, vector<8x1024xf32>, vector<8x1024xf32> -> vector<8x1024xf32>
    %118 = arith.addf %111, %117 : vector<8x1024xf32>
    %c31_i32_61 = arith.constant 31 : i32
    %119 = tpu.dynamic_rotate %105 by %c31_i32_61 dim 1 : vector<8x1024xf32>, i32 -> vector<8x1024xf32>
    %120 = vector.broadcast %39 : vector<1x1024xf32> to vector<8x1024xf32>
    %121 = arith.mulf %119, %120 : vector<8x1024xf32>
    %c2_62 = arith.constant 2 : index
    %c0_63 = arith.constant 0 : index
    %c0_64 = arith.constant 0 : index
    %122 = vector.load %arg5[%c2_62, %c0_63, %c0_64] : memref<9x8x8xf32, #tpu.memory_space<vmem>>, vector<1x8x8xf32>
    %123 = vector.shape_cast %122 : vector<1x8x8xf32> to vector<8x8xf32>
    %cst_65 = arith.constant dense<0.000000e+00> : vector<8x1024xf32>
    %124 = tpu.matmul %123, %121, %cst_65 {dimension_numbers = #tpu.dot_dimension_numbers<[1], [0], [0], [1], [0, 0, 1, 1], [], []>} : vector<8x8xf32>, vector<8x1024xf32>, vector<8x1024xf32> -> vector<8x1024xf32>
    %125 = arith.addf %118, %124 : vector<8x1024xf32>
    %c1_i32_66 = arith.constant 1 : i32
    %126 = tpu.dynamic_rotate %105 by %c1_i32_66 dim 1 : vector<8x1024xf32>, i32 -> vector<8x1024xf32>
    %127 = vector.broadcast %32 : vector<1x1024xf32> to vector<8x1024xf32>
    %128 = arith.mulf %126, %127 : vector<8x1024xf32>
    %c3_67 = arith.constant 3 : index
    %c0_68 = arith.constant 0 : index
    %c0_69 = arith.constant 0 : index
    %129 = vector.load %arg5[%c3_67, %c0_68, %c0_69] : memref<9x8x8xf32, #tpu.memory_space<vmem>>, vector<1x8x8xf32>
    %130 = vector.shape_cast %129 : vector<1x8x8xf32> to vector<8x8xf32>
    %cst_70 = arith.constant dense<0.000000e+00> : vector<8x1024xf32>
    %131 = tpu.matmul %130, %128, %cst_70 {dimension_numbers = #tpu.dot_dimension_numbers<[1], [0], [0], [1], [0, 0, 1, 1], [], []>} : vector<8x8xf32>, vector<8x1024xf32>, vector<8x1024xf32> -> vector<8x1024xf32>
    %132 = arith.addf %125, %131 : vector<8x1024xf32>
    %c4_71 = arith.constant 4 : index
    %c0_72 = arith.constant 0 : index
    %c0_73 = arith.constant 0 : index
    %133 = vector.load %arg5[%c4_71, %c0_72, %c0_73] : memref<9x8x8xf32, #tpu.memory_space<vmem>>, vector<1x8x8xf32>
    %134 = vector.shape_cast %133 : vector<1x8x8xf32> to vector<8x8xf32>
    %cst_74 = arith.constant dense<0.000000e+00> : vector<8x1024xf32>
    %135 = tpu.matmul %134, %105, %cst_74 {dimension_numbers = #tpu.dot_dimension_numbers<[1], [0], [0], [1], [0, 0, 1, 1], [], []>} : vector<8x8xf32>, vector<8x1024xf32>, vector<8x1024xf32> -> vector<8x1024xf32>
    %136 = arith.addf %132, %135 : vector<8x1024xf32>
    %c1023_i32_75 = arith.constant 1023 : i32
    %137 = tpu.dynamic_rotate %105 by %c1023_i32_75 dim 1 : vector<8x1024xf32>, i32 -> vector<8x1024xf32>
    %138 = vector.broadcast %37 : vector<1x1024xf32> to vector<8x1024xf32>
    %139 = arith.mulf %137, %138 : vector<8x1024xf32>
    %c5_76 = arith.constant 5 : index
    %c0_77 = arith.constant 0 : index
    %c0_78 = arith.constant 0 : index
    %140 = vector.load %arg5[%c5_76, %c0_77, %c0_78] : memref<9x8x8xf32, #tpu.memory_space<vmem>>, vector<1x8x8xf32>
    %141 = vector.shape_cast %140 : vector<1x8x8xf32> to vector<8x8xf32>
    %cst_79 = arith.constant dense<0.000000e+00> : vector<8x1024xf32>
    %142 = tpu.matmul %141, %139, %cst_79 {dimension_numbers = #tpu.dot_dimension_numbers<[1], [0], [0], [1], [0, 0, 1, 1], [], []>} : vector<8x8xf32>, vector<8x1024xf32>, vector<8x1024xf32> -> vector<8x1024xf32>
    %143 = arith.addf %136, %142 : vector<8x1024xf32>
    %c993_i32_80 = arith.constant 993 : i32
    %144 = tpu.dynamic_rotate %105 by %c993_i32_80 dim 1 : vector<8x1024xf32>, i32 -> vector<8x1024xf32>
    %145 = vector.broadcast %40 : vector<1x1024xf32> to vector<8x1024xf32>
    %146 = arith.mulf %144, %145 : vector<8x1024xf32>
    %c6_81 = arith.constant 6 : index
    %c0_82 = arith.constant 0 : index
    %c0_83 = arith.constant 0 : index
    %147 = vector.load %arg5[%c6_81, %c0_82, %c0_83] : memref<9x8x8xf32, #tpu.memory_space<vmem>>, vector<1x8x8xf32>
    %148 = vector.shape_cast %147 : vector<1x8x8xf32> to vector<8x8xf32>
    %cst_84 = arith.constant dense<0.000000e+00> : vector<8x1024xf32>
    %149 = tpu.matmul %148, %146, %cst_84 {dimension_numbers = #tpu.dot_dimension_numbers<[1], [0], [0], [1], [0, 0, 1, 1], [], []>} : vector<8x8xf32>, vector<8x1024xf32>, vector<8x1024xf32> -> vector<8x1024xf32>
    %150 = arith.addf %143, %149 : vector<8x1024xf32>
    %c992_i32_85 = arith.constant 992 : i32
    %151 = tpu.dynamic_rotate %105 by %c992_i32_85 dim 1 : vector<8x1024xf32>, i32 -> vector<8x1024xf32>
    %152 = vector.broadcast %27 : vector<1x1024xf32> to vector<8x1024xf32>
    %153 = arith.mulf %151, %152 : vector<8x1024xf32>
    %c7_86 = arith.constant 7 : index
    %c0_87 = arith.constant 0 : index
    %c0_88 = arith.constant 0 : index
    %154 = vector.load %arg5[%c7_86, %c0_87, %c0_88] : memref<9x8x8xf32, #tpu.memory_space<vmem>>, vector<1x8x8xf32>
    %155 = vector.shape_cast %154 : vector<1x8x8xf32> to vector<8x8xf32>
    %cst_89 = arith.constant dense<0.000000e+00> : vector<8x1024xf32>
    %156 = tpu.matmul %155, %153, %cst_89 {dimension_numbers = #tpu.dot_dimension_numbers<[1], [0], [0], [1], [0, 0, 1, 1], [], []>} : vector<8x8xf32>, vector<8x1024xf32>, vector<8x1024xf32> -> vector<8x1024xf32>
    %157 = arith.addf %150, %156 : vector<8x1024xf32>
    %c991_i32_90 = arith.constant 991 : i32
    %158 = tpu.dynamic_rotate %105 by %c991_i32_90 dim 1 : vector<8x1024xf32>, i32 -> vector<8x1024xf32>
    %159 = vector.broadcast %41 : vector<1x1024xf32> to vector<8x1024xf32>
    %160 = arith.mulf %158, %159 : vector<8x1024xf32>
    %c8_91 = arith.constant 8 : index
    %c0_92 = arith.constant 0 : index
    %c0_93 = arith.constant 0 : index
    %161 = vector.load %arg5[%c8_91, %c0_92, %c0_93] : memref<9x8x8xf32, #tpu.memory_space<vmem>>, vector<1x8x8xf32>
    %162 = vector.shape_cast %161 : vector<1x8x8xf32> to vector<8x8xf32>
    %cst_94 = arith.constant dense<0.000000e+00> : vector<8x1024xf32>
    %163 = tpu.matmul %162, %160, %cst_94 {dimension_numbers = #tpu.dot_dimension_numbers<[1], [0], [0], [1], [0, 0, 1, 1], [], []>} : vector<8x8xf32>, vector<8x1024xf32>, vector<8x1024xf32> -> vector<8x1024xf32>
    %164 = arith.addf %157, %163 : vector<8x1024xf32>
    %c0_95 = arith.constant 0 : index
    %c0_96 = arith.constant 0 : index
    %165 = vector.load %arg6[%c0_95, %c0_96] : memref<8x1xf32, #tpu.memory_space<vmem>>, vector<8x1xf32>
    %166 = vector.broadcast %165 : vector<8x1xf32> to vector<8x1024xf32>
    %167 = arith.addf %164, %166 : vector<8x1024xf32>
    %cst_97 = arith.constant 0.000000e+00 : f32
    %168 = vector.broadcast %cst_97 : f32 to vector<8x1024xf32>
    %169 = arith.maximumf %167, %168 : vector<8x1024xf32>
    %c0_98 = arith.constant 0 : index
    %c0_99 = arith.constant 0 : index
    %c0_100 = arith.constant 0 : index
    %170 = vector.load %arg7[%c0_98, %c0_99, %c0_100] : memref<1x8x1024xf32, #tpu.memory_space<vmem>>, vector<1x8x1024xf32>
    %171 = vector.shape_cast %170 : vector<1x8x1024xf32> to vector<8x1024xf32>
    %172 = vector.shape_cast %169 : vector<8x1024xf32> to vector<1x8x1024xf32>
    tpu.vector_store %arg7[%c0_98, %c0_99, %c0_100], %172 {strides = array<i32>} : memref<1x8x1024xf32, #tpu.memory_space<vmem>>, vector<1x8x1024xf32>,
    return
  }
  func.func @transform_0(%arg0: i32) -> (i32, i32, i32) {
    %c0_i32 = arith.constant 0 : i32
    %c0_i32_0 = arith.constant 0 : i32
    %c0_i32_1 = arith.constant 0 : i32
    return %arg0, %c0_i32, %c0_i32_0 : i32, i32, i32
  }
  func.func @transform_1(%arg0: i32) -> (i32, i32) {
    %c0_i32 = arith.constant 0 : i32
    %c0_i32_0 = arith.constant 0 : i32
    %c0_i32_1 = arith.constant 0 : i32
    return %c0_i32, %c0_i32_0 : i32, i32
  }
  func.func @transform_2(%arg0: i32) -> (i32, i32, i32) {
    %c0_i32 = arith.constant 0 : i32
    %c0_i32_0 = arith.constant 0 : i32
    %c0_i32_1 = arith.constant 0 : i32
    %c0_i32_2 = arith.constant 0 : i32
    return %c0_i32, %c0_i32_0, %c0_i32_1 : i32, i32, i32
  }
  func.func @transform_3(%arg0: i32) -> (i32, i32) {
    %c0_i32 = arith.constant 0 : i32
    %c0_i32_0 = arith.constant 0 : i32
    %c0_i32_1 = arith.constant 0 : i32
    return %c0_i32, %c0_i32_0 : i32, i32
  }
  func.func @transform_4(%arg0: i32) -> (i32, i32, i32) {
    %c0_i32 = arith.constant 0 : i32
    %c0_i32_0 = arith.constant 0 : i32
    %c0_i32_1 = arith.constant 0 : i32
    %c0_i32_2 = arith.constant 0 : i32
    return %c0_i32, %c0_i32_0, %c0_i32_1 : i32, i32, i32
  }
  func.func @transform_5(%arg0: i32) -> (i32, i32) {
    %c0_i32 = arith.constant 0 : i32
    %c0_i32_0 = arith.constant 0 : i32
    %c0_i32_1 = arith.constant 0 : i32
    return %c0_i32, %c0_i32_0 : i32, i32
  }
  func.func @transform_6(%arg0: i32) -> (i32, i32, i32) {
    %c0_i32 = arith.constant 0 : i32
    %c0_i32_0 = arith.constant 0 : i32
    %c0_i32_1 = arith.constant 0 : i32
    return %arg0, %c0_i32, %c0_i32_0 : i32, i32, i32
  }
}

</mosaic_0001>

<bundles_post_ra>
// kernel: tpu_custom_call.1
= control target key start
LH: loop header
LB: loop body
LE: loop exit
PB: predicated region body
PF: predicated region fallthrough
CT: control target
= control target key end

     0   :  { %11 = vsyncpa [#allocation3], 0  ;;  %s9726_s0 = inlined_call_operand.vmem [shape: f32[2,4,256], index: 0, kind: input, shape index: {}]   ;;  %s9727_s1 = inlined_call_operand.hbm [shape: f32[256,1024], index: 1, kind: input, shape index: {}]   ;;  %s9728_s2 = inlined_call_operand.vmem [shape: f32[9,8,4], index: 2, kind: input, shape index: {}]   ;;  %s9729_s3 = inlined_call_operand.vmem [shape: f32[8,1], index: 3, kind: input, shape index: {}]   ;;  %s9730_s4 = inlined_call_operand.vmem [shape: f32[9,8,8], index: 4, kind: input, shape index: {}]   ;;  %s9731_s5 = inlined_call_operand.vmem [shape: f32[8,1], index: 5, kind: input, shape index: {}]   ;;  %s9732_s6 = inlined_call_operand.hbm [shape: f32[2,8,1024], index: 6, kind: output, shape index: {}]  }
   0x1   :  { %12 = vsyncpa [#allocation4], 0 }
   0x2   :  { %14 = vsyncpa [#allocation4 + $0x1], 0  ;;  %s7945_s21 = smov 0   ;;  %s7947_s22 = smov 0  }
   0x3   :  { %s7949_s23 = smov 0   ;;  %s7951_s24 = smov 0  }
   0x4 LB: > { %s7966_s25 = sadd.s32 4294967295, %s7894_s24   ;;  %s7176_s26 = sadd.s32 4294967294, %s7894_s24   ;;  %s7894_s24 = sphi %s7951_s24, %s9990_s24   ;;  %s7890_s23 = sphi %s7949_s23, %s9989_s23   ;;  %s7886_s22 = sphi %s7947_s22, %s9988_s22   ;;  %s7882_s21 = sphi %s7945_s21, %s9987_s21  }
   0x5   : > { %s7970_s27 = sadd.s32 1, %s7894_s24   ;;  %s158_s28 = sadd.s32 1, %s7890_s23 }
   0x6   : > { %s155_s29 = ssub.s32 %s7894_s24, %s7970_s27  ;;  %p168_p0 = scmp.ne.s32.totalorder %s7890_s23, %s7886_s22 }
   0x7   : > { %p156_p1 = scmp.eq.s32.totalorder %s155_s29, 0  ;;  %p169_p2 = scmp.eq.s32.totalorder %s7966_s25, 1 }
   0x8   : > { %p174_p3 = scmp.ne.s32.totalorder %s7886_s22, %s7882_s21  ;;  %p175_p4 = scmp.eq.s32.totalorder %s7176_s26, 1 }
   0x9   : > { %s7981_s30 = scalar_select %p156_p1, %s7890_s23, %s158_s28  }
   0xa   : > { %p7983_p5 = por %p169_p2, %p168_p0  ;;  %p7987_p6 = por %p175_p4, %p174_p3 }
   0xb   : > { %p7177_p7 = scmp.ge.s32.totalorder %s7894_s24, 1  ;;  %p182_p8 = scmp.lt.s32.totalorder %s7894_s24, 3 }
   0xc   : > { %s9813_s7 = scalar_select %p7983_p5, 1, 0 }
   0xd   : > { %s9814_s8 = scalar_select %p7987_p6, 1, 0 }
   0xe   : > { %p9733_p9 = scmp.eq.s32.totalorder %s7966_s25, 0  ;;  %p7994_p10 = pnand %p7177_p7, %p182_p8 }
   0xf   : > { %s7896_s10 = smov [#allocation2]   ;;  %s7800_s15 = scalar_lea.hbm %s9727_s1, 32768 }
  0x10   : > { %s9815_s9 = scalar_select %p7994_p10, 1, 0 }
  0x11   : > { %s194_s11 = sshll.u32 %s7896_s10, 4  ;;  %p7742_p11 = pneg %p7994_p10  ;;  %s195_s11 = int_to_ptr.vmem [resolvable:$true] %s194_s11 }
  0x12   : > { %p7801_p13 = scmp.ne.s32.totalorder %s9727_s1, %s7800_s15  ;;  %p7807_p3 = scmp.lt.u32.totalorder %s7800_s15, %s9727_s1 }
  0x13   : > { %p8002_p12 = pnand %p9733_p9, %p7742_p11 }
  0x15   : > { %p7802_p0 = pneg %p8002_p12 }
  0x17   : > { %p7803_p1 = pnand %p7802_p0, %p7801_p13 }
  0x19   : > { %p7804_p2 = pneg %p7803_p1 }
  0x1b   : > { %p7809_p4 = pnand %p7807_p3, %p7804_p2 }
  0x1d   : > { %7812 = shalt.err (!%p7809_p4)
}
  0x1e   : > { %s7813_s20 = scalar_lea.vmem %s195_s11, 32768  ;;  %p7821_p9 = scmp.lt.s32.totalorder %s195_s11, %s195_s11 }
  0x1f   : > { %p7814_p7 = scmp.ne.s32.totalorder %s195_s11, %s7813_s20  ;;  %p7822_p6 = scmp.lt.s32.totalorder %s7813_s20, %s7813_s20 }
  0x21   : > { %p7816_p8 = pnand %p7814_p7, %p7802_p0  ;;  %p7823_p5 = por %p7822_p6, %p7821_p9 }
  0x23   : > { %p7817_p11 = pneg %p7816_p8 }
  0x25   : > { %p7824_p10 = pnand %p7823_p5, %p7817_p11 }
  0x27   : > { %7827 = shalt.err (!%p7824_p10)
}
  0x28   : > { %s7897_s26 = smov 1024   ;;  %s7898_s28 = smov 64  }
  0x29   : > { %7745 = dma.hbm_to_vmem [thread:$0]  (!%p8002_p12), %s9727_s1, 32768, %s195_s11, [#allocation3], %s7897_s26, %s7897_s26, %s7898_s28  }
  0x2a   : > { %p9817_p13 = scmp.ne.s32.totalorder %s9815_s9, 0 }
  0x2c   : > { %230 = sbr.rel (%p9817_p13) target bundleno = 1295 (0x50f), region = 44 }
  0x33   : > { %p9818_p1 = scmp.eq.s32.totalorder %s7966_s25, 0 }
  0x35   : > { %7873 = dma.done.wait (%p9818_p1), [#allocation3], 32768   ;;  %p9819_p0 = pmov %p9818_p1 }
  0x36   : > { %v267_v0 = vld [vmem:[#allocation2 + $0x8] sm:$0xff]  ;;  %v269_v2 = vld [vmem:[#allocation2 + $0x18] sm:$0xff]  ;;  %v266_v5 = vld [vmem:[#allocation2] sm:$0xff]  ;;  %p260_p5 = scmp.lt.s32.totalorder %s7966_s25, 1  ;;  %s7899_s15 = smov 32   ;;  %vm1060_vm2 = vcmask 1043456  }
  0x37   : > { %7875 = vsyncadd (%p9819_p0), [#allocation3], 4294934528  ;;  %v275_v1 = vld [vmem:[#allocation2 + $0x48] sm:$0xff]  ;;  %v277_v4 = vld [vmem:[#allocation2 + $0x58] sm:$0xff]  ;;  %s7900_s16 = smov 33   ;;  %s7902_s17 = smov 31  }
  0x38   : > { %v7352_v3 = vpack.c.bf16 %v275_v1, %v267_v0  ;;  %v274_v6 = vld [vmem:[#allocation2 + $0x40] sm:$0xff]  ;;  %v7416_v7 = vpack.c.bf16 %v277_v4, %v269_v2  ;;  %v268_v9 = vld [vmem:[#allocation2 + $0x10] sm:$0xff]  ;;  %v283_v11 = vld [vmem:[#allocation2 + $0x88] sm:$0xff]  ;;  %s8032_s9 = scalar_select %p260_p5, %s7966_s25, 1  ;;  %vm9752_vm5 = vcmask 31744  }
  0x39   : > { %v7354_v8 = vpack.c.bf16 %v274_v6, %v266_v5  ;;  %v276_v10 = vld [vmem:[#allocation2 + $0x50] sm:$0xff]  ;;  %v291_v13 = vld [vmem:[#allocation2 + $0xc8] sm:$0xff]  ;;  %v285_v14 = vld [vmem:[#allocation2 + $0x98] sm:$0xff]  ;;  %s7903_s18 = smov 1   ;;  %s7904_s19 = smov 127  }
  0x3a   : > { %7353 = vmatprep.subr.bf16.mxu0 %v7352_v3  ;;  %v7418_v12 = vpack.c.bf16 %v276_v10, %v268_v9  ;;  %v293_v15 = vld [vmem:[#allocation2 + $0xd8] sm:$0xff]  ;;  %7417 = vmatprep.subr.bf16.mxu1 %v7416_v7  ;;  %v7356_v16 = vpack.c.bf16 %v291_v13, %v283_v11  ;;  %v282_v18 = vld [vmem:[#allocation2 + $0x80] sm:$0xff]  ;;  %v284_v20 = vld [vmem:[#allocation2 + $0x90] sm:$0xff]  ;;  %s7350_s11 = sshll.u32 %s8032_s9, 3  ;;  %s7905_s20 = smov 97  }
  0x3b   : > { %7355 = vmatpush1.bf16.msra.mxu0 %v7354_v8  ;;  %v7420_v17 = vpack.c.bf16 %v293_v15, %v285_v14  ;;  %v290_v19 = vld [vmem:[#allocation2 + $0xc0] sm:$0xff]  ;;  %v292_v22 = vld [vmem:[#allocation2 + $0xd0] sm:$0xff]  ;;  %v299_v23 = vld [vmem:[#allocation2 + $0x108] sm:$0xff]  ;;  %s264_s14 = scalar_lea.vmem %s9726_s0, %s7350_s11  ;;  %s7906_s26 = smov 96  }
  0x3c   : > { %7419 = vmatpush1.bf16.msra.mxu1 %v7418_v12  ;;  %v7358_v21 = vpack.c.bf16 %v290_v19, %v282_v18  ;;  %v307_v24 = vld [vmem:[#allocation2 + $0x148] sm:$0xff]  ;;  %7357 = vmatprep.subr.bf16.mxu0 %v7356_v16  ;;  %v7422_v25 = vpack.c.bf16 %v292_v22, %v284_v20  ;;  %v301_v27 = vld [vmem:[#allocation2 + $0x118] sm:$0xff]  ;;  %v298_v29 = vld [vmem:[#allocation2 + $0x100] sm:$0xff]  ;;  %s7907_s28 = smov 95   ;;  %p9985_p9 = scmp.ne.s32.totalorder %s9813_s7, 0 }
  0x3d   : > { %7421 = vmatprep.subr.bf16.mxu1 %v7420_v17  ;;  %v7360_v26 = vpack.c.bf16 %v307_v24, %v299_v23  ;;  %v309_v28 = vld [vmem:[#allocation2 + $0x158] sm:$0xff]  ;;  %v306_v31 = vld [vmem:[#allocation2 + $0x140] sm:$0xff]  ;;  %v300_v32 = vld [vmem:[#allocation2 + $0x110] sm:$0xff]  ;;  %s7909_s13 = smov [#allocation5]  }
  0x3e   : > { %v7424_v30 = vpack.c.bf16 %v309_v28, %v301_v27  ;;  %v308_v33 = vld [vmem:[#allocation2 + $0x150] sm:$0xff]  ;;  %v7362_v34 = vpack.c.bf16 %v306_v31, %v298_v29  ;;  %v315_v35 = vld [vmem:[#allocation2 + $0x188] sm:$0xff]  ;;  %v317_v37 = vld [vmem:[#allocation2 + $0x198] sm:$0xff] }
  0x3f   : > { %7359 = vmatpush1.bf16.msra.mxu0 %v7358_v21  ;;  %v323_v36 = vld [vmem:[#allocation2 + $0x1c8] sm:$0xff]  ;;  %v7426_v38 = vpack.c.bf16 %v308_v33, %v300_v32  ;;  %v325_v40 = vld [vmem:[#allocation2 + $0x1d8] sm:$0xff]  ;;  %v314_v41 = vld [vmem:[#allocation2 + $0x180] sm:$0xff] }
  0x40   : > { %7423 = vmatpush1.bf16.msra.mxu1 %v7422_v25  ;;  %7361 = vmatprep.subr.bf16.mxu0 %v7360_v26  ;;  %v7364_v39 = vpack.c.bf16 %v323_v36, %v315_v35  ;;  %v322_v42 = vld [vmem:[#allocation2 + $0x1c0] sm:$0xff]  ;;  %v7428_v43 = vpack.c.bf16 %v325_v40, %v317_v37  ;;  %v316_v44 = vld [vmem:[#allocation2 + $0x190] sm:$0xff]  ;;  %v331_v46 = vld [vmem:[#allocation2 + $0x208] sm:$0xff] }
  0x41   : > { %7425 = vmatprep.subr.bf16.mxu1 %v7424_v30  ;;  %v324_v45 = vld [vmem:[#allocation2 + $0x1d0] sm:$0xff]  ;;  %v339_v47 = vld [vmem:[#allocation2 + $0x248] sm:$0xff]  ;;  %v333_v48 = vld [vmem:[#allocation2 + $0x218] sm:$0xff]  ;;  %v7366_v50 = vpack.c.bf16 %v322_v42, %v314_v41 }
  0x42   : > { %v341_v49 = vld [vmem:[#allocation2 + $0x258] sm:$0xff]  ;;  %v7430_v51 = vpack.c.bf16 %v324_v45, %v316_v44  ;;  %v7368_v52 = vpack.c.bf16 %v339_v47, %v331_v46  ;;  %v330_v53 = vld [vmem:[#allocation2 + $0x200] sm:$0xff]  ;;  %v332_v55 = vld [vmem:[#allocation2 + $0x210] sm:$0xff] }
  0x43   : > { %7363 = vmatpush1.bf16.msra.mxu0 %v7362_v34  ;;  %v338_v54 = vld [vmem:[#allocation2 + $0x240] sm:$0xff]  ;;  %v7432_v56 = vpack.c.bf16 %v341_v49, %v333_v48  ;;  %v340_v57 = vld [vmem:[#allocation2 + $0x250] sm:$0xff]  ;;  %v347_v58 = vld [vmem:[#allocation2 + $0x288] sm:$0xff] }
  0x44   : > { %7427 = vmatpush1.bf16.msra.mxu1 %v7426_v38  ;;  %7365 = vmatprep.subr.bf16.mxu0 %v7364_v39  ;;  %v355_v59 = vld [vmem:[#allocation2 + $0x2c8] sm:$0xff]  ;;  %v349_v60 = vld [vmem:[#allocation2 + $0x298] sm:$0xff]  ;;  %v7370_v62 = vpack.c.bf16 %v338_v54, %v330_v53  ;;  %v7434_v63 = vpack.c.bf16 %v340_v57, %v332_v55  ;;  %v346_v1 = vld [vmem:[#allocation2 + $0x280] sm:$0xff] }
  0x45   : > { %7429 = vmatprep.subr.bf16.mxu1 %v7428_v43  ;;  %v357_v61 = vld [vmem:[#allocation2 + $0x2d8] sm:$0xff]  ;;  %v7372_v0 = vpack.c.bf16 %v355_v59, %v347_v58  ;;  %v354_v2 = vld [vmem:[#allocation2 + $0x2c0] sm:$0xff]  ;;  %v348_v3 = vld [vmem:[#allocation2 + $0x290] sm:$0xff] }
  0x46   : > { %v7436_v4 = vpack.c.bf16 %v357_v61, %v349_v60  ;;  %v356_v5 = vld [vmem:[#allocation2 + $0x2d0] sm:$0xff]  ;;  %v363_v6 = vld [vmem:[#allocation2 + $0x308] sm:$0xff]  ;;  %v365_v8 = vld [vmem:[#allocation2 + $0x318] sm:$0xff]  ;;  %v7374_v10 = vpack.c.bf16 %v354_v2, %v346_v1 }
  0x47   : > { %7367 = vmatpush1.bf16.msra.mxu0 %v7366_v50  ;;  %v371_v7 = vld [vmem:[#allocation2 + $0x348] sm:$0xff]  ;;  %v373_v9 = vld [vmem:[#allocation2 + $0x358] sm:$0xff]  ;;  %v7438_v11 = vpack.c.bf16 %v356_v5, %v348_v3  ;;  %v362_v13 = vld [vmem:[#allocation2 + $0x300] sm:$0xff] }
  0x48   : > { %7431 = vmatpush1.bf16.msra.mxu1 %v7430_v51  ;;  %7369 = vmatprep.subr.bf16.mxu0 %v7368_v52  ;;  %v7376_v12 = vpack.c.bf16 %v371_v7, %v363_v6  ;;  %v370_v14 = vld [vmem:[#allocation2 + $0x340] sm:$0xff]  ;;  %v364_v15 = vld [vmem:[#allocation2 + $0x310] sm:$0xff]  ;;  %v7440_v16 = vpack.c.bf16 %v373_v9, %v365_v8  ;;  %v379_v18 = vld [vmem:[#allocation2 + $0x388] sm:$0xff] }
  0x49   : > { %7433 = vmatprep.subr.bf16.mxu1 %v7432_v56  ;;  %v372_v17 = vld [vmem:[#allocation2 + $0x350] sm:$0xff]  ;;  %v387_v19 = vld [vmem:[#allocation2 + $0x3c8] sm:$0xff]  ;;  %v381_v20 = vld [vmem:[#allocation2 + $0x398] sm:$0xff]  ;;  %v7378_v22 = vpack.c.bf16 %v370_v14, %v362_v13 }
  0x4a   : > { %v389_v21 = vld [vmem:[#allocation2 + $0x3d8] sm:$0xff]  ;;  %v7442_v23 = vpack.c.bf16 %v372_v17, %v364_v15  ;;  %v7380_v24 = vpack.c.bf16 %v387_v19, %v379_v18  ;;  %v378_v25 = vld [vmem:[#allocation2 + $0x380] sm:$0xff]  ;;  %v380_v27 = vld [vmem:[#allocation2 + $0x390] sm:$0xff] }
  0x4b   : > { %7371 = vmatpush1.bf16.msra.mxu0 %v7370_v62  ;;  %v386_v26 = vld [vmem:[#allocation2 + $0x3c0] sm:$0xff]  ;;  %v7444_v28 = vpack.c.bf16 %v389_v21, %v381_v20  ;;  %v388_v29 = vld [vmem:[#allocation2 + $0x3d0] sm:$0xff]  ;;  %v395_v30 = vld [vmem:[#allocation2 + $0x408] sm:$0xff] }
  0x4c   : > { %7435 = vmatpush1.bf16.msra.mxu1 %v7434_v63  ;;  %7373 = vmatprep.subr.bf16.mxu0 %v7372_v0  ;;  %v403_v31 = vld [vmem:[#allocation2 + $0x448] sm:$0xff]  ;;  %v397_v32 = vld [vmem:[#allocation2 + $0x418] sm:$0xff]  ;;  %v7382_v34 = vpack.c.bf16 %v386_v26, %v378_v25  ;;  %v7446_v35 = vpack.c.bf16 %v388_v29, %v380_v27  ;;  %v394_v37 = vld [vmem:[#allocation2 + $0x400] sm:$0xff] }
  0x4d   : > { %7437 = vmatprep.subr.bf16.mxu1 %v7436_v4  ;;  %v405_v33 = vld [vmem:[#allocation2 + $0x458] sm:$0xff]  ;;  %v7384_v36 = vpack.c.bf16 %v403_v31, %v395_v30  ;;  %v402_v38 = vld [vmem:[#allocation2 + $0x440] sm:$0xff]  ;;  %v396_v39 = vld [vmem:[#allocation2 + $0x410] sm:$0xff] }
  0x4e   : > { %v7448_v40 = vpack.c.bf16 %v405_v33, %v397_v32  ;;  %v404_v41 = vld [vmem:[#allocation2 + $0x450] sm:$0xff]  ;;  %v411_v42 = vld [vmem:[#allocation2 + $0x488] sm:$0xff]  ;;  %v413_v44 = vld [vmem:[#allocation2 + $0x498] sm:$0xff]  ;;  %v7386_v46 = vpack.c.bf16 %v402_v38, %v394_v37 }
  0x4f   : > { %7375 = vmatpush1.bf16.msra.mxu0 %v7374_v10  ;;  %v419_v43 = vld [vmem:[#allocation2 + $0x4c8] sm:$0xff]  ;;  %v421_v45 = vld [vmem:[#allocation2 + $0x4d8] sm:$0xff]  ;;  %v7450_v47 = vpack.c.bf16 %v404_v41, %v396_v39  ;;  %v410_v49 = vld [vmem:[#allocation2 + $0x480] sm:$0xff] }
  0x50   : > { %7439 = vmatpush1.bf16.msra.mxu1 %v7438_v11  ;;  %7377 = vmatprep.subr.bf16.mxu0 %v7376_v12  ;;  %v7388_v48 = vpack.c.bf16 %v419_v43, %v411_v42  ;;  %v418_v50 = vld [vmem:[#allocation2 + $0x4c0] sm:$0xff]  ;;  %v412_v51 = vld [vmem:[#allocation2 + $0x490] sm:$0xff]  ;;  %v7452_v52 = vpack.c.bf16 %v421_v45, %v413_v44  ;;  %v427_v54 = vld [vmem:[#allocation2 + $0x508] sm:$0xff] }
  0x51   : > { %7441 = vmatprep.subr.bf16.mxu1 %v7440_v16  ;;  %v420_v53 = vld [vmem:[#allocation2 + $0x4d0] sm:$0xff]  ;;  %v435_v55 = vld [vmem:[#allocation2 + $0x548] sm:$0xff]  ;;  %v429_v56 = vld [vmem:[#allocation2 + $0x518] sm:$0xff]  ;;  %v7390_v58 = vpack.c.bf16 %v418_v50, %v410_v49 }
  0x52   : > { %v437_v57 = vld [vmem:[#allocation2 + $0x558] sm:$0xff]  ;;  %v7454_v59 = vpack.c.bf16 %v420_v53, %v412_v51  ;;  %v7392_v60 = vpack.c.bf16 %v435_v55, %v427_v54  ;;  %v426_v61 = vld [vmem:[#allocation2 + $0x500] sm:$0xff]  ;;  %v428_v63 = vld [vmem:[#allocation2 + $0x510] sm:$0xff] }
  0x53   : > { %7379 = vmatpush1.bf16.msra.mxu0 %v7378_v22  ;;  %v434_v62 = vld [vmem:[#allocation2 + $0x540] sm:$0xff]  ;;  %v7456_v0 = vpack.c.bf16 %v437_v57, %v429_v56  ;;  %v436_v1 = vld [vmem:[#allocation2 + $0x550] sm:$0xff]  ;;  %v443_v2 = vld [vmem:[#allocation2 + $0x588] sm:$0xff] }
  0x54   : > { %7443 = vmatpush1.bf16.msra.mxu1 %v7442_v23  ;;  %7381 = vmatprep.subr.bf16.mxu0 %v7380_v24  ;;  %v451_v3 = vld [vmem:[#allocation2 + $0x5c8] sm:$0xff]  ;;  %v445_v4 = vld [vmem:[#allocation2 + $0x598] sm:$0xff]  ;;  %v7394_v6 = vpack.c.bf16 %v434_v62, %v426_v61  ;;  %v442_v7 = vld [vmem:[#allocation2 + $0x580] sm:$0xff]  ;;  %v7458_v8 = vpack.c.bf16 %v436_v1, %v428_v63 }
  0x55   : > { %7445 = vmatprep.subr.bf16.mxu1 %v7444_v28  ;;  %v453_v5 = vld [vmem:[#allocation2 + $0x5d8] sm:$0xff]  ;;  %v7396_v9 = vpack.c.bf16 %v451_v3, %v443_v2  ;;  %v450_v10 = vld [vmem:[#allocation2 + $0x5c0] sm:$0xff]  ;;  %v444_v11 = vld [vmem:[#allocation2 + $0x590] sm:$0xff] }
  0x56   : > { %v452_v12 = vld [vmem:[#allocation2 + $0x5d0] sm:$0xff]  ;;  %v7460_v13 = vpack.c.bf16 %v453_v5, %v445_v4  ;;  %v459_v14 = vld [vmem:[#allocation2 + $0x608] sm:$0xff]  ;;  %v8038_v16 = vld [vmem:[%s264_s14] sm:$0xff]  ;;  %v7398_v20 = vpack.c.bf16 %v450_v10, %v442_v7  ;;  %s7351_s14 = sshll.u32 %s7966_s25, 10 }
  0x57   : > { %7383 = vmatpush1.bf16.msra.mxu0 %v7382_v34  ;;  %v467_v15 = vld [vmem:[#allocation2 + $0x648] sm:$0xff]  ;;  %v461_v17 = vld [vmem:[#allocation2 + $0x618] sm:$0xff]  ;;  %v8042_v19 = vcombine.high %v8038_v16, %v8038_v16  ;;  %v7462_v21 = vpack.c.bf16 %v452_v12, %v444_v11  ;;  %v458_v23 = vld [vmem:[#allocation2 + $0x600] sm:$0xff]  ;;  %s9682_s11 = scalar_lea.hbm %s9732_s6, %s7351_s14 }
  0x58   : > { %7447 = vmatpush1.bf16.msra.mxu1 %v7446_v35  ;;  %7385 = vmatprep.subr.bf16.mxu0 %v7384_v36  ;;  %v469_v18 = vld [vmem:[#allocation2 + $0x658] sm:$0xff]  ;;  %v7400_v22 = vpack.c.bf16 %v467_v15, %v459_v14  ;;  %v466_v24 = vld [vmem:[#allocation2 + $0x640] sm:$0xff]  ;;  %v460_v25 = vld [vmem:[#allocation2 + $0x610] sm:$0xff] }
  0x59   : > { %7449 = vmatprep.subr.bf16.mxu1 %v7448_v40  ;;  %v7464_v26 = vpack.c.bf16 %v469_v18, %v461_v17  ;;  %v468_v27 = vld [vmem:[#allocation2 + $0x650] sm:$0xff]  ;;  %v475_v28 = vld [vmem:[#allocation2 + $0x688] sm:$0xff]  ;;  %589 = vmatprep.mubr.f32.mxu0 %v8042_v19  ;;  %v477_v30 = vld [vmem:[#allocation2 + $0x698] sm:$0xff]  ;;  %v7402_v32 = vpack.c.bf16 %v466_v24, %v458_v23 }
  0x5a   : > { %v483_v29 = vld [vmem:[#allocation2 + $0x6c8] sm:$0xff]  ;;  %v485_v31 = vld [vmem:[#allocation2 + $0x6d8] sm:$0xff]  ;;  %660 = vmatprep.mubr.f32.mxu1 %v8042_v19  ;;  %v7466_v33 = vpack.c.bf16 %v468_v27, %v460_v25  ;;  %v474_v35 = vld [vmem:[#allocation2 + $0x680] sm:$0xff] }
  0x5b   : > { %7387 = vmatpush1.bf16.msra.mxu0 %v7386_v46  ;;  %v7404_v34 = vpack.c.bf16 %v483_v29, %v475_v28  ;;  %v482_v36 = vld [vmem:[#allocation2 + $0x6c0] sm:$0xff]  ;;  %v476_v37 = vld [vmem:[#allocation2 + $0x690] sm:$0xff]  ;;  %v7468_v38 = vpack.c.bf16 %v485_v31, %v477_v30  ;;  %v491_v40 = vld [vmem:[#allocation2 + $0x708] sm:$0xff] }
  0x5c   : > { %7451 = vmatpush1.bf16.msra.mxu1 %v7450_v47  ;;  %7389 = vmatprep.subr.bf16.mxu0 %v7388_v48  ;;  %v484_v39 = vld [vmem:[#allocation2 + $0x6d0] sm:$0xff]  ;;  %v499_v41 = vld [vmem:[#allocation2 + $0x748] sm:$0xff]  ;;  %v493_v42 = vld [vmem:[#allocation2 + $0x718] sm:$0xff]  ;;  %v7406_v44 = vpack.c.bf16 %v482_v36, %v474_v35 }
  0x5d   : > { %7453 = vmatprep.subr.bf16.mxu1 %v7452_v52  ;;  %v501_v43 = vld [vmem:[#allocation2 + $0x758] sm:$0xff]  ;;  %v7470_v45 = vpack.c.bf16 %v484_v39, %v476_v37  ;;  %v7408_v46 = vpack.c.bf16 %v499_v41, %v491_v40  ;;  %v490_v47 = vld [vmem:[#allocation2 + $0x700] sm:$0xff]  ;;  %v492_v49 = vld [vmem:[#allocation2 + $0x710] sm:$0xff] }
  0x5e   : > { %v498_v48 = vld [vmem:[#allocation2 + $0x740] sm:$0xff]  ;;  %v7472_v50 = vpack.c.bf16 %v501_v43, %v493_v42  ;;  %v500_v51 = vld [vmem:[#allocation2 + $0x750] sm:$0xff]  ;;  %v507_v52 = vld [vmem:[#allocation2 + $0x788] sm:$0xff] }
  0x5f   : > { %7391 = vmatpush1.bf16.msra.mxu0 %v7390_v58  ;;  %v515_v53 = vld [vmem:[#allocation2 + $0x7c8] sm:$0xff]  ;;  %v509_v54 = vld [vmem:[#allocation2 + $0x798] sm:$0xff]  ;;  %v7410_v56 = vpack.c.bf16 %v498_v48, %v490_v47  ;;  %v7474_v57 = vpack.c.bf16 %v500_v51, %v492_v49  ;;  %v508_v61 = vld [vmem:[#allocation2 + $0x790] sm:$0xff] }
  0x60   : > { %7455 = vmatpush1.bf16.msra.mxu1 %v7454_v59  ;;  %7393 = vmatprep.subr.bf16.mxu0 %v7392_v60  ;;  %v517_v55 = vld [vmem:[#allocation2 + $0x7d8] sm:$0xff]  ;;  %v7412_v58 = vpack.c.bf16 %v515_v53, %v507_v52  ;;  %v506_v59 = vld [vmem:[#allocation2 + $0x780] sm:$0xff]  ;;  %v516_v63 = vld [vmem:[#allocation2 + $0x7d0] sm:$0xff] }
  0x61   : > { %7457 = vmatprep.subr.bf16.mxu1 %v7456_v0  ;;  %v514_v60 = vld [vmem:[#allocation2 + $0x7c0] sm:$0xff]  ;;  %v7476_v62 = vpack.c.bf16 %v517_v55, %v509_v54  ;;  %v271_v0 = vld [vmem:[#allocation2 + $0x28] sm:$0xff]  ;;  %v273_v2 = vld [vmem:[#allocation2 + $0x38] sm:$0xff]  ;;  %v7478_v5 = vpack.c.bf16 %v516_v63, %v508_v61 }
  0x62   : > { %v279_v1 = vld [vmem:[#allocation2 + $0x68] sm:$0xff]  ;;  %v281_v3 = vld [vmem:[#allocation2 + $0x78] sm:$0xff]  ;;  %v7414_v4 = vpack.c.bf16 %v514_v60, %v506_v59  ;;  %v270_v7 = vld [vmem:[#allocation2 + $0x20] sm:$0xff] }
  0x63   : > { %7395 = vmatpush1.bf16.msra.mxu0 %v7394_v6  ;;  %v7480_v6 = vpack.c.bf16 %v279_v1, %v271_v0  ;;  %v7544_v10 = vpack.c.bf16 %v281_v3, %v273_v2  ;;  %v280_v11 = vld [vmem:[#allocation2 + $0x70] sm:$0xff]  ;;  %v287_v12 = vld [vmem:[#allocation2 + $0xa8] sm:$0xff]  ;;  %v289_v14 = vld [vmem:[#allocation2 + $0xb8] sm:$0xff] }
  0x64   : > { %7459 = vmatpush1.bf16.msra.mxu1 %v7458_v8  ;;  %7397 = vmatprep.subr.bf16.mxu0 %v7396_v9  ;;  %v278_v8 = vld [vmem:[#allocation2 + $0x60] sm:$0xff]  ;;  %v272_v9 = vld [vmem:[#allocation2 + $0x30] sm:$0xff]  ;;  %v297_v15 = vld [vmem:[#allocation2 + $0xf8] sm:$0xff] }
  0x65   : > { %7461 = vmatprep.subr.bf16.mxu1 %v7460_v13  ;;  %v295_v13 = vld [vmem:[#allocation2 + $0xe8] sm:$0xff]  ;;  %v7482_v17 = vpack.c.bf16 %v278_v8, %v270_v7  ;;  %v7546_v18 = vpack.c.bf16 %v280_v11, %v272_v9  ;;  %v288_v23 = vld [vmem:[#allocation2 + $0xb0] sm:$0xff]  ;;  %v7548_v24 = vpack.c.bf16 %v297_v15, %v289_v14  ;;  %v305_v28 = vld [vmem:[#allocation2 + $0x138] sm:$0xff] }
  0x66   : > { %v296_v25 = vld [vmem:[#allocation2 + $0xf0] sm:$0xff]  ;;  %v311_v27 = vld [vmem:[#allocation2 + $0x168] sm:$0xff]  ;;  %v313_v29 = vld [vmem:[#allocation2 + $0x178] sm:$0xff] }
  0x67   : > { %7399 = vmatpush1.bf16.msra.mxu0 %v7398_v20  ;;  %v7484_v20 = vpack.c.bf16 %v295_v13, %v287_v12  ;;  %v7550_v31 = vpack.c.bf16 %v296_v25, %v288_v23  ;;  %v304_v35 = vld [vmem:[#allocation2 + $0x130] sm:$0xff]  ;;  %v7552_v36 = vpack.c.bf16 %v313_v29, %v305_v28  ;;  %v327_v39 = vld [vmem:[#allocation2 + $0x1e8] sm:$0xff]  ;;  %v321_v40 = vld [vmem:[#allocation2 + $0x1b8] sm:$0xff] }
  0x68   : > { %7463 = vmatpush1.bf16.msra.mxu1 %v7462_v21  ;;  %7401 = vmatprep.subr.bf16.mxu0 %v7400_v22  ;;  %v286_v21 = vld [vmem:[#allocation2 + $0xa0] sm:$0xff]  ;;  %v312_v37 = vld [vmem:[#allocation2 + $0x170] sm:$0xff]  ;;  %v329_v41 = vld [vmem:[#allocation2 + $0x1f8] sm:$0xff] }
  0x69   : > { %7465 = vmatprep.subr.bf16.mxu1 %v7464_v26  ;;  %v294_v22 = vld [vmem:[#allocation2 + $0xe0] sm:$0xff]  ;;  %v303_v26 = vld [vmem:[#allocation2 + $0x128] sm:$0xff]  ;;  %v7554_v43 = vpack.c.bf16 %v312_v37, %v304_v35  ;;  %v320_v47 = vld [vmem:[#allocation2 + $0x1b0] sm:$0xff]  ;;  %v7556_v48 = vpack.c.bf16 %v329_v41, %v321_v40 }
  0x6a   : > { %v7486_v30 = vpack.c.bf16 %v294_v22, %v286_v21  ;;  %v328_v49 = vld [vmem:[#allocation2 + $0x1f0] sm:$0xff]  ;;  %v343_v51 = vld [vmem:[#allocation2 + $0x268] sm:$0xff]  ;;  %v337_v52 = vld [vmem:[#allocation2 + $0x238] sm:$0xff] }
  0x6b   : > { %7403 = vmatpush1.bf16.msra.mxu0 %v7402_v32  ;;  %v7488_v32 = vpack.c.bf16 %v311_v27, %v303_v26  ;;  %v345_v53 = vld [vmem:[#allocation2 + $0x278] sm:$0xff]  ;;  %v344_v60 = vld [vmem:[#allocation2 + $0x270] sm:$0xff]  ;;  %v351_v61 = vld [vmem:[#allocation2 + $0x2a8] sm:$0xff] }
  0x6c   : > { %7467 = vmatpush1.bf16.msra.mxu1 %v7466_v33  ;;  %7405 = vmatprep.subr.bf16.mxu0 %v7404_v34  ;;  %v302_v33 = vld [vmem:[#allocation2 + $0x120] sm:$0xff]  ;;  %v7560_v59 = vpack.c.bf16 %v345_v53, %v337_v52  ;;  %v353_v63 = vld [vmem:[#allocation2 + $0x2b8] sm:$0xff]  ;;  %v360_v8 = vld [vmem:[#allocation2 + $0x2f0] sm:$0xff] }
  0x6d   : > { %7469 = vmatprep.subr.bf16.mxu1 %v7468_v38  ;;  %v310_v34 = vld [vmem:[#allocation2 + $0x160] sm:$0xff]  ;;  %v319_v38 = vld [vmem:[#allocation2 + $0x1a8] sm:$0xff]  ;;  %v361_v0 = vld [vmem:[#allocation2 + $0x2f8] sm:$0xff] }
  0x6e   : > { %v7490_v42 = vpack.c.bf16 %v310_v34, %v302_v33  ;;  %v7564_v7 = vpack.c.bf16 %v361_v0, %v353_v63  ;;  %v367_v9 = vld [vmem:[#allocation2 + $0x328] sm:$0xff]  ;;  %v369_v11 = vld [vmem:[#allocation2 + $0x338] sm:$0xff]  ;;  %v376_v22 = vld [vmem:[#allocation2 + $0x370] sm:$0xff] }
  0x6f   : > { %7407 = vmatpush1.bf16.msra.mxu0 %v7406_v44  ;;  %v7492_v44 = vpack.c.bf16 %v327_v39, %v319_v38  ;;  %v377_v12 = vld [vmem:[#allocation2 + $0x378] sm:$0xff]  ;;  %v383_v23 = vld [vmem:[#allocation2 + $0x3a8] sm:$0xff]  ;;  %v392_v34 = vld [vmem:[#allocation2 + $0x3f0] sm:$0xff] }
  0x70   : > { %7471 = vmatpush1.bf16.msra.mxu1 %v7470_v45  ;;  %7409 = vmatprep.subr.bf16.mxu0 %v7408_v46  ;;  %v318_v45 = vld [vmem:[#allocation2 + $0x1a0] sm:$0xff]  ;;  %v7568_v21 = vpack.c.bf16 %v377_v12, %v369_v11  ;;  %v385_v25 = vld [vmem:[#allocation2 + $0x3b8] sm:$0xff]  ;;  %v399_v35 = vld [vmem:[#allocation2 + $0x428] sm:$0xff] }
  0x71   : > { %7473 = vmatprep.subr.bf16.mxu1 %v7472_v50  ;;  %v326_v46 = vld [vmem:[#allocation2 + $0x1e0] sm:$0xff]  ;;  %v335_v50 = vld [vmem:[#allocation2 + $0x228] sm:$0xff]  ;;  %v393_v26 = vld [vmem:[#allocation2 + $0x3f8] sm:$0xff] }
  0x72   : > { %v7494_v54 = vpack.c.bf16 %v326_v46, %v318_v45  ;;  %v7496_v55 = vpack.c.bf16 %v343_v51, %v335_v50  ;;  %v7572_v33 = vpack.c.bf16 %v393_v26, %v385_v25  ;;  %v401_v37 = vld [vmem:[#allocation2 + $0x438] sm:$0xff]  ;;  %v408_v46 = vld [vmem:[#allocation2 + $0x470] sm:$0xff] }
  0x73   : > { %7411 = vmatpush1.bf16.msra.mxu0 %v7410_v56  ;;  %v334_v56 = vld [vmem:[#allocation2 + $0x220] sm:$0xff]  ;;  %v409_v38 = vld [vmem:[#allocation2 + $0x478] sm:$0xff] }
  0x74   : > { %7475 = vmatpush1.bf16.msra.mxu1 %v7474_v57  ;;  %7413 = vmatprep.subr.bf16.mxu0 %v7412_v58  ;;  %v342_v57 = vld [vmem:[#allocation2 + $0x260] sm:$0xff]  ;;  %v336_v58 = vld [vmem:[#allocation2 + $0x230] sm:$0xff]  ;;  %v7576_v45 = vpack.c.bf16 %v409_v38, %v401_v37  ;;  %v425_v50 = vld [vmem:[#allocation2 + $0x4f8] sm:$0xff] }
  0x75   : > { %7477 = vmatprep.subr.bf16.mxu1 %v7476_v62  ;;  %v359_v62 = vld [vmem:[#allocation2 + $0x2e8] sm:$0xff]  ;;  %v7498_v1 = vpack.c.bf16 %v342_v57, %v334_v56  ;;  %v7562_v2 = vpack.c.bf16 %v344_v60, %v336_v58  ;;  %v424_v57 = vld [vmem:[#allocation2 + $0x4f0] sm:$0xff]  ;;  %v433_v60 = vld [vmem:[#allocation2 + $0x538] sm:$0xff] }
  0x76   : > { %v7500_v3 = vpack.c.bf16 %v359_v62, %v351_v61  ;;  %v431_v58 = vld [vmem:[#allocation2 + $0x528] sm:$0xff]  ;;  %v441_v61 = vld [vmem:[#allocation2 + $0x578] sm:$0xff] }
  0x77   : > { %7415 = vmatpush1.bf16.msra.mxu0 %v7414_v4  ;;  %v350_v4 = vld [vmem:[#allocation2 + $0x2a0] sm:$0xff] }
  0x78   : > { %7479 = vmatpush1.bf16.msra.mxu1 %v7478_v5  ;;  %7481 = vmatprep.subr.bf16.mxu0 %v7480_v6  ;;  %v358_v5 = vld [vmem:[#allocation2 + $0x2e0] sm:$0xff]  ;;  %v352_v6 = vld [vmem:[#allocation2 + $0x2b0] sm:$0xff] }
  0x79   : > { %7545 = vmatprep.subr.bf16.mxu1 %v7544_v10  ;;  %v375_v10 = vld [vmem:[#allocation2 + $0x368] sm:$0xff]  ;;  %v7502_v13 = vpack.c.bf16 %v358_v5, %v350_v4  ;;  %v7566_v14 = vpack.c.bf16 %v360_v8, %v352_v6  ;;  %v7584_v4 = vpack.c.bf16 %v441_v61, %v433_v60  ;;  %v440_v5 = vld [vmem:[#allocation2 + $0x570] sm:$0xff]  ;;  %v449_v8 = vld [vmem:[#allocation2 + $0x5b8] sm:$0xff] }
  0x7a   : > { %590 = vmatmul.mubr.f32.vlgmr.msra.gmra.mrb[0].mxu0 %v8038_v16  ;;  %v7504_v15 = vpack.c.bf16 %v375_v10, %v367_v9  ;;  %v447_v6 = vld [vmem:[#allocation2 + $0x5a8] sm:$0xff]  ;;  %v457_v9 = vld [vmem:[#allocation2 + $0x5f8] sm:$0xff] }
  0x7b   : > { %661 = vmatmul.mubr.f32.vlgmr.msra.gmra.mrb[0].mxu1 %v8038_v16  ;;  %7483 = vmatpush1.bf16.msra.mxu0 %v7482_v17  ;;  %v366_v17 = vld [vmem:[#allocation2 + $0x320] sm:$0xff] }
  0x7c   : > { %7547 = vmatpush1.bf16.msra.mxu1 %v7546_v18  ;;  %7485 = vmatprep.subr.bf16.mxu0 %v7484_v20  ;;  %v374_v18 = vld [vmem:[#allocation2 + $0x360] sm:$0xff]  ;;  %v368_v20 = vld [vmem:[#allocation2 + $0x330] sm:$0xff] }
  0x7d   : > { %7549 = vmatprep.subr.bf16.mxu1 %v7548_v24  ;;  %731 = vmatprep.mubr.f32.mxu0 %v8042_v19  ;;  %v391_v24 = vld [vmem:[#allocation2 + $0x3e8] sm:$0xff]  ;;  %v7506_v27 = vpack.c.bf16 %v374_v18, %v366_v17  ;;  %v7570_v28 = vpack.c.bf16 %v376_v22, %v368_v20  ;;  %v7588_v17 = vpack.c.bf16 %v457_v9, %v449_v8  ;;  %v456_v18 = vld [vmem:[#allocation2 + $0x5f0] sm:$0xff]  ;;  %v465_v22 = vld [vmem:[#allocation2 + $0x638] sm:$0xff] }
  0x7e   : > { %802 = vmatprep.mubr.f32.mxu1 %v8042_v19  ;;  %v7558_v19 = vpack.c.bf16 %v328_v49, %v320_v47  ;;  %v7508_v29 = vpack.c.bf16 %v391_v24, %v383_v23  ;;  %v415_v47 = vld [vmem:[#allocation2 + $0x4a8] sm:$0xff]  ;;  %v417_v49 = vld [vmem:[#allocation2 + $0x4b8] sm:$0xff] }
  0x7f   : > { %7487 = vmatpush1.bf16.msra.mxu0 %v7486_v30  ;;  %v382_v30 = vld [vmem:[#allocation2 + $0x3a0] sm:$0xff]  ;;  %v7580_v56 = vpack.c.bf16 %v425_v50, %v417_v49  ;;  %v463_v20 = vld [vmem:[#allocation2 + $0x628] sm:$0xff]  ;;  %v473_v23 = vld [vmem:[#allocation2 + $0x678] sm:$0xff] }
  0x80   : > { %7551 = vmatpush1.bf16.msra.mxu1 %v7550_v31  ;;  %7489 = vmatprep.subr.bf16.mxu0 %v7488_v32  ;;  %v390_v31 = vld [vmem:[#allocation2 + $0x3e0] sm:$0xff]  ;;  %v384_v32 = vld [vmem:[#allocation2 + $0x3b0] sm:$0xff] }
  0x81   : > { %7553 = vmatprep.subr.bf16.mxu1 %v7552_v36  ;;  %v407_v36 = vld [vmem:[#allocation2 + $0x468] sm:$0xff]  ;;  %v7510_v39 = vpack.c.bf16 %v390_v31, %v382_v30  ;;  %v7574_v40 = vpack.c.bf16 %v392_v34, %v384_v32  ;;  %v7592_v30 = vpack.c.bf16 %v473_v23, %v465_v22  ;;  %v472_v31 = vld [vmem:[#allocation2 + $0x670] sm:$0xff]  ;;  %v481_v34 = vld [vmem:[#allocation2 + $0x6b8] sm:$0xff] }
  0x82   : > { %v7512_v41 = vpack.c.bf16 %v407_v36, %v399_v35  ;;  %v479_v32 = vld [vmem:[#allocation2 + $0x6a8] sm:$0xff]  ;;  %v489_v35 = vld [vmem:[#allocation2 + $0x6f8] sm:$0xff] }
  0x83   : > { %7491 = vmatpush1.bf16.msra.mxu0 %v7490_v42  ;;  %v398_v42 = vld [vmem:[#allocation2 + $0x420] sm:$0xff] }
  0x84   : > { %7555 = vmatpush1.bf16.msra.mxu1 %v7554_v43  ;;  %7493 = vmatprep.subr.bf16.mxu0 %v7492_v44  ;;  %v406_v43 = vld [vmem:[#allocation2 + $0x460] sm:$0xff]  ;;  %v400_v44 = vld [vmem:[#allocation2 + $0x430] sm:$0xff] }
  0x85   : > { %7557 = vmatprep.subr.bf16.mxu1 %v7556_v48  ;;  %v423_v48 = vld [vmem:[#allocation2 + $0x4e8] sm:$0xff]  ;;  %v7514_v51 = vpack.c.bf16 %v406_v43, %v398_v42  ;;  %v7578_v52 = vpack.c.bf16 %v408_v46, %v400_v44  ;;  %v7596_v42 = vpack.c.bf16 %v489_v35, %v481_v34  ;;  %v488_v43 = vld [vmem:[#allocation2 + $0x6f0] sm:$0xff]  ;;  %v497_v46 = vld [vmem:[#allocation2 + $0x738] sm:$0xff] }
  0x86   : > { %v7516_v53 = vpack.c.bf16 %v423_v48, %v415_v47  ;;  %v495_v44 = vld [vmem:[#allocation2 + $0x728] sm:$0xff]  ;;  %v505_v47 = vld [vmem:[#allocation2 + $0x778] sm:$0xff] }
  0x87   : > { %7495 = vmatpush1.bf16.msra.mxu0 %v7494_v54  ;;  %v414_v54 = vld [vmem:[#allocation2 + $0x4a0] sm:$0xff] }
  0x88   : > { %7559 = vmatpush1.bf16.msra.mxu1 %v7558_v19  ;;  %7497 = vmatprep.subr.bf16.mxu0 %v7496_v55  ;;  %v422_v19 = vld [vmem:[#allocation2 + $0x4e0] sm:$0xff]  ;;  %v416_v55 = vld [vmem:[#allocation2 + $0x4b0] sm:$0xff] }
  0x89   : > { %7561 = vmatprep.subr.bf16.mxu1 %v7560_v59  ;;  %v439_v59 = vld [vmem:[#allocation2 + $0x568] sm:$0xff]  ;;  %v7518_v62 = vpack.c.bf16 %v422_v19, %v414_v54  ;;  %v7582_v63 = vpack.c.bf16 %v424_v57, %v416_v55  ;;  %v7600_v54 = vpack.c.bf16 %v505_v47, %v497_v46  ;;  %v504_v19 = vld [vmem:[#allocation2 + $0x770] sm:$0xff]  ;;  %v513_v57 = vld [vmem:[#allocation2 + $0x7b8] sm:$0xff] }
  0x8a   : > { %v7520_v0 = vpack.c.bf16 %v439_v59, %v431_v58  ;;  %v511_v55 = vld [vmem:[#allocation2 + $0x7a8] sm:$0xff]  ;;  %v521_v58 = vld [vmem:[#allocation2 + $0x7f8] sm:$0xff] }
  0x8b   : > { %7499 = vmatpush1.bf16.msra.mxu0 %v7498_v1  ;;  %v430_v1 = vld [vmem:[#allocation2 + $0x520] sm:$0xff] }
  0x8c   : > { %7563 = vmatpush1.bf16.msra.mxu1 %v7562_v2  ;;  %7501 = vmatprep.subr.bf16.mxu0 %v7500_v3  ;;  %v438_v2 = vld [vmem:[#allocation2 + $0x560] sm:$0xff]  ;;  %v432_v3 = vld [vmem:[#allocation2 + $0x530] sm:$0xff] }
  0x8d   : > { %7565 = vmatprep.subr.bf16.mxu1 %v7564_v7  ;;  %v455_v7 = vld [vmem:[#allocation2 + $0x5e8] sm:$0xff]  ;;  %v7522_v10 = vpack.c.bf16 %v438_v2, %v430_v1  ;;  %v7586_v11 = vpack.c.bf16 %v440_v5, %v432_v3  ;;  %v512_v1 = vld [vmem:[#allocation2 + $0x7b0] sm:$0xff]  ;;  %v809_v5 = vlaneseq }
  0x8e   : > { %v7524_v12 = vpack.c.bf16 %v455_v7, %v447_v6  ;;  %v520_v2 = vld [vmem:[#allocation2 + $0x7f0] sm:$0xff] }
  0x8f   : > { %7503 = vmatpush1.bf16.msra.mxu0 %v7502_v13  ;;  %v446_v13 = vld [vmem:[#allocation2 + $0x5a0] sm:$0xff]  ;;  %v8052_v6 = vand.u32 127, %v809_v5 }
  0x90   : > { %7567 = vmatpush1.bf16.msra.mxu1 %v7566_v14  ;;  %7505 = vmatprep.subr.bf16.mxu0 %v7504_v15  ;;  %v454_v14 = vld [vmem:[#allocation2 + $0x5e0] sm:$0xff]  ;;  %v448_v15 = vld [vmem:[#allocation2 + $0x5b0] sm:$0xff] }
  0x91   : > { %7569 = vmatprep.subr.bf16.mxu1 %v7568_v21  ;;  %v471_v21 = vld [vmem:[#allocation2 + $0x668] sm:$0xff]  ;;  %v7526_v24 = vpack.c.bf16 %v454_v14, %v446_v13  ;;  %v7590_v25 = vpack.c.bf16 %v456_v18, %v448_v15  ;;  %v813_v7 = vadd.s32 384, %v8052_v6  ;;  %v811_v9 = vadd.s32 128, %v8052_v6  ;;  %v4125_v5 = vld [vmem:[%s9729_s3] sm:$0xff] }
  0x92   : > { %v7528_v26 = vpack.c.bf16 %v471_v21, %v463_v20  ;;  %vm1037_vm1 = vcmp.lt.s32.totalorder %v8052_v6, 32  ;;  %vm1003_vm10 = vcmp.lt.s32.totalorder %v8052_v6, 33 }
  0x93   : > { %7507 = vmatpush1.bf16.msra.mxu0 %v7506_v27  ;;  %v462_v27 = vld [vmem:[#allocation2 + $0x620] sm:$0xff]  ;;  %v821_v8 = vcvt.s32.f32 %v813_v7  ;;  %v819_v13 = vcvt.s32.f32 %v811_v9  ;;  %v8293_v9 = vadd.s32 512, %v8052_v6 }
  0x94   : > { %7571 = vmatpush1.bf16.msra.mxu1 %v7570_v28  ;;  %7509 = vmatprep.subr.bf16.mxu0 %v7508_v29  ;;  %v470_v28 = vld [vmem:[#allocation2 + $0x660] sm:$0xff]  ;;  %v464_v29 = vld [vmem:[#allocation2 + $0x630] sm:$0xff] }
  0x95   : > { %7573 = vmatprep.subr.bf16.mxu1 %v7572_v33  ;;  %v487_v33 = vld [vmem:[#allocation2 + $0x6e8] sm:$0xff]  ;;  %v7530_v36 = vpack.c.bf16 %v470_v28, %v462_v27  ;;  %v7594_v37 = vpack.c.bf16 %v472_v31, %v464_v29  ;;  %v828_v21 = vmul.f32 0.03125, %v819_v13 }
  0x96   : > { %v7532_v38 = vpack.c.bf16 %v487_v33, %v479_v32 }
  0x97   : > { %7511 = vmatpush1.bf16.msra.mxu0 %v7510_v39  ;;  %v478_v39 = vld [vmem:[#allocation2 + $0x6a0] sm:$0xff] }
  0x98   : > { %7575 = vmatpush1.bf16.msra.mxu1 %v7574_v40  ;;  %7513 = vmatprep.subr.bf16.mxu0 %v7512_v41  ;;  %v486_v40 = vld [vmem:[#allocation2 + $0x6e0] sm:$0xff]  ;;  %v480_v41 = vld [vmem:[#allocation2 + $0x6b0] sm:$0xff] }
  0x99   : > { %7577 = vmatprep.subr.bf16.mxu1 %v7576_v45  ;;  %v503_v45 = vld [vmem:[#allocation2 + $0x768] sm:$0xff]  ;;  %v7534_v48 = vpack.c.bf16 %v486_v40, %v478_v39  ;;  %v7598_v49 = vpack.c.bf16 %v488_v43, %v480_v41 }
  0x9a   : > { %v7536_v50 = vpack.c.bf16 %v503_v45, %v495_v44 }
  0x9b   : > { %7515 = vmatpush1.bf16.msra.mxu0 %v7514_v51  ;;  %v494_v51 = vld [vmem:[#allocation2 + $0x720] sm:$0xff] }
  0x9c   : > { %7579 = vmatpush1.bf16.msra.mxu1 %v7578_v52  ;;  %7517 = vmatprep.subr.bf16.mxu0 %v7516_v53  ;;  %v502_v52 = vld [vmem:[#allocation2 + $0x760] sm:$0xff]  ;;  %v496_v53 = vld [vmem:[#allocation2 + $0x730] sm:$0xff] }
  0x9d   : > { %7581 = vmatprep.subr.bf16.mxu1 %v7580_v56  ;;  %v519_v56 = vld [vmem:[#allocation2 + $0x7e8] sm:$0xff]  ;;  %v7538_v59 = vpack.c.bf16 %v502_v52, %v494_v51  ;;  %v7602_v60 = vpack.c.bf16 %v504_v19, %v496_v53 }
  0x9e   : > { %v7540_v61 = vpack.c.bf16 %v519_v56, %v511_v55 }
  0x9f   : > { %7519 = vmatpush1.bf16.msra.mxu0 %v7518_v62  ;;  %v510_v62 = vld [vmem:[#allocation2 + $0x7a0] sm:$0xff] }
  0xa0   : > { %7583 = vmatpush1.bf16.msra.mxu1 %v7582_v63  ;;  %7521 = vmatprep.subr.bf16.mxu0 %v7520_v0  ;;  %v518_v63 = vld [vmem:[#allocation2 + $0x7e0] sm:$0xff]  ;;  %v7604_v0 = vpack.c.bf16 %v521_v58, %v513_v57 }
  0xa1   : > { %7585 = vmatprep.subr.bf16.mxu1 %v7584_v4  ;;  %v7542_v3 = vpack.c.bf16 %v518_v63, %v510_v62  ;;  %v7606_v4 = vpack.c.bf16 %v520_v2, %v512_v1 }
  0xa3   : > { %7523 = vmatpush1.bf16.msra.mxu0 %v7522_v10  ;;  %v812_v10 = vadd.s32 256, %v8052_v6 }
  0xa4   : > { %7587 = vmatpush1.bf16.msra.mxu1 %v7586_v11  ;;  %7525 = vmatprep.subr.bf16.mxu0 %v7524_v12  ;;  %v830_v11 = vmul.f32 0.03125, %v821_v8 }
  0xa5   : > { %7589 = vmatprep.subr.bf16.mxu1 %v7588_v17  ;;  %v820_v14 = vcvt.s32.f32 %v812_v10  ;;  %v8296_v10 = vadd.s32 640, %v8052_v6 }
  0xa6   : > { %v8059_v15 = vfloor.f32 %v830_v11 }
  0xa7   : > { %7527 = vmatpush1.bf16.msra.mxu0 %v7526_v24  ;;  %v829_v22 = vmul.f32 0.03125, %v820_v14  ;;  %v9761_v24 = vmov 0.0  }
  0xa8   : > { %7591 = vmatpush1.bf16.msra.mxu1 %v7590_v25  ;;  %7529 = vmatprep.subr.bf16.mxu0 %v7528_v26  ;;  %v846_v20 = vmul.f32 32.0, %v8059_v15  ;;  %v8080_v25 = vfloor.f32 %v828_v21  ;;  %v862_v43 = vmul.f32 0.03125, %v8059_v15  ;;  %v9738_v21 = vcvt.s32.f32 %v8296_v10 }
  0xa9   : > { %7593 = vmatprep.subr.bf16.mxu1 %v7592_v30  ;;  %v8082_v26 = vfloor.f32 %v829_v22 }
  0xaa   : > { %v8074_v23 = vsub.f32 %v821_v8, %v846_v20  ;;  %v844_v27 = vmul.f32 32.0, %v8080_v25  ;;  %v860_v35 = vmul.f32 0.03125, %v8080_v25  ;;  %v9737_v20 = vcvt.s32.f32 %v8293_v9 }
  0xab   : > { %7531 = vmatpush1.bf16.msra.mxu0 %v7530_v36  ;;  %v845_v28 = vmul.f32 32.0, %v8082_v26 }
  0xac   : > { %7595 = vmatpush1.bf16.msra.mxu1 %v7594_v37  ;;  %7533 = vmatprep.subr.bf16.mxu0 %v7532_v38  ;;  %v8090_v29 = vsub.f32 %v819_v13, %v844_v27  ;;  %v868_v37 = vfloor.f32 %v860_v35  ;;  %v817_v13 = vadd.s32 896, %v8052_v6  ;;  %v818_v27 = vcvt.s32.f32 %v8052_v6 }
  0xad   : > { %7597 = vmatprep.subr.bf16.mxu1 %v7596_v42  ;;  %v8092_v30 = vsub.f32 %v820_v14, %v845_v28  ;;  %v861_v42 = vmul.f32 0.03125, %v8082_v26  ;;  %v831_v35 = vmul.f32 0.03125, %v9737_v20  ;;  %vm926_vm6 = vcmp.gt.f32.partialorder %v8074_v23, 0.5 }
  0xae   : > { %v876_v40 = vmul.f32 32.0, %v868_v37  ;;  %v825_v22 = vcvt.s32.f32 %v817_v13  ;;  %v832_v37 = vmul.f32 0.03125, %v9738_v21  ;;  %vm924_vm7 = vcmp.gt.f32.partialorder %v8090_v29, 0.5 }
  0xaf   : > { %7535 = vmatpush1.bf16.msra.mxu0 %v7534_v48  ;;  %v869_v47 = vfloor.f32 %v861_v42  ;;  %v870_v48 = vfloor.f32 %v862_v43  ;;  %v827_v42 = vmul.f32 0.03125, %v818_v27  ;;  %v839_v43 = vfloor.f32 %v831_v35 }
  0xb0   : > { %7599 = vmatpush1.bf16.msra.mxu1 %v7598_v49  ;;  %7537 = vmatprep.subr.bf16.mxu0 %v7536_v50  ;;  %v8202_v45 = vsub.f32 %v8080_v25, %v876_v40  ;;  %vm925_vm8 = vcmp.gt.f32.partialorder %v8092_v30, 0.5  ;;  %vm942_vm9 = vcmp.lt.f32.partialorder %v8074_v23, 30.5  ;;  %vm940_vm11 = vcmp.lt.f32.partialorder %v8090_v29, 30.5 }
  0xb1   : > { %7601 = vmatprep.subr.bf16.mxu1 %v7600_v54  ;;  %v877_v51 = vmul.f32 32.0, %v869_v47  ;;  %v878_v53 = vmul.f32 32.0, %v870_v48  ;;  %v840_v47 = vfloor.f32 %v832_v37  ;;  %vm941_vm12 = vcmp.lt.f32.partialorder %v8092_v30, 30.5 }
  0xb2   : > { %9827 = vst [vmem:[#allocation15_spill] sm:$0xff] %v8202_v45  ;;  %vm892_vm0 = vcmp.gt.f32.partialorder %v8202_v45, 0.5 }
  0xb3   : > { %7539 = vmatpush1.bf16.msra.mxu0 %v7538_v59  ;;  %v8221_v52 = vsel %vm892_vm0, 1.0, %v9761_v24  ;;  %v8229_v56 = vsub.f32 %v8082_v26, %v877_v51  ;;  %v8237_v58 = vsub.f32 %v8059_v15, %v878_v53  ;;  %v8304_v15 = vadd.s32 768, %v8052_v6 }
  0xb4   : > { %7603 = vmatpush1.bf16.msra.mxu1 %v7602_v60  ;;  %7541 = vmatprep.subr.bf16.mxu0 %v7540_v61 }
  0xb5   : > { %7605 = vmatprep.subr.bf16.mxu1 %v7604_v0  ;;  %9829 = vst [vmem:[#allocation17_spill] sm:$0xff] %v8229_v56  ;;  %9830 = vst [vmem:[#allocation18_spill] sm:$0xff] %v8237_v58  ;;  %vm893_vm3 = vcmp.gt.f32.partialorder %v8229_v56, 0.5  ;;  %vm894_vm4 = vcmp.gt.f32.partialorder %v8237_v58, 0.5  ;;  %v9736_v25 = vcvt.s32.f32 %v8304_v15  ;;  %v848_v56 = vmul.f32 32.0, %v840_v47 }
  0xb6   : > { %v8249_v60 = vsel %vm893_vm3, 1.0, %v9761_v24  ;;  %v8256_v63 = vsel %vm894_vm4, 1.0, %v9761_v24  ;;  %v9845_v29 = vcvt.s32.f32 %v8304_v15 }
  0xb7   : > { %7543 = vmatpush1.bf16.msra.mxu0 %v7542_v3  ;;  %v8270_v3 = vld [vmem:[%s9728_s2 + $0x8] sm:$0xff]  ;;  %v833_v40 = vmul.f32 0.03125, %v9736_v25 }
  0xb8   : > { %7607 = vmatpush1.bf16.msra.mxu1 %v7606_v4  ;;  %v7908_v4 = vmov 0  }
  0xb9   : > { %7798 = vset.pattern.permute.xlu0 %v7908_v4 }
  0xba   : > { %732 = vmatmul.mubr.f32.vlgmr.msra.gmra.mrb[2].mxu0 %v8038_v16 }
  0xbb   : > { %803 = vmatmul.mubr.f32.vlgmr.msra.gmra.mrb[2].mxu1 %v8038_v16  ;;  %1149 = vmatprep.mubr.f32.mxu0 %v9761_v24 }
  0xbc   : > { %1220 = vmatprep.mubr.f32.mxu1 %v9761_v24 }
 0x14d   : > { %v8057_v12 = vpop.f32.mrb[0].mxu0 }
 0x14e   : > { %9820 = vst [vmem:[#allocation8_spill] sm:$0xff] %v8057_v12  ;;  %v8061_v17 = vpop.f32.mrb[0].mxu1  ;;  %1021 = vrot.lane.b32.xlu1 %v8057_v12, %s7899_s15  ;;  %v8065_v16 = vpop.f32.mrb[1].mxu0 }
 0x14f   : > { %9821 = vst [vmem:[#allocation9_spill] sm:$0xff] %v8061_v17  ;;  %9822 = vst [vmem:[#allocation10_spill] sm:$0xff] %v8065_v16  ;;  %1025 = vrot.lane.b32.xlu0 %v8061_v17, %s7899_s15  ;;  %v8069_v18 = vpop.f32.mrb[1].mxu1 }
 0x152   : > { %987 = vrot.lane.b32.xlu1 %v8057_v12, %s7900_s16 }
 0x153   : > { %991 = vrot.lane.b32.xlu0 %v8061_v17, %s7900_s16 }
 0x156   : > { %1680 = vrot.lane.b32.xlu1 %v8057_v12, %s7902_s17 }
 0x157   : > { %1684 = vrot.lane.b32.xlu0 %v8061_v17, %s7902_s17 }
 0x15a   : > { %2034 = vrot.lane.b32.xlu1 %v8057_v12, %s7903_s18 }
 0x15b   : > { %2038 = vrot.lane.b32.xlu0 %v8061_v17, %s7903_s18 }
 0x15e   : > { %1023 = vrot.lane.b32.xlu1 %v8065_v16, %s7899_s15 }
 0x15f   : > { %2713 = vrot.lane.b32.xlu0 %v8061_v17, %s7904_s19 }
 0x162   : > { %993 = vrot.lane.b32.xlu1 %v8069_v18, %s7900_s16 }
 0x163   : > { %2709 = vrot.lane.b32.xlu0 %v8057_v12, %s7904_s19 }
 0x166   : > { %1686 = vrot.lane.b32.xlu1 %v8069_v18, %s7902_s17 }
 0x167   : > { %1027 = vrot.lane.b32.xlu0 %v8069_v18, %s7899_s15 }
 0x16a   : > { %2040 = vrot.lane.b32.xlu1 %v8069_v18, %s7903_s18 }
 0x16b   : > { %989 = vrot.lane.b32.xlu0 %v8065_v16, %s7900_s16 }
 0x16e   : > { %2711 = vrot.lane.b32.xlu1 %v8065_v16, %s7904_s19 }
 0x16f   : > { %1682 = vrot.lane.b32.xlu0 %v8065_v16, %s7902_s17 }
 0x173   : > { %2036 = vrot.lane.b32.xlu0 %v8065_v16, %s7903_s18 }
 0x177   : > { %2715 = vrot.lane.b32.xlu0 %v8069_v18, %s7904_s19 }
 0x18d   : > { %v8122_v31 = vpop.f32.mrb[2].mxu0 }
 0x18e   : > { %9823 = vst [vmem:[#allocation11_spill] sm:$0xff] %v8122_v31  ;;  %v8124_v32 = vpop.f32.mrb[2].mxu1  ;;  %1029 = vrot.lane.b32.xlu1 %v8122_v31, %s7899_s15  ;;  %v8128_v33 = vpop.f32.mrb[3].mxu0 }
 0x18f   : > { %9824 = vst [vmem:[#allocation12_spill] sm:$0xff] %v8124_v32  ;;  %9825 = vst [vmem:[#allocation13_spill] sm:$0xff] %v8128_v33  ;;  %1033 = vrot.lane.b32.xlu0 %v8124_v32, %s7899_s15  ;;  %v8132_v34 = vpop.f32.mrb[3].mxu1 }
 0x190   : > { %9826 = vst [vmem:[#allocation14_spill] sm:$0xff] %v8132_v34 }
 0x192   : > { %995 = vrot.lane.b32.xlu1 %v8122_v31, %s7900_s16 }
 0x193   : > { %999 = vrot.lane.b32.xlu0 %v8124_v32, %s7900_s16 }
 0x196   : > { %1688 = vrot.lane.b32.xlu1 %v8122_v31, %s7902_s17 }
 0x197   : > { %1692 = vrot.lane.b32.xlu0 %v8124_v32, %s7902_s17 }
 0x19a   : > { %2042 = vrot.lane.b32.xlu1 %v8122_v31, %s7903_s18 }
 0x19b   : > { %2046 = vrot.lane.b32.xlu0 %v8124_v32, %s7903_s18 }
 0x19e   : > { %2717 = vrot.lane.b32.xlu1 %v8122_v31, %s7904_s19 }
 0x19f   : > { %1031 = vrot.lane.b32.xlu0 %v8128_v33, %s7899_s15 }
 0x1a2   : > { %1035 = vrot.lane.b32.xlu1 %v8132_v34, %s7899_s15 }
 0x1a3   : > { %2721 = vrot.lane.b32.xlu0 %v8124_v32, %s7904_s19 }
 0x1a6   : > { %1001 = vrot.lane.b32.xlu1 %v8132_v34, %s7900_s16 }
 0x1a7   : > { %997 = vrot.lane.b32.xlu0 %v8128_v33, %s7900_s16 }
 0x1aa   : > { %3071 = vrot.lane.b32.xlu1 %v8122_v31, %s7905_s20 }
 0x1ab   : > { %3069 = vrot.lane.b32.xlu0 %v8069_v18, %s7905_s20 }
 0x1ae   : > { %1694 = vrot.lane.b32.xlu1 %v8132_v34, %s7902_s17 }
 0x1af   : > { %1690 = vrot.lane.b32.xlu0 %v8128_v33, %s7902_s17 }
 0x1b2   : > { %3065 = vrot.lane.b32.xlu1 %v8065_v16, %s7905_s20 }
 0x1b3   : > { %3067 = vrot.lane.b32.xlu0 %v8061_v17, %s7905_s20 }
 0x1b6   : > { %2048 = vrot.lane.b32.xlu1 %v8132_v34, %s7903_s18 }
 0x1b7   : > { %2044 = vrot.lane.b32.xlu0 %v8128_v33, %s7903_s18 }
 0x1ba   : > { %3425 = vrot.lane.b32.xlu1 %v8122_v31, %s7906_s26 }
 0x1bb   : > { %3063 = vrot.lane.b32.xlu0 %v8057_v12, %s7905_s20 }
 0x1be   : > { %3419 = vrot.lane.b32.xlu1 %v8065_v16, %s7906_s26 }
 0x1bf   : > { %3075 = vrot.lane.b32.xlu0 %v8124_v32, %s7905_s20 }
 0x1c0   : > { %v8183_v36 = vpop.permute.xlu1 %1021 }
 0x1c1   : > { %v1026_v38 = vpop.permute.xlu0 %1025 }
 0x1c2   : > { %3779 = vrot.lane.b32.xlu1 %v8122_v31, %s7907_s28 }
 0x1c3   : > { %3423 = vrot.lane.b32.xlu0 %v8069_v18, %s7906_s26 }
 0x1c4   : > { %v8189_v39 = vpop.permute.xlu1 %987 }
 0x1c5   : > { %v8191_v41 = vpop.permute.xlu0 %991 }
 0x1c6   : > { %3773 = vrot.lane.b32.xlu1 %v8065_v16, %s7907_s28 }
 0x1c7   : > { %3421 = vrot.lane.b32.xlu0 %v8061_v17, %s7906_s26 }
 0x1c8   : > { %v8199_v44 = vpop.permute.xlu1 %1680 }
 0x1c9   : > { %v8204_v46 = vpop.permute.xlu0 %1684 }
 0x1ca   : > { %2723 = vrot.lane.b32.xlu1 %v8132_v34, %s7904_s19 }
 0x1cb   : > { %3417 = vrot.lane.b32.xlu0 %v8057_v12, %s7906_s26 }
 0x1cc   : > { %v8210_v49 = vpop.permute.xlu1 %2034 }
 0x1cd   : > { %v8213_v50 = vpop.permute.xlu0 %2038 }
 0x1ce   : > { %2719 = vrot.lane.b32.xlu1 %v8128_v33, %s7904_s19 }
 0x1cf   : > { %3429 = vrot.lane.b32.xlu0 %v8124_v32, %s7906_s26 }
 0x1d0   : > { %v1024_v54 = vpop.permute.xlu1 %1023 }
 0x1d1   : > { %v8223_v19 = vpop.permute.xlu0 %2713  ;;  %v1044_v55 = vsel %vm1037_vm1, %v8183_v36, %v1024_v54  ;;  %v1043_v61 = vsel %vm1037_vm1, %v1024_v54, %v1026_v38  ;;  %v841_v54 = vfloor.f32 %v833_v40 }
 0x1d2   : > { %9828 = vst [vmem:[#allocation16_spill] sm:$0xff] %v8223_v19  ;;  %v1047_v57 = vmul.f32 %v1044_v55, %v8221_v52  ;;  %3077 = vrot.lane.b32.xlu1 %v8132_v34, %s7905_s20  ;;  %v1048_v2 = vmul.f32 %v1043_v61, %v8249_v60  ;;  %v835_v55 = vfloor.f32 %v827_v42  ;;  %v864_v61 = vmul.f32 0.03125, %v840_v47 }
 0x1d3   : > { %3777 = vrot.lane.b32.xlu0 %v8069_v18, %s7907_s28  ;;  %v8334_v42 = vsel %vm926_vm6, 1.0, %v9761_v24  ;;  %v849_v19 = vmul.f32 32.0, %v841_v54 }
 0x1d4   : > { %7186 = vmatprep.subr.msk.mxu0 %vm1060_vm2, %v1047_v57  ;;  %v8288_v7 = vpop.permute.xlu1 %993  ;;  %v863_v57 = vmul.f32 0.03125, %v839_v43  ;;  %v872_v25 = vfloor.f32 %v864_v61  ;;  %9834 = vst [vmem:[#allocation22_spill] sm:$0xff] %v8334_v42 }
 0x1d5   : > { %v8240_v59 = vpop.permute.xlu0 %2709  ;;  %v8403_v30 = vsub.f32 %v9845_v29, %v849_v19 }
 0x1d6   : > { %9831 = vst [vmem:[#allocation19_spill] sm:$0xff] %v8240_v59  ;;  %3073 = vrot.lane.b32.xlu1 %v8128_v33, %s7905_s20  ;;  %v871_v13 = vfloor.f32 %v863_v57  ;;  %v880_v31 = vmul.f32 32.0, %v872_v25  ;;  %v8348_v25 = vsel %vm924_vm7, 1.0, %v9761_v24 }
 0x1d7   : > { %3775 = vrot.lane.b32.xlu0 %v8061_v17, %s7907_s28  ;;  %9835 = vst [vmem:[#allocation23_spill] sm:$0xff] %v8348_v25 }
 0x1d8   : > { %v8298_v11 = vpop.permute.xlu1 %1686  ;;  %v879_v21 = vmul.f32 32.0, %v871_v13  ;;  %v847_v13 = vmul.f32 32.0, %v839_v43 }
 0x1d9   : > { %v8253_v62 = vpop.permute.xlu0 %1027 }
 0x1da   : > { %v1042_v0 = vsel %vm1037_vm1, %v1026_v38, %v8253_v62  ;;  %3431 = vrot.lane.b32.xlu1 %v8132_v34, %s7906_s26  ;;  %v834_v38 = vmul.f32 0.03125, %v825_v22 }
 0x1db   : > { %v1049_v1 = vmul.f32 %v1042_v0, %v8256_v63  ;;  %3771 = vrot.lane.b32.xlu0 %v8057_v12, %s7907_s28  ;;  %v8351_v12 = vsel %vm925_vm8, 1.0, %v9761_v24  ;;  %vm1696_vm8 = vcmp.lt.s32.totalorder %v8052_v6, 31 }
 0x1dc   : > { %v8309_v26 = vpop.permute.xlu1 %2040  ;;  %v842_v51 = vfloor.f32 %v834_v38  ;;  %9836 = vst [vmem:[#allocation24_spill] sm:$0xff] %v8351_v12 }
 0x1dd   : > { %7189 = vmatprep.subr.msk.mxu1 %vm1060_vm2, %v1049_v1  ;;  %v8290_v8 = vpop.permute.xlu0 %989  ;;  %v859_v1 = vmul.f32 0.03125, %v835_v55 }
 0x1de   : > { %7190 = vmatpush1.msk.msra.mxu1 %vm1060_vm2, %v1048_v2  ;;  %3427 = vrot.lane.b32.xlu1 %v8128_v33, %s7906_s26  ;;  %v866_v2 = vmul.f32 0.03125, %v842_v51 }
 0x1df   : > { %3783 = vrot.lane.b32.xlu0 %v8124_v32, %s7907_s28  ;;  %7191 = vmatmul.mubr.msk.f32.vlgmr.msra.gmra.mrb[4].mxu1 %vm9752_vm5, %v8270_v3  ;;  %v867_v37 = vfloor.f32 %v859_v1  ;;  %v850_v32 = vmul.f32 32.0, %v842_v51 }
 0x1e0   : > { %1362 = vmatprep.mubr.f32.mxu1 %v9761_v24  ;;  %v8320_v48 = vpop.permute.xlu1 %2711  ;;  %v874_v38 = vfloor.f32 %v866_v2 }
 0x1e1   : > { %v8301_v14 = vpop.permute.xlu0 %1682  ;;  %9832 = vst [vmem:[#allocation20_spill] sm:$0xff] %v8320_v48  ;;  %v875_v61 = vmul.f32 32.0, %v867_v37  ;;  %v8353_v37 = vsub.f32 %v839_v43, %v879_v21  ;;  %v8364_v23 = vsub.f32 %v825_v22, %v850_v32  ;;  %v9842_v43 = vcvt.s32.f32 %v8296_v10 }
 0x1e2   : > { %3785 = vrot.lane.b32.xlu1 %v8132_v34, %s7907_s28  ;;  %v882_v59 = vmul.f32 32.0, %v874_v38  ;;  %v8355_v38 = vsub.f32 %v840_v47, %v880_v31  ;;  %v8367_v34 = vsel %vm942_vm9, 1.0, %v9761_v24  ;;  %v9843_v32 = vcvt.s32.f32 %v8293_v9 }
 0x1e3   : > { %4128 = vperm.xlu0 %7798, %v4125_v5   ;;  %v865_v5 = vmul.f32 0.03125, %v841_v54  ;;  %9837 = vst [vmem:[#allocation25_spill] sm:$0xff] %v8353_v37  ;;  %v8360_v45 = vsub.f32 %v835_v55, %v875_v61  ;;  %v8377_v47 = vsub.f32 %v9842_v43, %v848_v56  ;;  %v8391_v22 = vmul.f32 %v8351_v12, %v8249_v60 }
 0x1e4   : > { %9838 = vst [vmem:[#allocation26_spill] sm:$0xff] %v8355_v38  ;;  %v8362_v48 = vsub.f32 %v842_v51, %v882_v59  ;;  %v8381_v59 = vmul.f32 %v8348_v25, %v8221_v52  ;;  %vm895_vm13 = vcmp.gt.f32.partialorder %v8353_v37, 0.5  ;;  %vm896_vm14 = vcmp.gt.f32.partialorder %v8355_v38, 0.5 }
 0x1e5   : > { %v8312_v28 = vpop.permute.xlu0 %2036  ;;  %v873_v40 = vfloor.f32 %v865_v5  ;;  %v8344_v5 = vmul.f32 %v8334_v42, %v8256_v63  ;;  %9839 = vst [vmem:[#allocation27_spill] sm:$0xff] %v8360_v45  ;;  %vm891_vm0 = vcmp.gt.f32.partialorder %v8360_v45, 0.5  ;;  %vm930_vm4 = vcmp.gt.f32.partialorder %v8364_v23, 0.5 }
 0x1e6   : > { %3781 = vrot.lane.b32.xlu1 %v8128_v33, %s7907_s28  ;;  %v843_v33 = vmul.f32 32.0, %v835_v55  ;;  %9840 = vst [vmem:[#allocation28_spill] sm:$0xff] %v8362_v48  ;;  %vm898_vm3 = vcmp.gt.f32.partialorder %v8362_v48, 0.5  ;;  %v8406_v9 = vsel %vm940_vm11, 1.0, %v9761_v24  ;;  %v8409_v10 = vsel %vm941_vm12, 1.0, %v9761_v24 }
 0x1e7   : > { %v881_v2 = vmul.f32 32.0, %v873_v40  ;;  %vm928_vm7 = vcmp.gt.f32.partialorder %v8377_v47, 0.5  ;;  %v8416_v51 = vsel %vm895_vm13, 1.0, %v9761_v24  ;;  %v8425_v15 = vsel %vm896_vm14, 1.0, %v9761_v24 }
 0x1e8   : > { %v8369_v17 = vsub.f32 %v818_v27, %v843_v33  ;;  %v8387_v33 = vsub.f32 %v9843_v32, %v847_v13  ;;  %v8431_v55 = vsel %vm898_vm3, 1.0, %v9761_v24  ;;  %v8434_v61 = vsel %vm930_vm4, 1.0, %v9761_v24 }
 0x1e9   : > { %v8322_v53 = vpop.permute.xlu0 %2715  ;;  %v8373_v31 = vsub.f32 %v841_v54, %v881_v2  ;;  %v8428_v54 = vsel %vm891_vm0, 1.0, %v9761_v24  ;;  %vm929_vm11 = vcmp.gt.f32.partialorder %v8403_v30, 0.5  ;;  %v8444_v32 = vsel %vm928_vm7, 1.0, %v9761_v24 }
 0x1ea   : > { %9833 = vst [vmem:[#allocation21_spill] sm:$0xff] %v8322_v53  ;;  %vm923_vm15 = vcmp.gt.f32.partialorder %v8369_v17, 0.5  ;;  %vm939_vm9 = vcmp.lt.f32.partialorder %v8369_v17, 30.5  ;;  %vm927_vm5 = vcmp.gt.f32.partialorder %v8387_v33, 0.5  ;;  %v8492_v53 = vmul.f32 %v8444_v32, %v8425_v15 }
 0x1eb   : > { %9841 = vst [vmem:[#allocation29_spill] sm:$0xff] %v8373_v31  ;;  %vm897_vm6 = vcmp.gt.f32.partialorder %v8373_v31, 0.5  ;;  %v8420_v19 = vsel %vm923_vm15, 1.0, %v9761_v24  ;;  %vm946_vm12 = vcmp.lt.f32.partialorder %v8364_v23, 30.5  ;;  %vm9852_vm13 = vcmask 31744  }
 0x1ec   : > { %9846 = vst [vmem:[#allocation31_spill] sm:$0xff] %v8420_v19  ;;  %v8437_v2 = vsel %vm897_vm6, 1.0, %v9761_v24  ;;  %v8459_v31 = vmul.f32 %v8420_v19, %v8428_v54  ;;  %9851 = vst [vmem:[#allocation35_spill] sm:$0xff] %v8492_v53  ;;  %vm944_vm14 = vcmp.lt.f32.partialorder %v8377_v47, 30.5  ;;  %v1701_v23 = vsel %vm1696_vm8, %v8204_v46, %v8298_v11 }
 0x1ed   : > { %vm945_vm15 = vcmp.lt.f32.partialorder %v8403_v30, 30.5  ;;  %vm943_vm0 = vcmp.lt.f32.partialorder %v8387_v33, 30.5  ;;  %vm2050_vm6 = vcmp.lt.s32.totalorder %v8052_v6, 1 }
 0x200   : > { %v8324_v0 = vpop.permute.xlu1 %1029 }
 0x201   : > { %v8326_v4 = vpop.permute.xlu0 %1033  ;;  %v1041_v24 = vsel %vm1037_vm1, %v8253_v62, %v8324_v0 }
 0x204   : > { %v8329_v35 = vpop.permute.xlu1 %995 }
 0x205   : > { %v8331_v20 = vpop.permute.xlu0 %999 }
 0x208   : > { %v8338_v57 = vpop.permute.xlu1 %1688 }
 0x209   : > { %v8340_v1 = vpop.permute.xlu0 %1692 }
 0x20c   : > { %v8358_v40 = vpop.permute.xlu1 %2042 }
 0x20d   : > { %v8371_v21 = vpop.permute.xlu0 %2046 }
 0x210   : > { %v8396_v56 = vpop.permute.xlu1 %2717 }
 0x211   : > { %9844 = vst [vmem:[#allocation30_spill] sm:$0xff] %v8396_v56  ;;  %v1032_v27 = vpop.permute.xlu0 %1031 }
 0x212   : > { %v1040_v13 = vsel %vm1037_vm1, %v8324_v0, %v1032_v27  ;;  %v1039_v29 = vsel %vm1037_vm1, %v1032_v27, %v8326_v4  ;;  %v9849_v0 = vmov 0.0  }
 0x213   : > { %v1051_v62 = vmul.f32 %v1040_v13, %v8425_v15  ;;  %v1050_v13 = vmul.f32 %v1041_v24, %v8416_v51  ;;  %v8499_v56 = vsel %vm927_vm5, 1.0, %v9849_v0  ;;  %vm9854_vm5 = vmmov %vm9852_vm13  ;;  %v8611_v47 = vsel %vm945_vm15, 1.0, %v9849_v0 }
 0x214   : > { %v1036_v43 = vpop.permute.xlu1 %1035  ;;  %vm9859_vm3 = vmmov %vm9854_vm5 }
 0x215   : > { %v1038_v38 = vsel %vm1037_vm1, %v8326_v4, %v1036_v43  ;;  %v1045_v37 = vsel %vm1037_vm1, %v1036_v43, %v8183_v36  ;;  %v8455_v48 = vpop.permute.xlu0 %2721  ;;  %v8469_v4 = vmul.f32 %v8434_v61, %v8431_v55  ;;  %v1008_v36 = vsel %vm1003_vm10, %v8191_v41, %v8288_v7  ;;  %vm9863_vm4 = vmmov %vm9859_vm3 }
 0x216   : > { %9847 = vst [vmem:[#allocation32_spill] sm:$0xff] %v8455_v48  ;;  %v1046_v27 = vmul.f32 %v1045_v37, %v8428_v54  ;;  %v1053_v45 = vmul.f32 %v1038_v38, %v8431_v55  ;;  %v1010_v43 = vsel %vm1003_vm10, %v8189_v39, %v8290_v8  ;;  %v8481_v37 = vsel %vm929_vm11, 1.0, %v9849_v0  ;;  %vm9867_vm7 = vmmov %vm9859_vm3 }
 0x217   : > { %9848 = vst [vmem:[#allocation33_spill] sm:$0xff] %v8469_v4  ;;  %9850 = vst [vmem:[#allocation34_spill] sm:$0xff] %v8481_v37  ;;  %v1009_v38 = vsel %vm1003_vm10, %v8290_v8, %v8191_v41  ;;  %v1052_v48 = vmul.f32 %v1039_v29, %v8437_v2  ;;  %v1015_v24 = vmul.f32 %v1008_v36, %v8344_v5  ;;  %v8529_v36 = vsel %vm946_vm12, 1.0, %v9849_v0 }
 0x218   : > { %7187 = vmatpush1.msk.msra.mxu0 %vm1060_vm2, %v1046_v27  ;;  %7195 = vmatprep.subr.msk.mxu1 %vm1060_vm2, %v1053_v45  ;;  %v1002_v16 = vpop.permute.xlu1 %1001  ;;  %v1013_v29 = vmul.f32 %v1010_v43, %v8381_v59  ;;  %v8515_v58 = vmul.f32 %v8481_v37, %v8437_v2  ;;  %v8537_v43 = vmul.f32 %v8406_v9, %v8221_v52  ;;  %vm9870_vm11 = vmmov %vm9859_vm3 }
 0x219   : > { %v1004_v41 = vsel %vm1003_vm10, %v8331_v20, %v1002_v16  ;;  %v1011_v45 = vsel %vm1003_vm10, %v1002_v16, %v8189_v39  ;;  %v998_v8 = vpop.permute.xlu0 %997  ;;  %7188 = vmatmul.mubr.msk.f32.vlgmr.msra.gmra.mrb[4].mxu0 %vm9852_vm13, %v8270_v3  ;;  %7192 = vmatprep.subr.msk.mxu0 %vm1060_vm2, %v1051_v62  ;;  %v1014_v16 = vmul.f32 %v1009_v38, %v8391_v22  ;;  %vm9871_vm12 = vmmov %vm9859_vm3 }
 0x21a   : > { %v1019_v27 = vmul.f32 %v1004_v41, %v8469_v4  ;;  %9853 = vst [vmem:[#allocation36_spill] sm:$0xff] %v8515_v58  ;;  %7196 = vmatpush1.msk.msra.mxu1 %vm1060_vm2, %v1052_v48  ;;  %v1012_v39 = vmul.f32 %v1011_v45, %v8459_v31  ;;  %v1006_v62 = vsel %vm1003_vm10, %v8329_v35, %v998_v8  ;;  %9856 = vst [vmem:[#allocation38_spill] sm:$0xff] %v8537_v43 }
 0x21b   : > { %7193 = vmatpush1.msk.msra.mxu0 %vm1060_vm2, %v1050_v13  ;;  %7197 = vmatmul.mubr.msk.f32.vlgmr.msra.gmra.mrb[6].mxu1 %vm9854_vm5, %v8270_v3  ;;  %v8533_v48 = vmul.f32 %v8367_v34, %v8256_v63  ;;  %v1005_v38 = vsel %vm1003_vm10, %v998_v8, %v8331_v20  ;;  %v8553_v41 = vmul.f32 %v8409_v10, %v8249_v60  ;;  %v8558_v20 = vsel %vm939_vm9, 1.0, %v9849_v0  ;;  %v1020_v8 = vld [vmem:[%s9728_s2] sm:$0xff]  ;;  %vm9868_vm9 = vmmov %vm9859_vm3 }
 0x21c   : > { %7201 = vmatprep.subr.msk.mxu1 %vm1060_vm2, %v1015_v24  ;;  %7198 = vmatprep.subr.msk.mxu0 %vm1060_vm2, %v1013_v29  ;;  %v8544_v13 = vpop.permute.xlu1 %3071  ;;  %v8570_v24 = vmul.f32 %v8499_v56, %v8416_v51  ;;  %v1017_v17 = vmul.f32 %v1006_v62, %v8492_v53  ;;  %v8579_v29 = vmul.f32 %v8529_v36, %v8431_v55  ;;  %vm9872_vm13 = vmmov %vm9859_vm3 }
 0x21d   : > { %9855 = vst [vmem:[#allocation37_spill] sm:$0xff] %v8533_v48  ;;  %9857 = vst [vmem:[#allocation39_spill] sm:$0xff] %v8553_v41  ;;  %7202 = vmatpush1.msk.msra.mxu1 %vm1060_vm2, %v1014_v16  ;;  %1291 = vmatprep.mubr.f32.mxu0 %v9849_v0  ;;  %v8562_v45 = vpop.permute.xlu0 %3069  ;;  %v1007_v16 = vsel %vm1003_vm10, %v8288_v7, %v8329_v35  ;;  %v1018_v4 = vmul.f32 %v1005_v38, %v8515_v58 }
 0x21e   : > { %9858 = vst [vmem:[#allocation40_spill] sm:$0xff] %v8570_v24  ;;  %7207 = vmatprep.subr.msk.mxu1 %vm1060_vm2, %v1019_v27  ;;  %7194 = vmatmul.mubr.msk.f32.vlgmr.msra.gmra.mrb[6].mxu0 %vm9859_vm3, %v8270_v3  ;;  %9860 = vst [vmem:[#allocation41_spill] sm:$0xff] %v8579_v29  ;;  %v8590_v27 = vmul.f32 %v8558_v20, %v8428_v54  ;;  %v8595_v3 = vsel %vm944_vm14, 1.0, %v9849_v0  ;;  %v1708_v62 = vmul.f32 %v1701_v23, %v8533_v48 }
 0x21f   : > { %7199 = vmatpush1.msk.msra.mxu0 %vm1060_vm2, %v1012_v39  ;;  %1531 = vmatprep.mubr.f32.mxu1 %v9849_v0  ;;  %9862 = vst [vmem:[#allocation43_spill] sm:$0xff] %v8595_v3  ;;  %v1702_v7 = vsel %vm1696_vm8, %v8301_v14, %v8204_v46  ;;  %v1703_v35 = vsel %vm1696_vm8, %v8199_v44, %v8301_v14  ;;  %vm9873_vm5 = vmmov %vm9859_vm3 }
 0x220   : > { %9861 = vst [vmem:[#allocation42_spill] sm:$0xff] %v8590_v27  ;;  %7203 = vmatmul.mubr.msk.f32.vlgmr.msra.gmra.mrb[4].mxu1 %vm9863_vm4, %v1020_v8  ;;  %7204 = vmatprep.subr.msk.mxu0 %vm1060_vm2, %v1017_v17  ;;  %v1695_v39 = vpop.permute.xlu1 %1694  ;;  %v1016_v23 = vmul.f32 %v1007_v16, %v8570_v24  ;;  %v1706_v17 = vmul.f32 %v1703_v35, %v8537_v43  ;;  %vm9874_vm14 = vmmov %vm9859_vm3  ;;  %v9908_v24 = vld [vmem:[#allocation25_spill] sm:$0xff] }
 0x221   : > { %7208 = vmatpush1.msk.msra.mxu1 %vm1060_vm2, %v1018_v4  ;;  %v1697_v46 = vsel %vm1696_vm8, %v8340_v1, %v1695_v39  ;;  %v1704_v14 = vsel %vm1696_vm8, %v1695_v39, %v8199_v44  ;;  %1460 = vmatprep.mubr.f32.mxu0 %v9849_v0  ;;  %v1691_v38 = vpop.permute.xlu0 %1690  ;;  %v8627_v4 = vmul.f32 %v8595_v3, %v8425_v15  ;;  %v8634_v44 = vsel %vm943_vm0, 1.0, %v9849_v0  ;;  %vm9875_vm15 = vmmov %vm9859_vm3 }
 0x222   : > { %7214 = vmatprep.subr.msk.mxu1 %vm1060_vm2, %v1708_v62  ;;  %v1712_v30 = vmul.f32 %v1697_v46, %v8579_v29  ;;  %v1707_v58 = vmul.f32 %v1702_v7, %v8553_v41  ;;  %9865 = vst [vmem:[#allocation45_spill] sm:$0xff] %v8634_v44  ;;  %v8638_v16 = vmul.f32 %v8611_v47, %v8437_v2  ;;  %v7210_v46 = vld [vmem:[%s9728_s2 + $0x10] sm:$0xff]  ;;  %vm9876_vm0 = vmmov %vm9859_vm3  ;;  %vm2725_vm3 = vcmp.lt.s32.totalorder %v8052_v6, 127 }
 0x223   : > { %9864 = vst [vmem:[#allocation44_spill] sm:$0xff] %v8627_v4  ;;  %7200 = vmatmul.mubr.msk.f32.vlgmr.msra.gmra.mrb[4].mxu0 %vm9867_vm7, %v1020_v8  ;;  %1673 = vmatprep.mubr.f32.mxu1 %v9849_v0  ;;  %v1705_v62 = vmul.f32 %v1704_v14, %v8590_v27  ;;  %v1698_v35 = vsel %vm1696_vm8, %v1691_v38, %v8340_v1  ;;  %vm9878_vm7 = vmmov %vm9876_vm0 }
 0x224   : > { %9866 = vst [vmem:[#allocation46_spill] sm:$0xff] %v8638_v16  ;;  %v1699_v33 = vsel %vm1696_vm8, %v8338_v57, %v1691_v38  ;;  %7205 = vmatpush1.msk.msra.mxu0 %vm1060_vm2, %v1016_v23  ;;  %7209 = vmatmul.mubr.msk.f32.vlgmr.msra.gmra.mrb[6].mxu1 %vm9868_vm9, %v1020_v8  ;;  %v8651_v7 = vpop.permute.xlu1 %3065  ;;  %v2055_v39 = vsel %vm2050_vm6, %v8213_v50, %v8309_v26  ;;  %vm9885_vm9 = vmmov %vm9876_vm0 }
 0x225   : > { %7211 = vmatprep.subr.msk.mxu0 %vm1060_vm2, %v1706_v17  ;;  %7215 = vmatpush1.msk.msra.mxu1 %vm1060_vm2, %v1707_v58  ;;  %v8659_v1 = vpop.permute.xlu0 %3067  ;;  %v8666_v14 = vmul.f32 %v8634_v44, %v8416_v51  ;;  %v1700_v38 = vsel %vm1696_vm8, %v8298_v11, %v8338_v57  ;;  %v1710_v58 = vmul.f32 %v1699_v33, %v8627_v4  ;;  %v9894_v4 = vld [vmem:[#allocation12_spill] sm:$0xff] }
 0x226   : > { %1602 = vmatprep.mubr.f32.mxu0 %v9849_v0  ;;  %7220 = vmatprep.subr.msk.mxu1 %vm1060_vm2, %v1712_v30  ;;  %v1711_v23 = vmul.f32 %v1698_v35, %v8638_v16  ;;  %v2062_v17 = vmul.f32 %v2055_v39, %v8334_v42  ;;  %v2056_v30 = vsel %vm2050_vm6, %v8312_v28, %v8213_v50  ;;  %v9893_v16 = vld [vmem:[#allocation13_spill] sm:$0xff] }
 0x227   : > { %9869 = vst [vmem:[#allocation47_spill] sm:$0xff] %v8666_v14  ;;  %7206 = vmatmul.mubr.msk.f32.vlgmr.msra.gmra.mrb[6].mxu0 %vm9870_vm11, %v1020_v8  ;;  %1877 = vmatprep.mubr.f32.mxu1 %v9849_v0  ;;  %v2057_v11 = vsel %vm2050_vm6, %v8210_v49, %v8312_v28  ;;  %v1709_v28 = vmul.f32 %v1700_v38, %v8666_v14  ;;  %v9892_v14 = vld [vmem:[#allocation27_spill] sm:$0xff] }
 0x228   : > { %7212 = vmatpush1.msk.msra.mxu0 %vm1060_vm2, %v1705_v62  ;;  %7216 = vmatmul.mubr.msk.f32.vlgmr.msra.gmra.mrb[4].mxu1 %vm9871_vm12, %v7210_v46  ;;  %v2049_v57 = vpop.permute.xlu1 %2048  ;;  %v2060_v33 = vmul.f32 %v2057_v11, %v8348_v25  ;;  %v2061_v39 = vmul.f32 %v2056_v30, %v8351_v12  ;;  %v2054_v30 = vsel %vm2050_vm6, %v8309_v26, %v8358_v40  ;;  %vm9890_vm12 = vmmov %vm9876_vm0 }
 0x229   : > { %7217 = vmatprep.subr.msk.mxu0 %vm1060_vm2, %v1710_v58  ;;  %7221 = vmatpush1.msk.msra.mxu1 %vm1060_vm2, %v1711_v23  ;;  %v2051_v8 = vsel %vm2050_vm6, %v8371_v21, %v2049_v57  ;;  %v2058_v50 = vsel %vm2050_vm6, %v2049_v57, %v8210_v49  ;;  %v2045_v35 = vpop.permute.xlu0 %2044  ;;  %v2063_v26 = vmul.f32 %v2054_v30, %v8499_v56  ;;  %v9886_v30 = vld [vmem:[#allocation16_spill] sm:$0xff] }
 0x22a   : > { %7227 = vmatprep.subr.msk.mxu1 %vm1060_vm2, %v2062_v17  ;;  %v2066_v62 = vmul.f32 %v2051_v8, %v8434_v61  ;;  %1806 = vmatprep.mubr.f32.mxu0 %v9849_v0  ;;  %v2059_v58 = vmul.f32 %v2058_v50, %v8420_v19  ;;  %v2052_v49 = vsel %vm2050_vm6, %v2045_v35, %v8371_v21  ;;  %v7223_v21 = vld [vmem:[%s9728_s2 + $0x18] sm:$0xff] }
 0x22b   : > { %7213 = vmatmul.mubr.msk.f32.vlgmr.msra.gmra.mrb[4].mxu0 %vm9872_vm13, %v7210_v46  ;;  %2019 = vmatprep.mubr.f32.mxu1 %v9849_v0  ;;  %v2053_v38 = vsel %vm2050_vm6, %v8358_v40, %v2045_v35  ;;  %v2065_v57 = vmul.f32 %v2052_v49, %v8481_v37  ;;  %v9877_v40 = vld [vmem:[#allocation18_spill] sm:$0xff] }
 0x22c   : > { %7218 = vmatpush1.msk.msra.mxu0 %vm1060_vm2, %v1709_v28  ;;  %7222 = vmatmul.mubr.msk.f32.vlgmr.msra.gmra.mrb[6].mxu1 %vm9873_vm5, %v7210_v46  ;;  %v8714_v23 = vpop.permute.xlu1 %3425  ;;  %v2064_v11 = vmul.f32 %v2053_v38, %v8444_v32  ;;  %vm910_vm4 = vcmp.lt.f32.partialorder %v9877_v40, 30.5  ;;  %v9879_v35 = vld [vmem:[#allocation30_spill] sm:$0xff]  ;;  %v9880_v28 = vld [vmem:[#allocation21_spill] sm:$0xff]  ;;  %vm907_vm5 = vcmp.lt.f32.partialorder %v9892_v14, 30.5 }
 0x22d   : > { %7224 = vmatprep.subr.msk.mxu0 %vm1060_vm2, %v2060_v33  ;;  %7228 = vmatpush1.msk.msra.mxu1 %vm1060_vm2, %v2061_v39  ;;  %v8718_v17 = vpop.permute.xlu0 %3063  ;;  %v9882_v33 = vld [vmem:[#allocation9_spill] sm:$0xff]  ;;  %v9883_v49 = vld [vmem:[#allocation14_spill] sm:$0xff]  ;;  %v8770_v38 = vsel %vm910_vm4, 1.0, %v9849_v0  ;;  %vm9900_vm4 = vmmov %vm9878_vm7 }
 0x22e   : > { %1948 = vmatprep.mubr.f32.mxu0 %v9849_v0  ;;  %7233 = vmatprep.subr.msk.mxu1 %vm1060_vm2, %v2066_v62  ;;  %v9881_v62 = vld [vmem:[#allocation10_spill] sm:$0xff]  ;;  %9884 = vst [vmem:[#allocation18_spill] sm:$0xff] %v8770_v38  ;;  %v8805_v27 = vmul.f32 %v8334_v42, %v8770_v38 }
 0x22f   : > { %7219 = vmatmul.mubr.msk.f32.vlgmr.msra.gmra.mrb[6].mxu0 %vm9874_vm14, %v7210_v46  ;;  %2231 = vmatprep.mubr.f32.mxu1 %v9849_v0 }
 0x230   : > { %7225 = vmatpush1.msk.msra.mxu0 %vm1060_vm2, %v2059_v58  ;;  %7229 = vmatmul.mubr.msk.f32.vlgmr.msra.gmra.mrb[4].mxu1 %vm9875_vm15, %v7223_v21  ;;  %v8735_v8 = vpop.permute.xlu1 %3419  ;;  %v7236_v58 = vld [vmem:[%s9728_s2 + $0x20] sm:$0xff]  ;;  %9898 = vst [vmem:[#allocation30_spill] sm:$0xff] %v8805_v27 }
 0x231   : > { %7230 = vmatprep.subr.msk.mxu0 %vm1060_vm2, %v2064_v11  ;;  %7234 = vmatpush1.msk.msra.mxu1 %vm1060_vm2, %v2065_v57  ;;  %v8739_v50 = vpop.permute.xlu0 %3075  ;;  %v9887_v11 = vld [vmem:[#allocation20_spill] sm:$0xff] }
 0x232   : > { %7240 = vmatprep.subr.msk.mxu1 %vm1060_vm2, %v8069_v18  ;;  %2160 = vmatprep.mubr.f32.mxu0 %v9849_v0  ;;  %v2729_v18 = vsel %vm2725_vm3, %v9880_v28, %v9879_v35  ;;  %v2731_v57 = vsel %vm2725_vm3, %v9887_v11, %v9886_v30 }
 0x233   : > { %7226 = vmatmul.mubr.msk.f32.vlgmr.msra.gmra.mrb[4].mxu0 %vm9876_vm0, %v7223_v21  ;;  %2373 = vmatprep.mubr.f32.mxu1 %v9849_v0  ;;  %v2737_v40 = vmul.f32 %v2729_v18, %v8367_v34  ;;  %v9895_v18 = vld [vmem:[#allocation29_spill] sm:$0xff]  ;;  %vm3079_vm0 = vcmp.lt.s32.totalorder %v8052_v6, 97 }
 0x234   : > { %7231 = vmatpush1.msk.msra.mxu0 %vm1060_vm2, %v2063_v26  ;;  %7235 = vmatmul.mubr.msk.f32.vlgmr.msra.gmra.mrb[6].mxu1 %vm9878_vm7, %v7223_v21  ;;  %v8751_v46 = vpop.permute.xlu1 %3779  ;;  %v2730_v26 = vsel %vm2725_vm3, %v9886_v30, %v9880_v28  ;;  %vm913_vm14 = vcmp.lt.f32.partialorder %v9895_v18, 30.5  ;;  %v9896_v30 = vld [vmem:[#allocation28_spill] sm:$0xff]  ;;  %vm9904_vm7 = vmmov %vm9900_vm4 }
 0x235   : > { %7237 = vmatprep.subr.msk.mxu0 %vm1060_vm2, %v9881_v62  ;;  %7241 = vmatpush1.msk.msra.mxu1 %vm1060_vm2, %v9882_v33  ;;  %v8761_v39 = vpop.permute.xlu0 %3423  ;;  %v9888_v62 = vld [vmem:[#allocation15_spill] sm:$0xff]  ;;  %v9889_v33 = vld [vmem:[#allocation8_spill] sm:$0xff]  ;;  %vm914_vm15 = vcmp.lt.f32.partialorder %v9896_v30, 30.5  ;;  %v7249_v30 = vld [vmem:[%s9728_s2 + $0x28] sm:$0xff] }
 0x236   : > { %7246 = vmatprep.subr.msk.mxu1 %vm1060_vm2, %v9883_v49  ;;  %2302 = vmatprep.mubr.f32.mxu0 %v9849_v0  ;;  %vm908_vm11 = vcmp.lt.f32.partialorder %v9888_v62, 30.5  ;;  %v9891_v49 = vld [vmem:[#allocation17_spill] sm:$0xff]  ;;  %v8835_v62 = vsel %vm913_vm14, 1.0, %v9849_v0  ;;  %vm3433_vm14 = vcmp.lt.s32.totalorder %v8052_v6, 96 }
 0x237   : > { %7232 = vmatmul.mubr.msk.f32.vlgmr.msra.gmra.mrb[6].mxu0 %vm9885_vm9, %v7223_v21  ;;  %2552 = vmatprep.mubr.f32.mxu1 %v9849_v0  ;;  %vm909_vm13 = vcmp.lt.f32.partialorder %v9891_v49, 30.5  ;;  %v8815_v41 = vsel %vm908_vm11, 1.0, %v9849_v0  ;;  %9905 = vst [vmem:[#allocation14_spill] sm:$0xff] %v8835_v62  ;;  %v8840_v49 = vsel %vm914_vm15, 1.0, %v9849_v0  ;;  %vm911_vm9 = vcmp.lt.f32.partialorder %v9908_v24, 30.5  ;;  %vm9920_vm15 = vmmov %vm9900_vm4 }
 0x238   : > { %7238 = vmatpush1.msk.msra.mxu0 %vm1060_vm2, %v9889_v33  ;;  %7242 = vmatmul.mubr.msk.f32.vlgmr.msra.gmra.mrb[4].mxu1 %vm9890_vm12, %v7236_v58  ;;  %v8787_v21 = vpop.permute.xlu1 %3773  ;;  %v9897_v33 = vld [vmem:[#allocation19_spill] sm:$0xff]  ;;  %9899 = vst [vmem:[#allocation21_spill] sm:$0xff] %v8815_v41  ;;  %9906 = vst [vmem:[#allocation16_spill] sm:$0xff] %v8840_v49 }
 0x239   : > { %7243 = vmatprep.subr.msk.mxu0 %vm1060_vm2, %v9893_v16  ;;  %7247 = vmatpush1.msk.msra.mxu1 %vm1060_vm2, %v9894_v4  ;;  %v8795_v28 = vpop.permute.xlu0 %3421  ;;  %v2732_v29 = vsel %vm2725_vm3, %v9897_v33, %v9887_v11  ;;  %v2735_v4 = vmul.f32 %v2731_v57, %v8406_v9  ;;  %v2736_v16 = vmul.f32 %v2730_v26, %v8409_v10  ;;  %v8822_v11 = vsel %vm909_vm13, 1.0, %v9849_v0  ;;  %v9903_v26 = vld [vmem:[#allocation11_spill] sm:$0xff]  ;;  %vm9913_vm12 = vmmov %vm9900_vm4 }
 0x23a   : > { %7253 = vmatprep.subr.msk.mxu1 %vm1060_vm2, %v2737_v40  ;;  %2481 = vmatprep.mubr.f32.mxu0 %v9849_v0  ;;  %9901 = vst [vmem:[#allocation10_spill] sm:$0xff] %v8822_v11  ;;  %v8827_v57 = vsel %vm907_vm5, 1.0, %v9849_v0  ;;  %v2734_v14 = vmul.f32 %v2732_v29, %v8558_v20  ;;  %v3083_v29 = vsel %vm3079_vm0, %v8562_v45, %v8544_v13  ;;  %vm9914_vm13 = vmmov %vm9900_vm4 }
 0x23b   : > { %7239 = vmatmul.mubr.msk.f32.vlgmr.msra.gmra.mrb[4].mxu0 %vm9900_vm4, %v7236_v58  ;;  %2694 = vmatprep.mubr.f32.mxu1 %v9849_v0  ;;  %9902 = vst [vmem:[#allocation9_spill] sm:$0xff] %v8827_v57  ;;  %v8872_v53 = vmul.f32 %v8351_v12, %v8822_v11  ;;  %v8876_v48 = vmul.f32 %v8420_v19, %v8827_v57  ;;  %vm9919_vm5 = vmmov %vm9900_vm4 }
 0x23c   : > { %7244 = vmatpush1.msk.msra.mxu0 %vm1060_vm2, %v9903_v26  ;;  %7248 = vmatmul.mubr.msk.f32.vlgmr.msra.gmra.mrb[6].mxu1 %vm9904_vm7, %v7236_v58  ;;  %v2724_v40 = vpop.permute.xlu1 %2723  ;;  %v9907_v26 = vld [vmem:[#allocation32_spill] sm:$0xff]  ;;  %v8887_v12 = vmul.f32 %v8481_v37, %v8835_v62  ;;  %v8891_v19 = vmul.f32 %v8434_v61, %v8840_v49  ;;  %vm9923_vm7 = vmmov %vm9900_vm4 }
 0x23d   : > { %7250 = vmatprep.subr.msk.mxu0 %vm1060_vm2, %v2735_v4  ;;  %7254 = vmatpush1.msk.msra.mxu1 %vm1060_vm2, %v2736_v16  ;;  %v2726_v42 = vsel %vm2725_vm3, %v9907_v26, %v2724_v40  ;;  %v2733_v18 = vsel %vm2725_vm3, %v2724_v40, %v9897_v33  ;;  %v8851_v43 = vpop.permute.xlu0 %3417  ;;  %v9909_v33 = vld [vmem:[#allocation26_spill] sm:$0xff]  ;;  %v8868_v40 = vmul.f32 %v8348_v25, %v8815_v41 }
 0x23e   : > { %v2740_v4 = vmul.f32 %v2726_v42, %v8611_v47  ;;  %v2741_v16 = vmul.f32 %v2733_v18, %v8529_v36  ;;  %2623 = vmatprep.mubr.f32.mxu0 %v9849_v0  ;;  %2906 = vmatprep.mubr.f32.mxu1 %v9849_v0  ;;  %vm912_vm11 = vcmp.lt.f32.partialorder %v9909_v33, 30.5  ;;  %9911 = vst [vmem:[#allocation15_spill] sm:$0xff] %v8872_v53  ;;  %9912 = vst [vmem:[#allocation8_spill] sm:$0xff] %v8876_v48 }
 0x23f   : > { %9910 = vst [vmem:[#allocation20_spill] sm:$0xff] %v8868_v40  ;;  %7245 = vmatmul.mubr.msk.f32.vlgmr.msra.gmra.mrb[6].mxu0 %vm9913_vm12, %v7236_v58  ;;  %v3084_v42 = vsel %vm3079_vm0, %v8659_v1, %v8562_v45  ;;  %9915 = vst [vmem:[#allocation17_spill] sm:$0xff] %v8887_v12  ;;  %v8896_v58 = vsel %vm911_vm9, 1.0, %v9849_v0  ;;  %v3091_v45 = vmul.f32 %v3083_v29, %v8805_v27  ;;  %v8912_v24 = vsel %vm912_vm11, 1.0, %v9849_v0 }
 0x240   : > { %7251 = vmatpush1.msk.msra.mxu0 %vm1060_vm2, %v2734_v14  ;;  %7255 = vmatmul.mubr.msk.f32.vlgmr.msra.gmra.mrb[4].mxu1 %vm9914_vm13, %v7249_v30  ;;  %v2720_v18 = vpop.permute.xlu1 %2719  ;;  %9916 = vst [vmem:[#allocation27_spill] sm:$0xff] %v8891_v19  ;;  %9917 = vst [vmem:[#allocation13_spill] sm:$0xff] %v8896_v58  ;;  %v3086_v33 = vsel %vm3079_vm0, %v8718_v17, %v8651_v7  ;;  %vm3787_vm11 = vcmp.lt.s32.totalorder %v8052_v6, 95 }
 0x241   : > { %v2727_v14 = vsel %vm2725_vm3, %v2720_v18, %v9907_v26  ;;  %v2728_v37 = vsel %vm2725_vm3, %v9879_v35, %v2720_v18  ;;  %7259 = vmatprep.subr.msk.mxu1 %vm1060_vm2, %v2741_v16  ;;  %v8906_v25 = vpop.permute.xlu0 %3429  ;;  %2835 = vmatprep.mubr.f32.mxu0 %v9849_v0  ;;  %9918 = vst [vmem:[#allocation12_spill] sm:$0xff] %v8912_v24  ;;  %vm9924_vm9 = vmmov %vm9900_vm4 }
 0x242   : > { %v3085_v26 = vsel %vm3079_vm0, %v8651_v7, %v8659_v1  ;;  %v2738_v29 = vmul.f32 %v2728_v37, %v8634_v44  ;;  %v2739_v35 = vmul.f32 %v2727_v14, %v8595_v3  ;;  %7260 = vmatpush1.msk.msra.mxu1 %vm1060_vm2, %v2740_v4  ;;  %3048 = vmatprep.mubr.f32.mxu1 %v9849_v0  ;;  %v7262_v14 = vld [vmem:[%s9728_s2 + $0x30] sm:$0xff]  ;;  %vm9925_vm12 = vmmov %vm9900_vm4 }
 0x243   : > { %v3090_v16 = vmul.f32 %v3084_v42, %v8872_v53  ;;  %7252 = vmatmul.mubr.msk.f32.vlgmr.msra.gmra.mrb[4].mxu0 %vm9919_vm5, %v7249_v30  ;;  %7266 = vmatprep.subr.msk.mxu1 %vm1060_vm2, %v3091_v45  ;;  %v8934_v1 = vmul.f32 %v8499_v56, %v8896_v58  ;;  %v8938_v4 = vmul.f32 %v8444_v32, %v8912_v24  ;;  %vm9928_vm13 = vmmov %vm9900_vm4 }
 0x244   : > { %7261 = vmatmul.mubr.msk.f32.vlgmr.msra.gmra.mrb[6].mxu1 %vm9920_vm15, %v7249_v30  ;;  %v3078_v37 = vpop.permute.xlu1 %3077  ;;  %7256 = vmatprep.subr.msk.mxu0 %vm1060_vm2, %v2739_v35  ;;  %v3089_v7 = vmul.f32 %v3085_v26, %v8868_v40  ;;  %v3088_v35 = vmul.f32 %v3086_v33, %v8876_v48  ;;  %vm9930_vm5 = vmmov %vm9900_vm4 }
 0x245   : > { %9921 = vst [vmem:[#allocation29_spill] sm:$0xff] %v8934_v1  ;;  %9922 = vst [vmem:[#allocation28_spill] sm:$0xff] %v8938_v4  ;;  %7267 = vmatpush1.msk.msra.mxu1 %vm1060_vm2, %v3090_v16  ;;  %v3080_v42 = vsel %vm3079_vm0, %v8739_v50, %v3078_v37  ;;  %v3087_v18 = vsel %vm3079_vm0, %v3078_v37, %v8718_v17  ;;  %v3778_v45 = vpop.permute.xlu0 %3777  ;;  %7257 = vmatpush1.msk.msra.mxu0 %vm1060_vm2, %v2738_v29 }
 0x246   : > { %v3094_v26 = vmul.f32 %v3080_v42, %v8887_v12  ;;  %v3095_v16 = vmul.f32 %v3087_v18, %v8891_v19  ;;  %2977 = vmatprep.mubr.f32.mxu0 %v9849_v0  ;;  %3260 = vmatprep.mubr.f32.mxu1 %v9849_v0  ;;  %v3437_v17 = vsel %vm3433_vm14, %v8761_v39, %v8714_v23  ;;  %vm9934_vm15 = vmmov %vm9900_vm4 }
 0x247   : > { %7258 = vmatmul.mubr.msk.f32.vlgmr.msra.gmra.mrb[6].mxu0 %vm9900_vm4, %v7249_v30  ;;  %7263 = vmatprep.subr.msk.mxu0 %vm1060_vm2, %v3089_v7  ;;  %v3438_v29 = vsel %vm3433_vm14, %v8795_v28, %v8761_v39  ;;  %v3445_v39 = vmul.f32 %v3437_v17, %v8770_v38  ;;  %v7275_v17 = vld [vmem:[%s9728_s2 + $0x38] sm:$0xff] }
 0x248   : > { %7268 = vmatmul.mubr.msk.f32.vlgmr.msra.gmra.mrb[4].mxu1 %vm9923_vm7, %v7262_v14  ;;  %7264 = vmatpush1.msk.msra.mxu0 %vm1060_vm2, %v3088_v35  ;;  %v3074_v33 = vpop.permute.xlu1 %3073  ;;  %v3440_v35 = vsel %vm3433_vm14, %v8851_v43, %v8735_v8  ;;  %vm9937_vm7 = vmmov %vm9900_vm4 }
 0x249   : > { %v3081_v37 = vsel %vm3079_vm0, %v3074_v33, %v8739_v50  ;;  %v3082_v30 = vsel %vm3079_vm0, %v8544_v13, %v3074_v33  ;;  %7272 = vmatprep.subr.msk.mxu1 %vm1060_vm2, %v3095_v16  ;;  %v3776_v7 = vpop.permute.xlu0 %3775  ;;  %3189 = vmatprep.mubr.f32.mxu0 %v9849_v0  ;;  %v3439_v50 = vsel %vm3433_vm14, %v8735_v8, %v8795_v28 }
 0x24a   : > { %v3092_v42 = vmul.f32 %v3082_v30, %v8934_v1  ;;  %v3093_v18 = vmul.f32 %v3081_v37, %v8938_v4  ;;  %7273 = vmatpush1.msk.msra.mxu1 %vm1060_vm2, %v3094_v26  ;;  %v3444_v13 = vmul.f32 %v3438_v29, %v8822_v11  ;;  %3402 = vmatprep.mubr.f32.mxu1 %v9849_v0 }
 0x24b   : > { %7265 = vmatmul.mubr.msk.f32.vlgmr.msra.gmra.mrb[4].mxu0 %vm9924_vm9, %v7262_v14  ;;  %7279 = vmatprep.subr.msk.mxu1 %vm1060_vm2, %v3445_v39  ;;  %v8997_v28 = vmul.f32 %v8367_v34, %v8770_v38  ;;  %v3443_v29 = vmul.f32 %v3439_v50, %v8815_v41  ;;  %v3442_v39 = vmul.f32 %v3440_v35, %v8827_v57  ;;  %vm9938_vm9 = vmmov %vm9900_vm4 }
 0x24c   : > { %7274 = vmatmul.mubr.msk.f32.vlgmr.msra.gmra.mrb[6].mxu1 %vm9925_vm12, %v7262_v14  ;;  %v3432_v26 = vpop.permute.xlu1 %3431  ;;  %7269 = vmatprep.subr.msk.mxu0 %vm1060_vm2, %v3093_v18  ;;  %v9021_v18 = vmul.f32 %v8409_v10, %v8822_v11  ;;  %v9027_v50 = vmul.f32 %v8406_v9, %v8815_v41  ;;  %v9035_v35 = vmul.f32 %v8611_v47, %v8835_v62  ;;  %vm9939_vm12 = vmmov %vm9900_vm4  ;;  %v7301_v41 = vld [vmem:[%s9730_s4 + $0x8] sm:$0xff] }
 0x24d   : > { %9926 = vst [vmem:[#allocation19_spill] sm:$0xff] %v8997_v28  ;;  %7280 = vmatpush1.msk.msra.mxu1 %vm1060_vm2, %v3444_v13  ;;  %v3434_v16 = vsel %vm3433_vm14, %v8906_v25, %v3432_v26  ;;  %v3441_v8 = vsel %vm3433_vm14, %v3432_v26, %v8851_v43  ;;  %v3772_v30 = vpop.permute.xlu0 %3771  ;;  %7270 = vmatpush1.msk.msra.mxu0 %vm1060_vm2, %v3092_v42 }
 0x24e   : > { %v3448_v33 = vmul.f32 %v3434_v16, %v8835_v62  ;;  %v3449_v37 = vmul.f32 %v3441_v8, %v8840_v49  ;;  %3331 = vmatprep.mubr.f32.mxu0 %v9849_v0  ;;  %v3791_v43 = vsel %vm3787_vm11, %v3778_v45, %v8751_v46  ;;  %9927 = vst [vmem:[#allocation11_spill] sm:$0xff] %v9021_v18  ;;  %9929 = vst [vmem:[#allocation32_spill] sm:$0xff] %v9027_v50 }
 0x24f   : > { %3614 = vmatprep.mubr.f32.mxu1 %v9849_v0  ;;  %7271 = vmatmul.mubr.msk.f32.vlgmr.msra.gmra.mrb[6].mxu0 %vm9928_vm13, %v7262_v14  ;;  %v3792_v42 = vsel %vm3787_vm11, %v3776_v7, %v3778_v45  ;;  %9931 = vst [vmem:[#allocation25_spill] sm:$0xff] %v9035_v35  ;;  %v9047_v45 = vmul.f32 %v8529_v36, %v8840_v49  ;;  %vm9940_vm13 = vmmov %vm9900_vm4 }
 0x250   : > { %7276 = vmatprep.subr.msk.mxu0 %vm1060_vm2, %v3443_v29  ;;  %7281 = vmatmul.mubr.msk.f32.vlgmr.msra.gmra.mrb[4].mxu1 %vm9930_vm5, %v7275_v17  ;;  %v3428_v13 = vpop.permute.xlu1 %3427  ;;  %v3799_v16 = vmul.f32 %v3791_v43, %v8997_v28  ;;  %vm9941_vm5 = vmmov %vm9900_vm4 }
 0x251   : > { %7277 = vmatpush1.msk.msra.mxu0 %vm1060_vm2, %v3442_v39  ;;  %v3435_v14 = vsel %vm3433_vm14, %v3428_v13, %v8906_v25  ;;  %v3436_v26 = vsel %vm3433_vm14, %v8714_v23, %v3428_v13  ;;  %7285 = vmatprep.subr.msk.mxu1 %vm1060_vm2, %v3449_v37  ;;  %9932 = vst [vmem:[#allocation26_spill] sm:$0xff] %v9047_v45  ;;  %v3784_v43 = vpop.permute.xlu0 %3783 }
 0x252   : > { %v3446_v8 = vmul.f32 %v3436_v26, %v8896_v58  ;;  %v3447_v29 = vmul.f32 %v3435_v14, %v8912_v24  ;;  %3543 = vmatprep.mubr.f32.mxu0 %v9849_v0  ;;  %7286 = vmatpush1.msk.msra.mxu1 %vm1060_vm2, %v3448_v33  ;;  %v3793_v25 = vsel %vm3787_vm11, %v8787_v21, %v3776_v7 }
 0x253   : > { %v3798_v23 = vmul.f32 %v3792_v42, %v9021_v18  ;;  %v9060_v37 = vmul.f32 %v8558_v20, %v8827_v57  ;;  %3756 = vmatprep.mubr.f32.mxu1 %v9849_v0  ;;  %7278 = vmatmul.mubr.msk.f32.vlgmr.msra.gmra.mrb[4].mxu0 %vm9934_vm15, %v7275_v17  ;;  %v3794_v39 = vsel %vm3787_vm11, %v3772_v30, %v8787_v21  ;;  %v7288_v21 = vld [vmem:[%s9728_s2 + $0x40] sm:$0xff] }
 0x254   : > { %7287 = vmatmul.mubr.msk.f32.vlgmr.msra.gmra.mrb[6].mxu1 %vm9900_vm4, %v7275_v17  ;;  %7292 = vmatprep.subr.msk.mxu1 %vm1060_vm2, %v3799_v16  ;;  %v3786_v7 = vpop.permute.xlu1 %3785  ;;  %v9071_v33 = vmul.f32 %v8634_v44, %v8896_v58  ;;  %v9084_v14 = vmul.f32 %v8595_v3, %v8912_v24  ;;  %v3797_v26 = vmul.f32 %v3793_v25, %v9027_v50 }
 0x255   : > { %9933 = vst [vmem:[#allocation48_spill] sm:$0xff] %v9060_v37  ;;  %7293 = vmatpush1.msk.msra.mxu1 %vm1060_vm2, %v3798_v23  ;;  %v3788_v42 = vsel %vm3787_vm11, %v3784_v43, %v3786_v7  ;;  %v3795_v13 = vsel %vm3787_vm11, %v3786_v7, %v3772_v30  ;;  %7282 = vmatprep.subr.msk.mxu0 %vm1060_vm2, %v3447_v29 }
 0x256   : > { %9935 = vst [vmem:[#allocation49_spill] sm:$0xff] %v9071_v33  ;;  %9936 = vst [vmem:[#allocation50_spill] sm:$0xff] %v9084_v14  ;;  %v3802_v16 = vmul.f32 %v3788_v42, %v9035_v35  ;;  %v3803_v23 = vmul.f32 %v3795_v13, %v9047_v45  ;;  %7283 = vmatpush1.msk.msra.mxu0 %vm1060_vm2, %v3446_v8  ;;  %3685 = vmatprep.mubr.f32.mxu0 %v9849_v0 }
 0x257   : > { %v3796_v30 = vmul.f32 %v3794_v39, %v9060_v37  ;;  %3968 = vmatprep.mubr.f32.mxu1 %v9849_v0  ;;  %7284 = vmatmul.mubr.msk.f32.vlgmr.msra.gmra.mrb[6].mxu0 %vm9937_vm7, %v7275_v17 }
 0x258   : > { %7289 = vmatprep.subr.msk.mxu0 %vm1060_vm2, %v3797_v26  ;;  %7294 = vmatmul.mubr.msk.f32.vlgmr.msra.gmra.mrb[4].mxu1 %vm9938_vm9, %v7288_v21  ;;  %v3782_v29 = vpop.permute.xlu1 %3781 }
 0x259   : > { %7290 = vmatpush1.msk.msra.mxu0 %vm1060_vm2, %v3796_v30  ;;  %v3789_v25 = vsel %vm3787_vm11, %v3782_v29, %v3784_v43  ;;  %v3790_v8 = vsel %vm3787_vm11, %v8751_v46, %v3782_v29  ;;  %7298 = vmatprep.subr.msk.mxu1 %vm1060_vm2, %v3803_v23 }
 0x25a   : > { %v3800_v39 = vmul.f32 %v3790_v8, %v9071_v33  ;;  %v3801_v17 = vmul.f32 %v3789_v25, %v9084_v14  ;;  %3897 = vmatprep.mubr.f32.mxu0 %v9849_v0  ;;  %7299 = vmatpush1.msk.msra.mxu1 %vm1060_vm2, %v3802_v16 }
 0x25b   : > { %4110 = vmatprep.mubr.f32.mxu1 %v9849_v0  ;;  %7291 = vmatmul.mubr.msk.f32.vlgmr.msra.gmra.mrb[4].mxu0 %vm9939_vm12, %v7288_v21 }
 0x25c   : > { %7300 = vmatmul.mubr.msk.f32.vlgmr.msra.gmra.mrb[6].mxu1 %vm9940_vm13, %v7288_v21  ;;  %7295 = vmatprep.subr.msk.mxu0 %vm1060_vm2, %v3801_v17 }
 0x25d   : > { %7296 = vmatpush1.msk.msra.mxu0 %vm1060_vm2, %v3800_v39  ;;  %4039 = vmatprep.mubr.f32.mxu0 %v9849_v0  ;;  %vm4214_vm2 = vcmask 64512  }
 0x25e   : > { %4353 = vmatprep.mubr.f32.mxu1 %v9849_v0 }
 0x25f   : > { %7297 = vmatmul.mubr.msk.f32.vlgmr.msra.gmra.mrb[6].mxu0 %vm9941_vm5, %v7288_v21 }
 0x260   : > { %4282 = vmatprep.mubr.f32.mxu0 %v9849_v0 }
 0x262   : > { %v4129_v46 = vpop.permute.xlu0 %4128 }
 0x32b   : > { %v3970_v43 = vpop.f32.mrb[4].mxu1 }
 0x32c   : > { %v4133_v7 = vadd.f32 %v4129_v46, %v3970_v43  ;;  %v3972_v42 = vpop.f32.mrb[5].mxu1 }
 0x32d   : > { %v4134_v26 = vadd.f32 %v4129_v46, %v3972_v42 }
 0x32e   : > { %v9116_v13 = vmax.f32 %v4133_v7, 0.0  ;;  %v3899_v16 = vpop.f32.mrb[4].mxu0 }
 0x32f   : > { %v4112_v23 = vpop.f32.mrb[6].mxu1  ;;  %v3901_v30 = vpop.f32.mrb[5].mxu0  ;;  %v9122_v21 = vmax.f32 %v4134_v26, 0.0  ;;  %v4131_v39 = vadd.f32 %v4129_v46, %v3899_v16 }
 0x330   : > { %v4114_v29 = vpop.f32.mrb[7].mxu1  ;;  %5748 = vrot.lane.b32.xlu1 %v9116_v13, %s7904_s19  ;;  %4184 = vrot.lane.b32.xlu0 %v9116_v13, %s7899_s15  ;;  %v4132_v43 = vadd.f32 %v4129_v46, %v3901_v30  ;;  %v4137_v7 = vadd.f32 %v4129_v46, %v4112_v23 }
 0x331   : > { %v9140_v17 = vmax.f32 %v4131_v39, 0.0  ;;  %v4138_v16 = vadd.f32 %v4129_v46, %v4114_v29 }
 0x332   : > { %v4041_v25 = vpop.f32.mrb[6].mxu0  ;;  %v9146_v42 = vmax.f32 %v4132_v43, 0.0  ;;  %v9152_v26 = vmax.f32 %v4137_v7, 0.0 }
 0x333   : > { %v4043_v8 = vpop.f32.mrb[7].mxu0  ;;  %v9166_v23 = vmax.f32 %v4138_v16, 0.0  ;;  %v4135_v30 = vadd.f32 %v4129_v46, %v4041_v25 }
 0x334   : > { %4186 = vrot.lane.b32.xlu1 %v9122_v21, %s7899_s15  ;;  %4151 = vrot.lane.b32.xlu0 %v9116_v13, %s7900_s16  ;;  %v4136_v29 = vadd.f32 %v4129_v46, %v4043_v8 }
 0x335   : > { %v9184_v39 = vmax.f32 %v4135_v30, 0.0 }
 0x336   : > { %v9186_v43 = vmax.f32 %v4136_v29, 0.0  ;;  %v7060_v29 = vld [vmem:[%s9731_s5] sm:$0xff] }
 0x338   : > { %4153 = vrot.lane.b32.xlu1 %v9122_v21, %s7900_s16  ;;  %4793 = vrot.lane.b32.xlu0 %v9116_v13, %s7902_s17 }
 0x33c   : > { %4795 = vrot.lane.b32.xlu1 %v9122_v21, %s7902_s17  ;;  %5122 = vrot.lane.b32.xlu0 %v9116_v13, %s7903_s18 }
 0x340   : > { %5124 = vrot.lane.b32.xlu1 %v9122_v21, %s7903_s18  ;;  %5750 = vrot.lane.b32.xlu0 %v9122_v21, %s7904_s19 }
 0x344   : > { %4147 = vrot.lane.b32.xlu0 %v9140_v17, %s7900_s16  ;;  %4180 = vrot.lane.b32.xlu1 %v9140_v17, %s7899_s15 }
 0x348   : > { %4789 = vrot.lane.b32.xlu0 %v9140_v17, %s7902_s17  ;;  %4182 = vrot.lane.b32.xlu1 %v9146_v42, %s7899_s15 }
 0x34c   : > { %5118 = vrot.lane.b32.xlu0 %v9140_v17, %s7903_s18  ;;  %4192 = vrot.lane.b32.xlu1 %v9152_v26, %s7899_s15 }
 0x350   : > { %5744 = vrot.lane.b32.xlu0 %v9140_v17, %s7904_s19  ;;  %4149 = vrot.lane.b32.xlu1 %v9146_v42, %s7900_s16 }
 0x354   : > { %5746 = vrot.lane.b32.xlu0 %v9146_v42, %s7904_s19  ;;  %4159 = vrot.lane.b32.xlu1 %v9152_v26, %s7900_s16 }
 0x358   : > { %4194 = vrot.lane.b32.xlu0 %v9166_v23, %s7899_s15  ;;  %4791 = vrot.lane.b32.xlu1 %v9146_v42, %s7902_s17 }
 0x35c   : > { %4161 = vrot.lane.b32.xlu0 %v9166_v23, %s7900_s16  ;;  %4801 = vrot.lane.b32.xlu1 %v9152_v26, %s7902_s17 }
 0x360   : > { %4803 = vrot.lane.b32.xlu0 %v9166_v23, %s7902_s17  ;;  %5120 = vrot.lane.b32.xlu1 %v9146_v42, %s7903_s18 }
 0x364   : > { %5132 = vrot.lane.b32.xlu0 %v9166_v23, %s7903_s18  ;;  %5130 = vrot.lane.b32.xlu1 %v9152_v26, %s7903_s18 }
 0x368   : > { %4190 = vrot.lane.b32.xlu0 %v9186_v43, %s7899_s15  ;;  %4188 = vrot.lane.b32.xlu1 %v9184_v39, %s7899_s15  ;;  %s7832_s15 = sshll.u32 %s7909_s13, 4  ;;  %s7833_s15 = int_to_ptr.vmem [resolvable:$false] %s7832_s15 }
 0x36c   : > { %5756 = vrot.lane.b32.xlu0 %v9152_v26, %s7904_s19  ;;  %4155 = vrot.lane.b32.xlu1 %v9184_v39, %s7900_s16 }
 0x370   : > { %4157 = vrot.lane.b32.xlu0 %v9186_v43, %s7900_s16  ;;  %4797 = vrot.lane.b32.xlu1 %v9184_v39, %s7902_s17  ;;  %s7834_s16 = scalar_lea.vmem %s7833_s15, 2048 }
 0x374   : > { %6075 = vrot.lane.b32.xlu0 %v9146_v42, %s7905_s20  ;;  %5126 = vrot.lane.b32.xlu1 %v9184_v39, %s7903_s18 }
 0x378   : > { %4799 = vrot.lane.b32.xlu0 %v9186_v43, %s7902_s17  ;;  %5752 = vrot.lane.b32.xlu1 %v9184_v39, %s7904_s19 }
 0x37c   : > { %6079 = vrot.lane.b32.xlu0 %v9122_v21, %s7905_s20  ;;  %5758 = vrot.lane.b32.xlu1 %v9166_v23, %s7904_s19 }
 0x380   : > { %5128 = vrot.lane.b32.xlu0 %v9186_v43, %s7903_s18  ;;  %6077 = vrot.lane.b32.xlu1 %v9116_v13, %s7905_s20 }
 0x384   : > { %6073 = vrot.lane.b32.xlu0 %v9140_v17, %s7905_s20  ;;  %6081 = vrot.lane.b32.xlu1 %v9184_v39, %s7905_s20 }
 0x388   : > { %6085 = vrot.lane.b32.xlu0 %v9152_v26, %s7905_s20  ;;  %6087 = vrot.lane.b32.xlu1 %v9166_v23, %s7905_s20 }
 0x38c   : > { %6404 = vrot.lane.b32.xlu0 %v9146_v42, %s7906_s26  ;;  %6406 = vrot.lane.b32.xlu1 %v9116_v13, %s7906_s26 }
 0x390   : > { %6408 = vrot.lane.b32.xlu0 %v9122_v21, %s7906_s26  ;;  %6410 = vrot.lane.b32.xlu1 %v9184_v39, %s7906_s26 }
 0x394   : > { %6402 = vrot.lane.b32.xlu0 %v9140_v17, %s7906_s26  ;;  %6416 = vrot.lane.b32.xlu1 %v9166_v23, %s7906_s26 }
 0x398   : > { %6414 = vrot.lane.b32.xlu0 %v9152_v26, %s7906_s26  ;;  %5754 = vrot.lane.b32.xlu1 %v9186_v43, %s7904_s19 }
 0x39c   : > { %6733 = vrot.lane.b32.xlu0 %v9146_v42, %s7907_s28  ;;  %6735 = vrot.lane.b32.xlu1 %v9116_v13, %s7907_s28 }
 0x3a0   : > { %6737 = vrot.lane.b32.xlu0 %v9122_v21, %s7907_s28  ;;  %6083 = vrot.lane.b32.xlu1 %v9186_v43, %s7905_s20  ;;  %s257_s20 = sand.u32 1, %s7886_s22  }
 0x3a1   : > { %s7091_s25 = scalar_lea.sflag [#allocation4], %s257_s20 }
 0x3a2   : > { %v9248_v46 = vpop.permute.xlu1 %5748  ;;  %v4185_v25 = vpop.permute.xlu0 %4184 }
 0x3a4   : > { %6731 = vrot.lane.b32.xlu0 %v9140_v17, %s7907_s28  ;;  %6739 = vrot.lane.b32.xlu1 %v9184_v39, %s7907_s28 }
 0x3a6   : > { %v4187_v8 = vpop.permute.xlu1 %4186  ;;  %v4152_v7 = vpop.permute.xlu0 %4151 }
 0x3a7   : > { %v4200_v16 = vsel %vm1037_vm1, %v4185_v25, %v4187_v8 }
 0x3a8   : > { %v4207_v30 = vmul.f32 %v4200_v16, %v8256_v63  ;;  %6743 = vrot.lane.b32.xlu0 %v9152_v26, %s7907_s28  ;;  %6412 = vrot.lane.b32.xlu1 %v9186_v43, %s7906_s26  ;;  %s7182_s26 = sshll.u32 %s257_s20, 6 }
 0x3aa   : > { %v9264_v45 = vpop.permute.xlu1 %4153  ;;  %4289 = vmatprep.subr.mxu1 %v4207_v30  ;;  %v9266_v35 = vpop.permute.xlu0 %4793 }
 0x3ac   : > { %7063 = vperm.xlu0 %7798, %v7060_v29   ;;  %6741 = vrot.lane.b32.xlu1 %v9186_v43, %s7907_s28 }
 0x3ae   : > { %v9270_v63 = vpop.permute.xlu1 %4795  ;;  %v9272_v16 = vpop.permute.xlu0 %5122 }
 0x3b0   : > { %6745 = vrot.lane.b32.xlu1 %v9166_v23, %s7907_s28  ;;  %s259_s28 = scalar_lea.vmem [#allocation5], %s7182_s26 }
 0x3b1   : > { %s7105_s29 = sshll.u32 %s259_s28, 4  ;;  %s9684_s29 = int_to_ptr.vmem [resolvable:$true] %s7105_s29 }
 0x3b2   : > { %v9276_v33 = vpop.permute.xlu1 %5124  ;;  %v9278_v14 = vpop.permute.xlu0 %5750  ;;  %s7828_s12 = scalar_lea.vmem %s9684_s29, 1024  ;;  %p7835_p2 = scmp.lt.s32.totalorder %s9684_s29, %s7833_s15 }
 0x3b3   : > { %v9284_v30 = vsel %vm2725_vm3, %v9248_v46, %v9278_v14  ;;  %p7829_p6 = scmp.ne.s32.totalorder %s9684_s29, %s7828_s12  ;;  %p7836_p3 = scmp.lt.s32.totalorder %s7834_s16, %s7828_s12 }
 0x3b5   : > { %p7830_p10 = pnand %p7829_p6, %p9985_p9  ;;  %p7837_p4 = por %p7836_p3, %p7835_p2 }
 0x3b6   : > { %v4148_v29 = vpop.permute.xlu0 %4147  ;;  %v4181_v37 = vpop.permute.xlu1 %4180 }
 0x3b7   : > { %p7831_p12 = pneg %p7830_p10 }
 0x3b9   : > { %p7838_p7 = pnand %p7837_p4, %p7831_p12 }
 0x3ba   : > { %v9286_v50 = vpop.permute.xlu0 %4789  ;;  %v4183_v24 = vpop.permute.xlu1 %4182 }
 0x3bb   : > { %v4201_v58 = vsel %vm1037_vm1, %v4183_v24, %v4185_v25  ;;  %v4202_v18 = vsel %vm1037_vm1, %v4181_v37, %v4183_v24 }
 0x3bc   : > { %v4205_v28 = vmul.f32 %v4202_v18, %v8221_v52  ;;  %v4206_v57 = vmul.f32 %v4201_v58, %v8249_v60 }
 0x3be   : > { %v9297_v4 = vpop.permute.xlu0 %5118  ;;  %4218 = vmatprep.subr.mxu0 %v4205_v28  ;;  %4290 = vmatpush1.msra.mxu1 %v4206_v57  ;;  %v4193_v1 = vpop.permute.xlu1 %4192 }
 0x3bf   : > { %7303 = vmatmul.mubr.msk.f32.vlgmr.msra.gmra.mrb[8].mxu1 %vm4214_vm2, %v7301_v41 }
 0x3c0   : > { %4495 = vmatprep.mubr.f32.mxu1 %v9849_v0 }
 0x3c2   : > { %v9301_v25 = vpop.permute.xlu0 %5744  ;;  %v4150_v24 = vpop.permute.xlu1 %4149 }
 0x3c6   : > { %v9303_v52 = vpop.permute.xlu0 %5746  ;;  %v4160_v60 = vpop.permute.xlu1 %4159 }
 0x3ca   : > { %v4195_v58 = vpop.permute.xlu0 %4194  ;;  %v4792_v18 = vpop.permute.xlu1 %4791 }
 0x3cb   : > { %v4196_v62 = vsel %vm1037_vm1, %v4193_v1, %v4195_v58  ;;  %v4203_v28 = vsel %vm1037_vm1, %v4195_v58, %v4181_v37 }
 0x3cc   : > { %v4204_v57 = vmul.f32 %v4203_v28, %v8428_v54  ;;  %v4211_v49 = vmul.f32 %v4196_v62, %v8431_v55  ;;  %v4167_v54 = vsel %vm1003_vm10, %v4152_v7, %v9264_v45 }
 0x3ce   : > { %v4162_v48 = vpop.permute.xlu0 %4161  ;;  %4219 = vmatpush1.msra.mxu0 %v4204_v57  ;;  %4431 = vmatprep.subr.mxu1 %v4211_v49  ;;  %v9311_v11 = vpop.permute.xlu1 %4801  ;;  %v4168_v49 = vsel %vm1003_vm10, %v4150_v24, %v4152_v7  ;;  %v4169_v57 = vsel %vm1003_vm10, %v4148_v29, %v4150_v24 }
 0x3cf   : > { %7302 = vmatmul.mubr.msk.f32.vlgmr.msra.gmra.mrb[8].mxu0 %vm4214_vm2, %v7301_v41  ;;  %v4163_v7 = vsel %vm1003_vm10, %v4160_v60, %v4162_v48 }
 0x3d0   : > { %4424 = vmatprep.mubr.f32.mxu0 %v9849_v0 }
 0x3d2   : > { %v4804_v40 = vpop.permute.xlu0 %4803  ;;  %v9315_v38 = vpop.permute.xlu1 %5120 }
 0x3d6   : > { %v9317_v3 = vpop.permute.xlu0 %5132  ;;  %v9319_v44 = vpop.permute.xlu1 %5130 }
 0x3da   : > { %v4191_v55 = vpop.permute.xlu0 %4190  ;;  %v4189_v62 = vpop.permute.xlu1 %4188 }
 0x3db   : > { %v4197_v37 = vsel %vm1037_vm1, %v4191_v55, %v4193_v1  ;;  %v4198_v58 = vsel %vm1037_vm1, %v4189_v62, %v4191_v55  ;;  %v4199_v28 = vsel %vm1037_vm1, %v4187_v8, %v4189_v62  ;;  %v4170_v1 = vsel %vm1003_vm10, %v4162_v48, %v4148_v29  ;;  %v9944_v62 = vld [vmem:[#allocation35_spill] sm:$0xff] }
 0x3dc   : > { %v4210_v12 = vmul.f32 %v4197_v37, %v8437_v2  ;;  %v4208_v19 = vmul.f32 %v4199_v28, %v8416_v51  ;;  %v4209_v53 = vmul.f32 %v4198_v58, %v8425_v15  ;;  %v4174_v55 = vmul.f32 %v4167_v54, %v8344_v5  ;;  %v9942_v5 = vld [vmem:[#allocation33_spill] sm:$0xff]  ;;  %v9945_v37 = vld [vmem:[#allocation36_spill] sm:$0xff] }
 0x3dd   : > { %v4809_v51 = vsel %vm1696_vm8, %v9266_v35, %v9270_v63  ;;  %v4172_v15 = vmul.f32 %v4169_v57, %v8381_v59  ;;  %v4173_v2 = vmul.f32 %v4168_v49, %v8391_v22  ;;  %v4171_v48 = vmul.f32 %v4170_v1, %v8459_v31  ;;  %v9946_v28 = vld [vmem:[#allocation40_spill] sm:$0xff] }
 0x3de   : > { %v9342_v27 = vpop.permute.xlu0 %5756  ;;  %4360 = vmatprep.subr.mxu0 %v4209_v53  ;;  %4432 = vmatpush1.msra.mxu1 %v4210_v12  ;;  %v4156_v8 = vpop.permute.xlu1 %4155  ;;  %v4178_v29 = vmul.f32 %v4163_v7, %v9942_v5  ;;  %v4179_v12 = vld [vmem:[%s9730_s4] sm:$0xff]  ;;  %v9943_v53 = vld [vmem:[#allocation37_spill] sm:$0xff]  ;;  %v5138_v1 = vsel %vm2050_vm6, %v9272_v16, %v9276_v33  ;;  %v7310_v5 = vld [vmem:[%s9730_s4 + $0x10] sm:$0xff] }
 0x3df   : > { %4361 = vmatpush1.msra.mxu0 %v4208_v19  ;;  %7305 = vmatmul.mubr.msk.f32.vlgmr.msra.gmra.mrb[10].mxu1 %vm4214_vm2, %v7301_v41  ;;  %v4816_v59 = vmul.f32 %v4809_v51, %v9943_v53  ;;  %v4166_v22 = vsel %vm1003_vm10, %v9264_v45, %v4156_v8  ;;  %v4811_v45 = vsel %vm1696_vm8, %v9286_v50, %v4792_v18  ;;  %v9948_v51 = vld [vmem:[#allocation39_spill] sm:$0xff] }
 0x3e0   : > { %4576 = vmatprep.subr.mxu1 %v4174_v55  ;;  %7304 = vmatmul.mubr.msk.f32.vlgmr.msra.gmra.mrb[10].mxu0 %vm4214_vm2, %v7301_v41  ;;  %v4810_v41 = vsel %vm1696_vm8, %v4792_v18, %v9266_v35  ;;  %v4805_v35 = vsel %vm1696_vm8, %v9311_v11, %v4804_v40  ;;  %v4175_v57 = vmul.f32 %v4166_v22, %v9946_v28  ;;  %v9947_v55 = vld [vmem:[#allocation38_spill] sm:$0xff] }
 0x3e1   : > { %4505 = vmatprep.subr.mxu0 %v4172_v15  ;;  %4577 = vmatpush1.msra.mxu1 %v4173_v2  ;;  %v9950_v2 = vld [vmem:[#allocation41_spill] sm:$0xff] }
 0x3e2   : > { %4506 = vmatpush1.msra.mxu0 %v4171_v48  ;;  %4718 = vmatprep.subr.mxu1 %v4178_v29  ;;  %v4158_v31 = vpop.permute.xlu0 %4157  ;;  %v4798_v19 = vpop.permute.xlu1 %4797  ;;  %v4820_v48 = vmul.f32 %v4805_v35, %v9950_v2  ;;  %v9951_v29 = vld [vmem:[#allocation22_spill] sm:$0xff]  ;;  %v9955_v35 = vld [vmem:[#allocation23_spill] sm:$0xff] }
 0x3e3   : > { %v4164_v24 = vsel %vm1003_vm10, %v4158_v31, %v4160_v60  ;;  %v4165_v54 = vsel %vm1003_vm10, %v4156_v8, %v4158_v31  ;;  %4640 = vmatprep.mubr.f32.mxu1 %v9849_v0  ;;  %4569 = vmatprep.mubr.f32.mxu0 %v9849_v0  ;;  %v4812_v60 = vsel %vm1696_vm8, %v4804_v40, %v9286_v50  ;;  %v9949_v50 = vld [vmem:[#allocation42_spill] sm:$0xff] }
 0x3e4   : > { %v4176_v49 = vmul.f32 %v4165_v54, %v9944_v62  ;;  %v4177_v58 = vmul.f32 %v4164_v24, %v9945_v37  ;;  %7307 = vmatmul.mubr.msk.f32.vlgmr.msra.gmra.mrb[8].mxu1 %vm4214_vm2, %v4179_v12  ;;  %7306 = vmatmul.mubr.msk.f32.vlgmr.msra.gmra.mrb[8].mxu0 %vm4214_vm2, %v4179_v12  ;;  %v4814_v8 = vmul.f32 %v4811_v45, %v9947_v55  ;;  %v9952_v54 = vld [vmem:[#allocation44_spill] sm:$0xff]  ;;  %v9953_v62 = vld [vmem:[#allocation46_spill] sm:$0xff] }
 0x3e5   : > { %4782 = vmatprep.mubr.f32.mxu1 %v9849_v0  ;;  %4711 = vmatprep.mubr.f32.mxu0 %v9849_v0  ;;  %v4815_v40 = vmul.f32 %v4810_v41, %v9948_v51  ;;  %v4813_v15 = vmul.f32 %v4812_v60, %v9949_v50  ;;  %v5145_v53 = vmul.f32 %v5138_v1, %v9951_v29 }
 0x3e6   : > { %v9386_v18 = vpop.permute.xlu0 %6075  ;;  %4647 = vmatprep.subr.mxu0 %v4176_v49  ;;  %4719 = vmatpush1.msra.mxu1 %v4177_v58  ;;  %v5127_v7 = vpop.permute.xlu1 %5126  ;;  %v9954_v49 = vld [vmem:[#allocation47_spill] sm:$0xff]  ;;  %v5765_v29 = vsel %vm2725_vm3, %v9303_v52, %v9248_v46 }
 0x3e7   : > { %4648 = vmatpush1.msra.mxu0 %v4175_v57  ;;  %4897 = vmatprep.subr.mxu1 %v4816_v59  ;;  %v4808_v59 = vsel %vm1696_vm8, %v9270_v63, %v4798_v19  ;;  %v5140_v63 = vsel %vm2050_vm6, %v9297_v4, %v9315_v38  ;;  %v9957_v57 = vld [vmem:[#allocation31_spill] sm:$0xff]  ;;  %v5137_v55 = vsel %vm2050_vm6, %v9276_v33, %v5127_v7 }
 0x3e8   : > { %7309 = vmatmul.mubr.msk.f32.vlgmr.msra.gmra.mrb[10].mxu1 %vm4214_vm2, %v4179_v12  ;;  %7308 = vmatmul.mubr.msk.f32.vlgmr.msra.gmra.mrb[10].mxu0 %vm4214_vm2, %v4179_v12  ;;  %v5139_v12 = vsel %vm2050_vm6, %v9315_v38, %v9272_v16  ;;  %v4817_v38 = vmul.f32 %v4808_v59, %v9954_v49  ;;  %v5143_v60 = vmul.f32 %v5140_v63, %v9955_v35  ;;  %v9961_v63 = vld [vmem:[#allocation27_spill] sm:$0xff] }
 0x3e9   : > { %4826 = vmatprep.subr.mxu0 %v4814_v8  ;;  %4898 = vmatpush1.msra.mxu1 %v4815_v40  ;;  %v7315_v40 = vld [vmem:[%s9730_s4 + $0x18] sm:$0xff] }
 0x3ea   : > { %4827 = vmatpush1.msra.mxu0 %v4813_v15  ;;  %5039 = vmatprep.subr.mxu1 %v4820_v48  ;;  %v4800_v22 = vpop.permute.xlu0 %4799  ;;  %v9405_v31 = vpop.permute.xlu1 %5752  ;;  %v9958_v15 = vld [vmem:[#allocation34_spill] sm:$0xff]  ;;  %v5146_v48 = vmul.f32 %v5137_v55, %v8499_v56 }
 0x3eb   : > { %v4806_v41 = vsel %vm1696_vm8, %v4800_v22, %v9311_v11  ;;  %v4807_v24 = vsel %vm1696_vm8, %v4798_v19, %v4800_v22  ;;  %4961 = vmatprep.mubr.f32.mxu1 %v9849_v0  ;;  %4890 = vmatprep.mubr.f32.mxu0 %v9849_v0  ;;  %v5141_v11 = vsel %vm2050_vm6, %v9317_v3, %v9297_v4  ;;  %v9956_v4 = vld [vmem:[#allocation24_spill] sm:$0xff] }
 0x3ec   : > { %v4818_v45 = vmul.f32 %v4807_v24, %v9952_v54  ;;  %v4819_v16 = vmul.f32 %v4806_v41, %v9953_v62  ;;  %7312 = vmatmul.mubr.msk.f32.vlgmr.msra.gmra.mrb[8].mxu1 %vm4214_vm2, %v7310_v5  ;;  %7311 = vmatmul.mubr.msk.f32.vlgmr.msra.gmra.mrb[8].mxu0 %vm4214_vm2, %v7310_v5  ;;  %v5134_v19 = vsel %vm2050_vm6, %v9319_v44, %v9317_v3 }
 0x3ed   : > { %5103 = vmatprep.mubr.f32.mxu1 %v9849_v0  ;;  %5032 = vmatprep.mubr.f32.mxu0 %v9849_v0  ;;  %v5144_v28 = vmul.f32 %v5139_v12, %v9956_v4  ;;  %v5142_v3 = vmul.f32 %v5141_v11, %v9957_v57  ;;  %v5149_v1 = vmul.f32 %v5134_v19, %v8434_v61  ;;  %v9960_v12 = vld [vmem:[#allocation15_spill] sm:$0xff]  ;;  %v7330_v11 = vld [vmem:[%s9730_s4 + $0x30] sm:$0xff] }
 0x3ee   : > { %v9437_v37 = vpop.permute.xlu0 %6079  ;;  %4968 = vmatprep.subr.mxu0 %v4818_v45  ;;  %5040 = vmatpush1.msra.mxu1 %v4819_v16  ;;  %v9439_v58 = vpop.permute.xlu1 %5758  ;;  %v5763_v56 = vsel %vm2725_vm3, %v9278_v14, %v9405_v31 }
 0x3ef   : > { %4969 = vmatpush1.msra.mxu0 %v4817_v38  ;;  %5226 = vmatprep.subr.mxu1 %v5145_v53  ;;  %v5771_v14 = vmul.f32 %v5763_v56, %v8367_v34  ;;  %v9962_v38 = vld [vmem:[#allocation17_spill] sm:$0xff] }
 0x3f0   : > { %7314 = vmatmul.mubr.msk.f32.vlgmr.msra.gmra.mrb[10].mxu1 %vm4214_vm2, %v7310_v5  ;;  %7313 = vmatmul.mubr.msk.f32.vlgmr.msra.gmra.mrb[10].mxu0 %vm4214_vm2, %v7310_v5 }
 0x3f1   : > { %5155 = vmatprep.subr.mxu0 %v5143_v60  ;;  %5227 = vmatpush1.msra.mxu1 %v5144_v28  ;;  %v9964_v60 = vld [vmem:[#allocation43_spill] sm:$0xff] }
 0x3f2   : > { %5156 = vmatpush1.msra.mxu0 %v5142_v3  ;;  %5368 = vmatprep.subr.mxu1 %v5149_v1  ;;  %v5129_v8 = vpop.permute.xlu0 %5128  ;;  %v9450_v51 = vpop.permute.xlu1 %6077 }
 0x3f3   : > { %v5135_v61 = vsel %vm2050_vm6, %v5129_v8, %v9319_v44  ;;  %v5136_v50 = vsel %vm2050_vm6, %v5127_v7, %v5129_v8  ;;  %5290 = vmatprep.mubr.f32.mxu1 %v9849_v0  ;;  %5219 = vmatprep.mubr.f32.mxu0 %v9849_v0  ;;  %v6094_v28 = vsel %vm3079_vm0, %v9386_v18, %v9450_v51 }
 0x3f4   : > { %v5147_v33 = vmul.f32 %v5136_v50, %v8444_v32  ;;  %v5148_v2 = vmul.f32 %v5135_v61, %v9958_v15  ;;  %7317 = vmatmul.mubr.msk.f32.vlgmr.msra.gmra.mrb[8].mxu1 %vm4214_vm2, %v7315_v40  ;;  %7316 = vmatmul.mubr.msk.f32.vlgmr.msra.gmra.mrb[8].mxu0 %vm4214_vm2, %v7315_v40  ;;  %v9967_v61 = vld [vmem:[#allocation10_spill] sm:$0xff] }
 0x3f5   : > { %5432 = vmatprep.mubr.f32.mxu1 %v9849_v0  ;;  %5361 = vmatprep.mubr.f32.mxu0 %v9849_v0 }
 0x3f6   : > { %v9467_v5 = vpop.permute.xlu0 %6073  ;;  %5297 = vmatprep.subr.mxu0 %v5147_v33  ;;  %5369 = vmatpush1.msra.mxu1 %v5148_v2  ;;  %v9469_v44 = vpop.permute.xlu1 %6081  ;;  %v9968_v33 = vld [vmem:[#allocation8_spill] sm:$0xff] }
 0x3f7   : > { %5298 = vmatpush1.msra.mxu0 %v5146_v48  ;;  %5523 = vmatprep.subr.mxu1 %v9122_v21  ;;  %v7320_v21 = vld [vmem:[%s9730_s4 + $0x20] sm:$0xff] }
 0x3f8   : > { %7319 = vmatmul.mubr.msk.f32.vlgmr.msra.gmra.mrb[10].mxu1 %vm4214_vm2, %v7315_v40  ;;  %7318 = vmatmul.mubr.msk.f32.vlgmr.msra.gmra.mrb[10].mxu0 %vm4214_vm2, %v7315_v40  ;;  %v9969_v2 = vld [vmem:[#allocation16_spill] sm:$0xff] }
 0x3f9   : > { %5452 = vmatprep.subr.mxu0 %v9146_v42  ;;  %5524 = vmatpush1.msra.mxu1 %v9116_v13  ;;  %v5766_v13 = vsel %vm2725_vm3, %v9301_v25, %v9303_v52  ;;  %v5769_v42 = vmul.f32 %v5765_v29, %v8406_v9  ;;  %v9959_v52 = vld [vmem:[#allocation30_spill] sm:$0xff] }
 0x3fa   : > { %v9482_v32 = vpop.permute.xlu0 %6085  ;;  %v6088_v7 = vpop.permute.xlu1 %6087  ;;  %5453 = vmatpush1.msra.mxu0 %v9140_v17  ;;  %5665 = vmatprep.subr.mxu1 %v9166_v23  ;;  %v5767_v17 = vsel %vm2725_vm3, %v9439_v58, %v9301_v25  ;;  %v5768_v9 = vmul.f32 %v5766_v13, %v8558_v20  ;;  %v6093_v25 = vsel %vm3079_vm0, %v9450_v51, %v9437_v37  ;;  %v9966_v51 = vld [vmem:[#allocation20_spill] sm:$0xff]  ;;  %v9970_v13 = vld [vmem:[#allocation14_spill] sm:$0xff] }
 0x3fb   : > { %5587 = vmatprep.mubr.f32.mxu1 %v9849_v0  ;;  %5594 = vmatprep.subr.mxu0 %v9186_v43  ;;  %v5770_v43 = vmul.f32 %v9284_v30, %v8409_v10  ;;  %v5775_v46 = vmul.f32 %v5767_v17, %v8529_v36  ;;  %v6092_v10 = vsel %vm3079_vm0, %v9437_v37, %v9469_v44  ;;  %v7325_v30 = vld [vmem:[%s9730_s4 + $0x28] sm:$0xff] }
 0x3fc   : > { %5516 = vmatprep.mubr.f32.mxu0 %v9849_v0  ;;  %7322 = vmatmul.mubr.msk.f32.vlgmr.msra.gmra.mrb[8].mxu1 %vm4214_vm2, %v7320_v21  ;;  %v6100_v53 = vmul.f32 %v6092_v10, %v9959_v52  ;;  %v6096_v59 = vsel %vm3079_vm0, %v6088_v7, %v9467_v5  ;;  %v6099_v41 = vmul.f32 %v6093_v25, %v9960_v12  ;;  %v9971_v17 = vld [vmem:[#allocation29_spill] sm:$0xff]  ;;  %v9975_v25 = vld [vmem:[#allocation19_spill] sm:$0xff] }
 0x3fd   : > { %5666 = vmatpush1.msra.mxu1 %v9152_v26  ;;  %7321 = vmatmul.mubr.msk.f32.vlgmr.msra.gmra.mrb[8].mxu0 %vm4214_vm2, %v7320_v21  ;;  %v5760_v26 = vsel %vm2725_vm3, %v9342_v27, %v9439_v58  ;;  %v6089_v24 = vsel %vm3079_vm0, %v9482_v32, %v6088_v7  ;;  %v6104_v54 = vmul.f32 %v6096_v59, %v9961_v63  ;;  %v9963_v58 = vld [vmem:[#allocation45_spill] sm:$0xff]  ;;  %v7335_v7 = vld [vmem:[%s9730_s4 + $0x38] sm:$0xff] }
 0x3fe   : > { %v9509_v34 = vpop.permute.xlu0 %6404  ;;  %v9511_v23 = vpop.permute.xlu1 %6406  ;;  %5595 = vmatpush1.msra.mxu0 %v9184_v39  ;;  %5852 = vmatprep.subr.mxu1 %v5771_v14  ;;  %v5774_v36 = vmul.f32 %v5760_v26, %v8611_v47  ;;  %v6103_v37 = vmul.f32 %v6089_v24, %v9962_v38  ;;  %v6098_v40 = vmul.f32 %v6094_v28, %v9966_v51  ;;  %v9977_v63 = vld [vmem:[#allocation13_spill] sm:$0xff] }
 0x3ff   : > { %5781 = vmatprep.subr.mxu0 %v5769_v42  ;;  %5729 = vmatprep.mubr.f32.mxu1 %v9849_v0 }
 0x400   : > { %5658 = vmatprep.mubr.f32.mxu0 %v9849_v0  ;;  %7324 = vmatmul.mubr.msk.f32.vlgmr.msra.gmra.mrb[10].mxu1 %vm4214_vm2, %v7320_v21 }
 0x401   : > { %5853 = vmatpush1.msra.mxu1 %v5770_v43  ;;  %7323 = vmatmul.mubr.msk.f32.vlgmr.msra.gmra.mrb[10].mxu0 %vm4214_vm2, %v7320_v21  ;;  %v6423_v21 = vsel %vm3433_vm14, %v9509_v34, %v9511_v23 }
 0x402   : > { %v6409_v20 = vpop.permute.xlu0 %6408  ;;  %v9530_v39 = vpop.permute.xlu1 %6410  ;;  %5782 = vmatpush1.msra.mxu0 %v5768_v9  ;;  %5994 = vmatprep.subr.mxu1 %v5775_v46  ;;  %v9972_v9 = vld [vmem:[#allocation28_spill] sm:$0xff] }
 0x403   : > { %5916 = vmatprep.mubr.f32.mxu1 %v9849_v0  ;;  %5845 = vmatprep.mubr.f32.mxu0 %v9849_v0  ;;  %v6421_v45 = vsel %vm3433_vm14, %v6409_v20, %v9530_v39  ;;  %v6422_v57 = vsel %vm3433_vm14, %v9511_v23, %v6409_v20 }
 0x404   : > { %7327 = vmatmul.mubr.msk.f32.vlgmr.msra.gmra.mrb[8].mxu1 %vm4214_vm2, %v7325_v30  ;;  %v6428_v50 = vmul.f32 %v6422_v57, %v9967_v61 }
 0x405   : > { %5995 = vmatpush1.msra.mxu1 %v5774_v36  ;;  %6058 = vmatprep.mubr.f32.mxu1 %v9849_v0 }
 0x406   : > { %v6403_v22 = vpop.permute.xlu0 %6402  ;;  %v6417_v47 = vpop.permute.xlu1 %6416  ;;  %6181 = vmatprep.subr.mxu1 %v6100_v53  ;;  %7326 = vmatmul.mubr.msk.f32.vlgmr.msra.gmra.mrb[8].mxu0 %vm4214_vm2, %v7325_v30  ;;  %v9976_v53 = vld [vmem:[#allocation11_spill] sm:$0xff] }
 0x407   : > { %5987 = vmatprep.mubr.f32.mxu0 %v9849_v0  ;;  %v6425_v1 = vsel %vm3433_vm14, %v6417_v47, %v6403_v22  ;;  %v6424_v23 = vsel %vm3433_vm14, %v6403_v22, %v9509_v34 }
 0x408   : > { %7329 = vmatmul.mubr.msk.f32.vlgmr.msra.gmra.mrb[10].mxu1 %vm4214_vm2, %v7325_v30  ;;  %v6433_v48 = vmul.f32 %v6425_v1, %v9969_v2  ;;  %v9983_v1 = vld [vmem:[#allocation25_spill] sm:$0xff] }
 0x409   : > { %6182 = vmatpush1.msra.mxu1 %v6099_v41  ;;  %6245 = vmatprep.mubr.f32.mxu1 %v9849_v0 }
 0x40a   : > { %v9559_v62 = vpop.permute.xlu0 %6414  ;;  %v5755_v16 = vpop.permute.xlu1 %5754  ;;  %6323 = vmatprep.subr.mxu1 %v6104_v54 }
 0x40b   : > { %v5761_v19 = vsel %vm2725_vm3, %v5755_v16, %v9342_v27  ;;  %v5762_v49 = vsel %vm2725_vm3, %v9405_v31, %v5755_v16  ;;  %v9965_v27 = vld [vmem:[#allocation18_spill] sm:$0xff]  ;;  %v6095_v31 = vsel %vm3079_vm0, %v9467_v5, %v9386_v18  ;;  %v6418_v18 = vsel %vm3433_vm14, %v9559_v62, %v6417_v47  ;;  %v7340_v47 = vld [vmem:[%s9730_s4 + $0x40] sm:$0xff] }
 0x40c   : > { %v5772_v35 = vmul.f32 %v5762_v49, %v9963_v58  ;;  %v5773_v4 = vmul.f32 %v5761_v19, %v9964_v60  ;;  %v6429_v3 = vmul.f32 %v6421_v45, %v9965_v27  ;;  %7332 = vmatmul.mubr.msk.f32.vlgmr.msra.gmra.mrb[8].mxu1 %vm4214_vm2, %v7330_v11  ;;  %v6097_v15 = vmul.f32 %v6095_v31, %v9968_v33  ;;  %v9978_v45 = vld [vmem:[#allocation12_spill] sm:$0xff] }
 0x40d   : > { %6324 = vmatpush1.msra.mxu1 %v6103_v37  ;;  %6387 = vmatprep.mubr.f32.mxu1 %v9849_v0  ;;  %v6432_v42 = vmul.f32 %v6418_v18, %v9970_v13  ;;  %v9980_v37 = vld [vmem:[#allocation48_spill] sm:$0xff] }
 0x40e   : > { %v6734_v55 = vpop.permute.xlu0 %6733  ;;  %5923 = vmatprep.subr.mxu0 %v5773_v4  ;;  %v6736_v8 = vpop.permute.xlu1 %6735  ;;  %6510 = vmatprep.subr.mxu1 %v6429_v3  ;;  %v9982_v3 = vld [vmem:[#allocation49_spill] sm:$0xff] }
 0x40f   : > { %5924 = vmatpush1.msra.mxu0 %v5772_v35  ;;  %v6752_v12 = vsel %vm3787_vm11, %v6734_v55, %v6736_v8  ;;  %v9981_v35 = vld [vmem:[#allocation50_spill] sm:$0xff] }
 0x410   : > { %7334 = vmatmul.mubr.msk.f32.vlgmr.msra.gmra.mrb[10].mxu1 %vm4214_vm2, %v7330_v11  ;;  %7328 = vmatmul.mubr.msk.f32.vlgmr.msra.gmra.mrb[10].mxu0 %vm4214_vm2, %v7325_v30  ;;  %v9974_v30 = vld [vmem:[#allocation9_spill] sm:$0xff] }
 0x411   : > { %6511 = vmatpush1.msra.mxu1 %v6428_v50  ;;  %6110 = vmatprep.subr.mxu0 %v6098_v40  ;;  %v6426_v34 = vmul.f32 %v6424_v23, %v9974_v30 }
 0x412   : > { %v6738_v5 = vpop.permute.xlu0 %6737  ;;  %v6084_v56 = vpop.permute.xlu1 %6083  ;;  %6652 = vmatprep.subr.mxu1 %v6433_v48  ;;  %6111 = vmatpush1.msra.mxu0 %v6097_v15 }
 0x413   : > { %v6090_v29 = vsel %vm3079_vm0, %v6084_v56, %v9482_v32  ;;  %v6091_v14 = vsel %vm3079_vm0, %v9469_v44, %v6084_v56  ;;  %6574 = vmatprep.mubr.f32.mxu1 %v9849_v0  ;;  %6174 = vmatprep.mubr.f32.mxu0 %v9849_v0  ;;  %v9973_v32 = vld [vmem:[#allocation21_spill] sm:$0xff]  ;;  %v6751_v46 = vsel %vm3787_vm11, %v6736_v8, %v6738_v5  ;;  %v9984_v8 = vld [vmem:[#allocation26_spill] sm:$0xff] }
 0x414   : > { %v6101_v43 = vmul.f32 %v6091_v14, %v9971_v17  ;;  %v6102_v26 = vmul.f32 %v6090_v29, %v9972_v9  ;;  %7337 = vmatmul.mubr.msk.f32.vlgmr.msra.gmra.mrb[8].mxu1 %vm4214_vm2, %v7335_v7  ;;  %7331 = vmatmul.mubr.msk.f32.vlgmr.msra.gmra.mrb[8].mxu0 %vm4214_vm2, %v7330_v11  ;;  %v6427_v44 = vmul.f32 %v6423_v21, %v9973_v32 }
 0x415   : > { %6653 = vmatpush1.msra.mxu1 %v6432_v42  ;;  %6316 = vmatprep.mubr.f32.mxu0 %v9849_v0  ;;  %v6757_v59 = vmul.f32 %v6751_v46, %v9976_v53 }
 0x416   : > { %6252 = vmatprep.subr.mxu0 %v6102_v26  ;;  %v6740_v10 = vpop.permute.xlu1 %6739  ;;  %v6732_v36 = vpop.permute.xlu0 %6731  ;;  %6716 = vmatprep.mubr.f32.mxu1 %v9849_v0 }
 0x417   : > { %v6750_v20 = vsel %vm3787_vm11, %v6738_v5, %v6740_v10  ;;  %6253 = vmatpush1.msra.mxu0 %v6101_v43 }
 0x418   : > { %v6758_v52 = vmul.f32 %v6750_v20, %v9975_v25  ;;  %6439 = vmatprep.subr.mxu0 %v6427_v44  ;;  %7333 = vmatmul.mubr.msk.f32.vlgmr.msra.gmra.mrb[10].mxu0 %vm4214_vm2, %v7330_v11  ;;  %v6753_v11 = vsel %vm3787_vm11, %v6732_v36, %v6734_v55 }
 0x419   : > { %7339 = vmatmul.mubr.msk.f32.vlgmr.msra.gmra.mrb[10].mxu1 %vm4214_vm2, %v7335_v7  ;;  %6440 = vmatpush1.msra.mxu0 %v6426_v34  ;;  %v6755_v58 = vmul.f32 %v6753_v11, %v9980_v37 }
 0x41a   : > { %6839 = vmatprep.subr.mxu1 %v6758_v52  ;;  %v6413_v22 = vpop.permute.xlu1 %6412  ;;  %6503 = vmatprep.mubr.f32.mxu0 %v9849_v0  ;;  %v6744_v49 = vpop.permute.xlu0 %6743 }
 0x41b   : > { %v6419_v41 = vsel %vm3433_vm14, %v6413_v22, %v9559_v62  ;;  %v6420_v24 = vsel %vm3433_vm14, %v9530_v39, %v6413_v22  ;;  %6840 = vmatpush1.msra.mxu1 %v6757_v59  ;;  %6903 = vmatprep.mubr.f32.mxu1 %v9849_v0  ;;  %v9979_v62 = vld [vmem:[#allocation32_spill] sm:$0xff] }
 0x41c   : > { %v6430_v54 = vmul.f32 %v6420_v24, %v9977_v63  ;;  %v6431_v16 = vmul.f32 %v6419_v41, %v9978_v45  ;;  %7336 = vmatmul.mubr.msk.f32.vlgmr.msra.gmra.mrb[8].mxu0 %vm4214_vm2, %v7335_v7  ;;  %v6756_v19 = vmul.f32 %v6752_v12, %v9979_v62 }
 0x41d   : > { %7342 = vmatmul.mubr.msk.f32.vlgmr.msra.gmra.mrb[8].mxu1 %vm4214_vm2, %v7340_v47  ;;  %6645 = vmatprep.mubr.f32.mxu0 %v9849_v0 }
 0x41e   : > { %6581 = vmatprep.subr.mxu0 %v6431_v16  ;;  %v6742_v39 = vpop.permute.xlu1 %6741  ;;  %7045 = vmatprep.mubr.f32.mxu1 %v9849_v0 }
 0x41f   : > { %v6748_v38 = vsel %vm3787_vm11, %v6742_v39, %v6744_v49  ;;  %6582 = vmatpush1.msra.mxu0 %v6430_v54  ;;  %v6749_v4 = vsel %vm3787_vm11, %v6740_v10, %v6742_v39 }
 0x420   : > { %v6760_v60 = vmul.f32 %v6748_v38, %v9981_v35  ;;  %6768 = vmatprep.subr.mxu0 %v6756_v19  ;;  %7338 = vmatmul.mubr.msk.f32.vlgmr.msra.gmra.mrb[10].mxu0 %vm4214_vm2, %v7335_v7  ;;  %v6759_v31 = vmul.f32 %v6749_v4, %v9982_v3 }
 0x421   : > { %6769 = vmatpush1.msra.mxu0 %v6755_v58  ;;  %6832 = vmatprep.mubr.f32.mxu0 %v9849_v0 }
 0x422   : > { %v6746_v28 = vpop.permute.xlu1 %6745  ;;  %6910 = vmatprep.subr.mxu0 %v6760_v60 }
 0x423   : > { %v6747_v57 = vsel %vm3787_vm11, %v6744_v49, %v6746_v28  ;;  %v6754_v27 = vsel %vm3787_vm11, %v6746_v28, %v6732_v36 }
 0x424   : > { %v6761_v55 = vmul.f32 %v6747_v57, %v9983_v1  ;;  %v6762_v51 = vmul.f32 %v6754_v27, %v9984_v8  ;;  %7341 = vmatmul.mubr.msk.f32.vlgmr.msra.gmra.mrb[8].mxu0 %vm4214_vm2, %v7340_v47 }
 0x425   : > { %6911 = vmatpush1.msra.mxu0 %v6759_v31  ;;  %6974 = vmatprep.mubr.f32.mxu0 %v9849_v0 }
 0x426   : > { %6981 = vmatprep.subr.mxu1 %v6762_v51 }
 0x427   : > { %6982 = vmatpush1.msra.mxu1 %v6761_v55 }
 0x428   : > { %7344 = vmatmul.mubr.msk.f32.vlgmr.msra.gmra.mrb[10].mxu1 %vm4214_vm2, %v7340_v47  ;;  %7343 = vmatmul.mubr.msk.f32.vlgmr.msra.gmra.mrb[10].mxu0 %vm4214_vm2, %v7340_v47 }
 0x42b   : > { %v7064_v6 = vpop.permute.xlu0 %7063 }
 0x4f0   : > { %v6905_v40 = vpop.f32.mrb[8].mxu1 }
 0x4f1   : > { %v7068_v61 = vadd.f32 %v7064_v6, %v6905_v40  ;;  %v6907_v50 = vpop.f32.mrb[9].mxu1 }
 0x4f2   : > { %v7069_v33 = vadd.f32 %v7064_v6, %v6907_v50 }
 0x4f3   : > { %v7076_v15 = vmax.f32 %v7068_v61, 0.0 }
 0x4f4   : > { %v7077_v2 = vmax.f32 %v7069_v33, 0.0 }
 0x4f5   : > { %7084 = vst [vmem:[%s259_s28 + $0x10] sm:$0xff] %v7076_v15 }
 0x4f6   : > { %7085 = vst [vmem:[%s259_s28 + $0x18] sm:$0xff] %v7077_v2 }
 0x4f7   : > { %v6834_v0 = vpop.f32.mrb[8].mxu0 }
 0x4f8   : > { %v7066_v48 = vadd.f32 %v7064_v6, %v6834_v0  ;;  %v6836_v18 = vpop.f32.mrb[9].mxu0 }
 0x4f9   : > { %v7067_v5 = vadd.f32 %v7064_v6, %v6836_v18 }
 0x4fa   : > { %v7074_v56 = vmax.f32 %v7066_v48, 0.0 }
 0x4fb   : > { %v7047_v7 = vpop.f32.mrb[10].mxu1  ;;  %v7075_v21 = vmax.f32 %v7067_v5, 0.0  ;;  %v6976_v29 = vpop.f32.mrb[10].mxu0 }
 0x4fc   : > { %v7072_v14 = vadd.f32 %v7064_v6, %v7047_v7  ;;  %v7049_v13 = vpop.f32.mrb[11].mxu1  ;;  %7082 = vst [vmem:[%s259_s28] sm:$0xff] %v7074_v56  ;;  %v7070_v42 = vadd.f32 %v7064_v6, %v6976_v29  ;;  %v6978_v17 = vpop.f32.mrb[11].mxu0 }
 0x4fd   : > { %v7073_v43 = vadd.f32 %v7064_v6, %v7049_v13  ;;  %7083 = vst [vmem:[%s259_s28 + $0x8] sm:$0xff] %v7075_v21  ;;  %v7071_v26 = vadd.f32 %v7064_v6, %v6978_v17 }
 0x4fe   : > { %v7080_v9 = vmax.f32 %v7072_v14, 0.0  ;;  %v7078_v23 = vmax.f32 %v7070_v42, 0.0 }
 0x4ff   : > { %v7081_v32 = vmax.f32 %v7073_v43, 0.0  ;;  %v7079_v44 = vmax.f32 %v7071_v26, 0.0 }
 0x500   : > { %7088 = vst [vmem:[%s259_s28 + $0x30] sm:$0xff] %v7080_v9  ;;  %7086 = vst [vmem:[%s259_s28 + $0x20] sm:$0xff] %v7078_v23 }
 0x501   : > { %7089 = vst [vmem:[%s259_s28 + $0x38] sm:$0xff] %v7081_v32  ;;  %7087 = vst [vmem:[%s259_s28 + $0x28] sm:$0xff] %v7079_v44 }
 0x502   : > { %7841 = shalt.err (!%p7838_p7)
}
 0x503   : > { %s7842_s17 = scalar_lea.hbm %s9682_s11, 1024  ;;  %s7846_s20 = scalar_lea.hbm %s9732_s6, 2048 }
 0x504   : > { %p7843_p8 = scmp.ne.s32.totalorder %s9682_s11, %s7842_s17  ;;  %p7847_p1 = scmp.lt.u32.totalorder %s9682_s11, %s9732_s6 }
 0x505   : > { %p7848_p0 = scmp.lt.u32.totalorder %s7846_s20, %s7842_s17  ;;  %p7850_p6 = scmp.lt.u32.totalorder %s7842_s17, %s9682_s11 }
 0x506   : > { %p7844_p11 = pnand %p7843_p8, %p9985_p9 }
 0x507   : > { %p7849_p5 = por %p7848_p0, %p7847_p1 }
 0x508   : > { %p7845_p13 = pneg %p7844_p11 }
 0x509   : > { %p7851_p10 = por %p7850_p6, %p7849_p5 }
 0x50b   : > { %p7852_p12 = pnand %p7851_p10, %p7845_p13 }
 0x50d   : > { %7855 = shalt.err (!%p7852_p12)
}
 0x50e   : > { %7740 = dma.vmem_to_hbm [thread:$0]  (%p9985_p9), %s9684_s29, 1024, %s9682_s11, %s7091_s25  }
 0x50f PF: > { %p7752_p2 = scmp.ge.s32.totalorder %s7894_s24, 2  ;;  %s7117_s14 = sand.u32 1, %s7882_s21  }
 0x510   : > { %p9986_p3 = scmp.ne.s32.totalorder %s9814_s8, 0  ;;  %s7118_s10 = scalar_lea.sflag [#allocation4], %s7117_s14 }
 0x512   : > { %p7747_p4 = pnand %p7752_p2, %p9986_p3 }
 0x514   : > { %7877 = dma.done.wait (!%p7747_p4), %s7118_s10, 1024  }
 0x515   : > { %7879 = vsyncadd (!%p7747_p4), %s7118_s10, 4294966272  ;;  %p17_p7 = scmp.ge.s32.totalorder %s7970_s27, 4   ;;  %s9987_s21 = smov %s7886_s22 }
 0x516   : > { %s9988_s22 = smov %s7890_s23  ;;  %s9989_s23 = smov %s7981_s30 }
 0x517   : > { %s9990_s24 = smov %s7970_s27  ;;  %19 = sbr.rel (!%p17_p7) target bundleno = 4 (0x4), region = 100 }
 0x51e   :  { %7123 = vsyncpa [#allocation3], 1 }
 0x51f   :  { %7125 = vsyncpa [#allocation3 + $0x1], 1 }
 0x520   :  { %7126 = vsyncpa [#allocation4], 1 }
 0x521   :  { %7128 = vsyncpa [#allocation4 + $0x1], 1 }

</bundles_post_ra>
